<compile_context>
chip_gen: v6e
topology: v6e:2x2x1
jax: 0.10.0
libtpu: 0.0.40
codegen_flags: <defaults>
</compile_context>

<pallas_src>
import jax
import jax.numpy as jnp
from jax.experimental import pallas as pl
from jax.experimental.pallas import tpu as pltpu

IN_DIM = 784
IN_PAD = 896       # 7 * 128 — lane-dense K for fc1
H1 = 512
H2 = 256
OUT_DIM = 10
OUT_PAD = 128      # lane-dense class dim / output stores
NEG_LARGE = -1e30  # bias for padded logit columns -> softmax prob ~ 0

DEFAULT_TILE_B = 512


def _round_up(n, m):
    return ((n + m - 1) // m) * m


def discriminator_kernel(x_ref, w1_ref, b1_ref, w2_ref, b2_ref,
                         w3_ref, b3_ref, o_ref):
    # fc1: Linear(896 -> 512) + ReLU   (bf16 MXU operands, f32 accumulation)
    h1 = jnp.dot(x_ref[...], w1_ref[...], preferred_element_type=jnp.float32)
    h1 = jnp.maximum(h1 + b1_ref[...], 0.0)

    # fc2: Linear(512 -> 256) + ReLU
    h2 = jnp.dot(h1.astype(jnp.bfloat16), w2_ref[...],
                 preferred_element_type=jnp.float32)
    h2 = jnp.maximum(h2 + b2_ref[...], 0.0)

    # fc3: Linear(256 -> 128 padded) + Softmax over classes
    logits = jnp.dot(h2.astype(jnp.bfloat16), w3_ref[...],
                     preferred_element_type=jnp.float32)
    logits = logits + b3_ref[...]          # padded cols carry -1e30 bias
    m = jnp.max(logits, axis=-1, keepdims=True)
    e = jnp.exp(logits - m)
    denom = jnp.sum(e, axis=-1, keepdims=True)
    inv = pl.reciprocal(denom, approx=True)   # EUP slot, frees VALU
    o_ref[...] = (e * inv).astype(o_ref.dtype)


def discriminator_forward(x, params, tile_b=DEFAULT_TILE_B):
    """x: any shape flattening to (-1, 784), like the PyTorch forward."""
    w1, b1, w2, b2, w3, b3 = params
    x2d = x.reshape(-1, IN_DIM).astype(jnp.float32)   # glue: x.view(-1, 784)
    B = x2d.shape[0]

    # Tile sizing: cap at a 128-multiple of B so small batches use one tile.
    tile_b = min(tile_b, _round_up(B, 128))
    b_pad = _round_up(B, tile_b)
    grid = (b_pad // tile_b,)

    # Host-side padding / dtype prep (MXU operands -> bf16, biases stay f32).
    x_p = jnp.pad(x2d, ((0, b_pad - B), (0, IN_PAD - IN_DIM))).astype(jnp.bfloat16)
    w1_p = jnp.pad(w1.astype(jnp.float32),
                   ((0, IN_PAD - IN_DIM), (0, 0))).astype(jnp.bfloat16)
    w2_p = w2.astype(jnp.bfloat16)
    w3_p = jnp.pad(w3.astype(jnp.float32),
                   ((0, 0), (0, OUT_PAD - OUT_DIM))).astype(jnp.bfloat16)
    b1_p = b1.reshape(1, H1).astype(jnp.float32)
    b2_p = b2.reshape(1, H2).astype(jnp.float32)
    b3_p = jnp.pad(b3.reshape(1, OUT_DIM).astype(jnp.float32),
                   ((0, 0), (0, OUT_PAD - OUT_DIM)),
                   constant_values=NEG_LARGE)

    out = pl.pallas_call(
        discriminator_kernel,
        out_shape=jax.ShapeDtypeStruct((b_pad, OUT_PAD), jnp.float32),
        grid_spec=pltpu.PrefetchScalarGridSpec(
            num_scalar_prefetch=0,
            grid=grid,
            in_specs=[
                # batch-tiled activations (double-buffered across grid steps)
                pl.BlockSpec((tile_b, IN_PAD), lambda i: (i, 0)),
                # weights/biases: constant index_map -> resident in VMEM
                pl.BlockSpec((IN_PAD, H1), lambda i: (0, 0)),
                pl.BlockSpec((1, H1), lambda i: (0, 0)),
                pl.BlockSpec((H1, H2), lambda i: (0, 0)),
                pl.BlockSpec((1, H2), lambda i: (0, 0)),
                pl.BlockSpec((H2, OUT_PAD), lambda i: (0, 0)),
                pl.BlockSpec((1, OUT_PAD), lambda i: (0, 0)),
            ],
            out_specs=pl.BlockSpec((tile_b, OUT_PAD), lambda i: (i, 0)),
        ),
        compiler_params=pltpu.CompilerParams(
            dimension_semantics=("parallel",)),
    )(x_p, w1_p, b1_p, w2_p, b2_p, w3_p, b3_p)

    return out[:B, :OUT_DIM]


def discriminator_reference(x, params):
    """Pure-JAX f32 reference for correctness checking."""
    w1, b1, w2, b2, w3, b3 = params
    x2d = x.reshape(-1, IN_DIM).astype(jnp.float32)
    h1 = jnp.maximum(x2d @ w1 + b1.reshape(1, -1), 0.0)
    h2 = jnp.maximum(h1 @ w2 + b2.reshape(1, -1), 0.0)
    logits = h2 @ w3 + b3.reshape(1, -1)
    return jax.nn.softmax(logits, axis=-1)


def init_params(key):
    """Deterministic synthetic init (uniform fan-in scaling, like nn.Linear)."""
    ks = jax.random.split(key, 6)

    def lin(kw, kb, fan_in, fan_out):
        bound = 1.0 / jnp.sqrt(fan_in)
        w = jax.random.uniform(kw, (fan_in, fan_out), jnp.float32, -bound, bound)
        b = jax.random.uniform(kb, (1, fan_out), jnp.float32, -bound, bound)
        return w, b

    w1, b1 = lin(ks[0], ks[1], IN_DIM, H1)
    w2, b2 = lin(ks[2], ks[3], H1, H2)
    w3, b3 = lin(ks[4], ks[5], H2, OUT_DIM)
    return (w1, b1, w2, b2, w3, b3)


if __name__ == "__main__":
    key = jax.random.PRNGKey(0)
    k_param, k_x = jax.random.split(key)

    params = init_params(k_param)
    # Small MNIST-like batch: (B=8, C=1, H=28, W=28) -> flattened to (8, 784).
    x = jax.random.normal(k_x, (8, 1, 28, 28), dtype=jnp.float32)

    out = discriminator_forward(x, params)
    out = jax.block_until_ready(out)

    assert out.shape == (8, OUT_DIM)
    # softmax rows sum to ~1 (approx reciprocal + bf16 matmuls => loose tol)
    assert jnp.allclose(jnp.sum(out, axis=-1), 1.0, atol=1e-2)
    # matches the f32 reference within bf16 tolerance
    ref = discriminator_reference(x, params)
    assert jnp.allclose(out, ref, atol=2e-2, rtol=2e-2)
    print("KERNEL_OK")
</pallas_src>

<mosaic_0001>
module attributes {stable_mosaic.version = 11 : i64} {
  func.func @discriminator_kernel(%arg0: i32, %arg1: memref<128x896xbf16, #tpu.memory_space<vmem>>, %arg2: memref<896x512xbf16, #tpu.memory_space<vmem>>, %arg3: memref<1x512xf32, #tpu.memory_space<vmem>>, %arg4: memref<512x256xbf16, #tpu.memory_space<vmem>>, %arg5: memref<1x256xf32, #tpu.memory_space<vmem>>, %arg6: memref<256x128xbf16, #tpu.memory_space<vmem>>, %arg7: memref<1x128xf32, #tpu.memory_space<vmem>>, %arg8: memref<128x128xf32, #tpu.memory_space<vmem>>) attributes {dimension_semantics = [#tpu.dimension_semantics<parallel>], iteration_bounds = array<i64: 1>, scalar_prefetch = 0 : i64, scratch_operands = 0 : i64, tpu.core_type = #tpu.core_type<tc>, window_params = [{transform_indices = @transform_0, window_bounds = array<i64: 128, 896>}, {pipeline_mode = #tpu.pipeline_mode<synchronous>, transform_indices = @transform_1, window_bounds = array<i64: 896, 512>}, {pipeline_mode = #tpu.pipeline_mode<synchronous>, transform_indices = @transform_2, window_bounds = array<i64: 1, 512>}, {pipeline_mode = #tpu.pipeline_mode<synchronous>, transform_indices = @transform_3, window_bounds = array<i64: 512, 256>}, {pipeline_mode = #tpu.pipeline_mode<synchronous>, transform_indices = @transform_4, window_bounds = array<i64: 1, 256>}, {pipeline_mode = #tpu.pipeline_mode<synchronous>, transform_indices = @transform_5, window_bounds = array<i64: 256, 128>}, {pipeline_mode = #tpu.pipeline_mode<synchronous>, transform_indices = @transform_6, window_bounds = array<i64: 1, 128>}, {transform_indices = @transform_7, window_bounds = array<i64: 128, 128>}]} {
    %c0 = arith.constant 0 : index
    %c0_0 = arith.constant 0 : index
    %0 = vector.load %arg1[%c0, %c0_0] : memref<128x896xbf16, #tpu.memory_space<vmem>>, vector<128x896xbf16>
    %c0_1 = arith.constant 0 : index
    %c0_2 = arith.constant 0 : index
    %1 = vector.load %arg2[%c0_1, %c0_2] : memref<896x512xbf16, #tpu.memory_space<vmem>>, vector<896x512xbf16>
    %cst = arith.constant dense<0.000000e+00> : vector<128x512xf32>
    %2 = tpu.matmul %0, %1, %cst {dimension_numbers = #tpu.dot_dimension_numbers<[1], [0], [0], [1], [0, 0, 1, 1], [], []>} : vector<128x896xbf16>, vector<896x512xbf16>, vector<128x512xf32> -> vector<128x512xf32>
    %c0_3 = arith.constant 0 : index
    %c0_4 = arith.constant 0 : index
    %3 = vector.load %arg3[%c0_3, %c0_4] : memref<1x512xf32, #tpu.memory_space<vmem>>, vector<1x512xf32>
    %4 = vector.broadcast %3 : vector<1x512xf32> to vector<128x512xf32>
    %5 = arith.addf %2, %4 : vector<128x512xf32>
    %cst_5 = arith.constant 0.000000e+00 : f32
    %6 = vector.broadcast %cst_5 : f32 to vector<128x512xf32>
    %7 = arith.maximumf %5, %6 : vector<128x512xf32>
    %8 = arith.truncf %7 : vector<128x512xf32> to vector<128x512xbf16>
    %c0_6 = arith.constant 0 : index
    %c0_7 = arith.constant 0 : index
    %9 = vector.load %arg4[%c0_6, %c0_7] : memref<512x256xbf16, #tpu.memory_space<vmem>>, vector<512x256xbf16>
    %cst_8 = arith.constant dense<0.000000e+00> : vector<128x256xf32>
    %10 = tpu.matmul %8, %9, %cst_8 {dimension_numbers = #tpu.dot_dimension_numbers<[1], [0], [0], [1], [0, 0, 1, 1], [], []>} : vector<128x512xbf16>, vector<512x256xbf16>, vector<128x256xf32> -> vector<128x256xf32>
    %c0_9 = arith.constant 0 : index
    %c0_10 = arith.constant 0 : index
    %11 = vector.load %arg5[%c0_9, %c0_10] : memref<1x256xf32, #tpu.memory_space<vmem>>, vector<1x256xf32>
    %12 = vector.broadcast %11 : vector<1x256xf32> to vector<128x256xf32>
    %13 = arith.addf %10, %12 : vector<128x256xf32>
    %cst_11 = arith.constant 0.000000e+00 : f32
    %14 = vector.broadcast %cst_11 : f32 to vector<128x256xf32>
    %15 = arith.maximumf %13, %14 : vector<128x256xf32>
    %16 = arith.truncf %15 : vector<128x256xf32> to vector<128x256xbf16>
    %c0_12 = arith.constant 0 : index
    %c0_13 = arith.constant 0 : index
    %17 = vector.load %arg6[%c0_12, %c0_13] : memref<256x128xbf16, #tpu.memory_space<vmem>>, vector<256x128xbf16>
    %cst_14 = arith.constant dense<0.000000e+00> : vector<128x128xf32>
    %18 = tpu.matmul %16, %17, %cst_14 {dimension_numbers = #tpu.dot_dimension_numbers<[1], [0], [0], [1], [0, 0, 1, 1], [], []>} : vector<128x256xbf16>, vector<256x128xbf16>, vector<128x128xf32> -> vector<128x128xf32>
    %c0_15 = arith.constant 0 : index
    %c0_16 = arith.constant 0 : index
    %19 = vector.load %arg7[%c0_15, %c0_16] : memref<1x128xf32, #tpu.memory_space<vmem>>, vector<1x128xf32>
    %20 = vector.broadcast %19 : vector<1x128xf32> to vector<128x128xf32>
    %21 = arith.addf %18, %20 : vector<128x128xf32>
    %cst_17 = arith.constant dense<0xFF800000> : vector<128xf32>
    %22 = vector.multi_reduction <maximumf>, %21, %cst_17 [1] : vector<128x128xf32> to vector<128xf32>
    %23 = vector.shape_cast %22 : vector<128xf32> to vector<128x1xf32>
    %24 = vector.broadcast %23 : vector<128x1xf32> to vector<128x128xf32>
    %25 = arith.subf %21, %24 : vector<128x128xf32>
    %26 = math.exp %25 : vector<128x128xf32>
    %cst_18 = arith.constant dense<0.000000e+00> : vector<128xf32>
    %27 = vector.multi_reduction <add>, %26, %cst_18 [1] : vector<128x128xf32> to vector<128xf32>
    %28 = vector.shape_cast %27 : vector<128xf32> to vector<128x1xf32>
    %29 = tpu.reciprocal %28 {approx = true} : vector<128x1xf32> -> vector<128x1xf32>
    %30 = vector.broadcast %29 : vector<128x1xf32> to vector<128x128xf32>
    %31 = arith.mulf %26, %30 : vector<128x128xf32>
    %c0_19 = arith.constant 0 : index
    %c0_20 = arith.constant 0 : index
    %32 = vector.load %arg8[%c0_19, %c0_20] : memref<128x128xf32, #tpu.memory_space<vmem>>, vector<128x128xf32>
    tpu.vector_store %arg8[%c0_19, %c0_20], %31 {strides = array<i32>} : memref<128x128xf32, #tpu.memory_space<vmem>>, vector<128x128xf32>,
    return
  }
  func.func @transform_0(%arg0: i32) -> (i32, i32) {
    %c0_i32 = arith.constant 0 : i32
    %c0_i32_0 = arith.constant 0 : i32
    return %arg0, %c0_i32 : i32, i32
  }
  func.func @transform_1(%arg0: i32) -> (i32, i32) {
    %c0_i32 = arith.constant 0 : i32
    %c0_i32_0 = arith.constant 0 : i32
    %c0_i32_1 = arith.constant 0 : i32
    return %c0_i32, %c0_i32_0 : i32, i32
  }
  func.func @transform_2(%arg0: i32) -> (i32, i32) {
    %c0_i32 = arith.constant 0 : i32
    %c0_i32_0 = arith.constant 0 : i32
    %c0_i32_1 = arith.constant 0 : i32
    return %c0_i32, %c0_i32_0 : i32, i32
  }
  func.func @transform_3(%arg0: i32) -> (i32, i32) {
    %c0_i32 = arith.constant 0 : i32
    %c0_i32_0 = arith.constant 0 : i32
    %c0_i32_1 = arith.constant 0 : i32
    return %c0_i32, %c0_i32_0 : i32, i32
  }
  func.func @transform_4(%arg0: i32) -> (i32, i32) {
    %c0_i32 = arith.constant 0 : i32
    %c0_i32_0 = arith.constant 0 : i32
    %c0_i32_1 = arith.constant 0 : i32
    return %c0_i32, %c0_i32_0 : i32, i32
  }
  func.func @transform_5(%arg0: i32) -> (i32, i32) {
    %c0_i32 = arith.constant 0 : i32
    %c0_i32_0 = arith.constant 0 : i32
    %c0_i32_1 = arith.constant 0 : i32
    return %c0_i32, %c0_i32_0 : i32, i32
  }
  func.func @transform_6(%arg0: i32) -> (i32, i32) {
    %c0_i32 = arith.constant 0 : i32
    %c0_i32_0 = arith.constant 0 : i32
    %c0_i32_1 = arith.constant 0 : i32
    return %c0_i32, %c0_i32_0 : i32, i32
  }
  func.func @transform_7(%arg0: i32) -> (i32, i32) {
    %c0_i32 = arith.constant 0 : i32
    %c0_i32_0 = arith.constant 0 : i32
    return %arg0, %c0_i32 : i32, i32
  }
}

</mosaic_0001>

<bundles_post_ra>
// kernel: tpu_custom_call.1
= control target key start
LH: loop header
LB: loop body
LE: loop exit
PB: predicated region body
PF: predicated region fallthrough
CT: control target
= control target key end

     0   :  { %12 = vsyncpa [#allocation3], 0  ;;  %s5881_s0 = inlined_call_operand.hbm [shape: bf16[128,896], index: 0, kind: input, shape index: {}]   ;;  %s5882_s1 = inlined_call_operand.hbm [shape: bf16[896,512], index: 1, kind: input, shape index: {}]   ;;  %s5883_s2 = inlined_call_operand.hbm [shape: f32[1,512], index: 2, kind: input, shape index: {}]   ;;  %s5884_s3 = inlined_call_operand.hbm [shape: bf16[512,256], index: 3, kind: input, shape index: {}]   ;;  %s5885_s4 = inlined_call_operand.vmem [shape: f32[1,256], index: 4, kind: input, shape index: {}]   ;;  %s5886_s5 = inlined_call_operand.hbm [shape: bf16[256,128], index: 5, kind: input, shape index: {}]   ;;  %s5887_s6 = inlined_call_operand.vmem [shape: f32[1,128], index: 6, kind: input, shape index: {}]   ;;  %s5888_s7 = inlined_call_operand.hbm [shape: f32[128,128], index: 7, kind: output, shape index: {}]  }
   0x1   :  { %13 = vsyncpa [#allocation6], 0 }
   0x2   :  { %14 = vsyncpa [#allocation9], 0 }
   0x3   :  { %15 = vsyncpa [#allocation4], 0  ;;  %s5104_s24 = smov [#allocation5]  }
   0x4   :  { %s33_s25 = sshll.u32 %s5104_s24, 4  ;;  %s34_s25 = int_to_ptr.vmem [resolvable:$true] %s33_s25 }
   0x5   :  { %s4984_s26 = scalar_lea.vmem %s34_s25, 28672  ;;  %p4989_p1 = scmp.lt.s32.totalorder %s34_s25, %s34_s25 }
   0x6   :  { %p4985_p0 = scmp.ne.s32.totalorder %s34_s25, %s4984_s26  ;;  %p4990_p2 = scmp.lt.s32.totalorder %s4984_s26, %s4984_s26 }
   0x8   :  { %p4991_p3 = por %p4990_p2, %p4989_p1 }
   0xa   :  { %p4992_p4 = pnand %p4991_p3, %p4985_p0 }
   0xc   :  { %4995 = shalt.err (!%p4992_p4)
}
   0xd   :  { %s5105_s27 = smov 256   ;;  %s5106_s28 = smov 16  }
   0xe   :  { %39 = dma.hbm_to_vmem [thread:$0]  %s5882_s1, 28672, %s34_s25, [#allocation6], %s5105_s27, %s5105_s27, %s5106_s28  }
   0xf   :  { %s5107_s8 = smov [#allocation8]  }
  0x10   :  { %s55_s9 = sshll.u32 %s5107_s8, 4  ;;  %s56_s9 = int_to_ptr.vmem [resolvable:$true] %s55_s9 }
  0x11   :  { %s5004_s10 = scalar_lea.vmem %s56_s9, 8192  ;;  %p5009_p6 = scmp.lt.s32.totalorder %s56_s9, %s56_s9 }
  0x12   :  { %p5005_p5 = scmp.ne.s32.totalorder %s56_s9, %s5004_s10  ;;  %p5010_p7 = scmp.lt.s32.totalorder %s5004_s10, %s5004_s10 }
  0x14   :  { %p5011_p8 = por %p5010_p7, %p5009_p6 }
  0x16   :  { %p5012_p9 = pnand %p5011_p8, %p5005_p5 }
  0x18   :  { %5015 = shalt.err (!%p5012_p9)
}
  0x19   :  { %s5108_s11 = smov 128   ;;  %s5109_s12 = smov 8  }
  0x1a   :  { %61 = dma.hbm_to_vmem [thread:$0]  %s5884_s3, 8192, %s56_s9, [#allocation9], %s5108_s11, %s5108_s11, %s5109_s12  }
  0x1b   :  { %s5110_s1 = smov [#allocation2]  }
  0x1c   :  { %s21_s15 = sshll.u32 %s5110_s1, 4  ;;  %s22_s15 = int_to_ptr.vmem [resolvable:$true] %s21_s15 }
  0x1d   :  { %s5024_s16 = scalar_lea.vmem %s22_s15, 7168  ;;  %p5029_p11 = scmp.lt.s32.totalorder %s22_s15, %s22_s15 }
  0x1e   :  { %p5025_p10 = scmp.ne.s32.totalorder %s22_s15, %s5024_s16  ;;  %p5030_p12 = scmp.lt.s32.totalorder %s5024_s16, %s5024_s16 }
  0x20   :  { %p5031_p13 = por %p5030_p12, %p5029_p11 }
  0x22   :  { %p5032_p0 = pnand %p5031_p13, %p5025_p10 }
  0x24   :  { %5035 = shalt.err (!%p5032_p0)
}
  0x25   :  { %s5111_s17 = smov 448   ;;  %s5112_s18 = smov 28  }
  0x26   :  { %27 = dma.hbm_to_vmem [thread:$0]  %s5881_s0, 7168, %s22_s15, [#allocation3], %s5111_s17, %s5111_s17, %s5112_s18  }
  0x27   :  { %s5113_s21 = smov [#allocation7]   ;;  %s5114_s3 = smov [#allocation10]  }
  0x28   :  { %s46_s22 = sshll.u32 %s5113_s21, 4  ;;  %s69_s23 = sshll.u32 %s5114_s3, 4  ;;  %s47_s22 = int_to_ptr.vmem [resolvable:$true] %s46_s22  ;;  %s70_s23 = int_to_ptr.vmem [resolvable:$true] %s69_s23 }
  0x29   :  { %s5044_s24 = scalar_lea.vmem %s47_s22, 64  ;;  %p5049_p2 = scmp.lt.s32.totalorder %s47_s22, %s47_s22 }
  0x2a   :  { %p5045_p1 = scmp.ne.s32.totalorder %s47_s22, %s5044_s24  ;;  %p5050_p3 = scmp.lt.s32.totalorder %s5044_s24, %s5044_s24 }
  0x2c   :  { %p5051_p4 = por %p5050_p3, %p5049_p2 }
  0x2e   :  { %p5052_p5 = pnand %p5051_p4, %p5045_p1 }
  0x30   :  { %5055 = shalt.err (!%p5052_p5)
}
  0x31   :  { %49 = dma.hbm_to_vmem [thread:$0]  %s5883_s2, 64, %s47_s22, [#allocation6]  }
  0x32   :  { %s5064_s27 = scalar_lea.vmem %s70_s23, 2048  ;;  %p5069_p7 = scmp.lt.s32.totalorder %s70_s23, %s70_s23 }
  0x33   :  { %p5065_p6 = scmp.ne.s32.totalorder %s70_s23, %s5064_s27  ;;  %p5070_p8 = scmp.lt.s32.totalorder %s5064_s27, %s5064_s27 }
  0x35   :  { %p5071_p9 = por %p5070_p8, %p5069_p7 }
  0x37   :  { %p5072_p10 = pnand %p5071_p9, %p5065_p6 }
  0x39   :  { %5075 = shalt.err (!%p5072_p10)
}
  0x3a   :  { %s5115_s0 = smov 64   ;;  %s5116_s28 = smov 4  }
  0x3b   :  { %75 = dma.hbm_to_vmem [thread:$0]  %s5886_s5, 2048, %s70_s23, [#allocation9], %s5115_s0, %s5115_s0, %s5116_s28  }
  0x3c   :  { %5096 = dma.done.wait [#allocation3], 7168  }
  0x3d   :  { %5097 = vsyncadd [#allocation3], 4294960128 }
  0x3e   :  { %5098 = dma.done.wait [#allocation6], 28736  }
  0x3f   :  { %5099 = vsyncadd [#allocation6], 4294938560 }
  0x40   :  { %5100 = dma.done.wait [#allocation9], 10240  }
  0x41   :  { %5101 = vsyncadd [#allocation9], 4294957056  ;;  %v4349_v0 = vld [vmem:[#allocation5 + $0xe4] ss:$16 sps:$4 sm:$0xff]   ;;  %v4353_v2 = vld [vmem:[#allocation5 + $0xe0] ss:$16 sps:$4 sm:$0xff]  }
  0x42   :  { %v4351_v1 = vld [vmem:[#allocation5 + $0x2e4] ss:$16 sps:$4 sm:$0xff]   ;;  %1812 = vmatprep.subr.bf16.mxu0 %v4349_v0  ;;  %v4354_v3 = vld [vmem:[#allocation5 + $0x2e0] ss:$16 sps:$4 sm:$0xff]   ;;  %v4450_v51 = vld [vmem:[#allocation2 + $0xc] ss:$28 sps:$4 sm:$0xff]  }
  0x43   :  { %1925 = vmatprep.subr.bf16.mxu1 %v4351_v1  ;;  %v4355_v4 = vld [vmem:[#allocation5 + $0xc4] ss:$16 sps:$4 sm:$0xff]   ;;  %1813 = vmatpush1.bf16.msra.mxu0 %v4353_v2  ;;  %v4359_v6 = vld [vmem:[#allocation5 + $0xc0] ss:$16 sps:$4 sm:$0xff]  }
  0x44   :  { %1926 = vmatpush1.bf16.msra.mxu1 %v4354_v3  ;;  %v4357_v5 = vld [vmem:[#allocation5 + $0x2c4] ss:$16 sps:$4 sm:$0xff]   ;;  %1814 = vmatprep.subr.bf16.mxu0 %v4355_v4  ;;  %v4360_v7 = vld [vmem:[#allocation5 + $0x2c0] ss:$16 sps:$4 sm:$0xff]  }
  0x45   :  { %1927 = vmatprep.subr.bf16.mxu1 %v4357_v5  ;;  %v4361_v8 = vld [vmem:[#allocation5 + $0xa4] ss:$16 sps:$4 sm:$0xff]   ;;  %v4365_v10 = vld [vmem:[#allocation5 + $0xa0] ss:$16 sps:$4 sm:$0xff]   ;;  %1957 = vmatprep.mubr.bf16.mxu1 %v4450_v51 }
  0x46   :  { %v4363_v9 = vld [vmem:[#allocation5 + $0x2a4] ss:$16 sps:$4 sm:$0xff]   ;;  %v4366_v11 = vld [vmem:[#allocation5 + $0x2a0] ss:$16 sps:$4 sm:$0xff]  }
  0x47   :  { %1815 = vmatpush1.bf16.msra.mxu0 %v4359_v6  ;;  %v4367_v12 = vld [vmem:[#allocation5 + $0x84] ss:$16 sps:$4 sm:$0xff]   ;;  %v4371_v14 = vld [vmem:[#allocation5 + $0x80] ss:$16 sps:$4 sm:$0xff]  }
  0x48   :  { %1928 = vmatpush1.bf16.msra.mxu1 %v4360_v7  ;;  %1816 = vmatprep.subr.bf16.mxu0 %v4361_v8  ;;  %v4369_v13 = vld [vmem:[#allocation5 + $0x284] ss:$16 sps:$4 sm:$0xff]   ;;  %v4372_v15 = vld [vmem:[#allocation5 + $0x280] ss:$16 sps:$4 sm:$0xff]  }
  0x49   :  { %1929 = vmatprep.subr.bf16.mxu1 %v4363_v9  ;;  %v4373_v16 = vld [vmem:[#allocation5 + $0x64] ss:$16 sps:$4 sm:$0xff]   ;;  %v4377_v18 = vld [vmem:[#allocation5 + $0x60] ss:$16 sps:$4 sm:$0xff]   ;;  %v4460_v9 = vld [vmem:[#allocation2 + $0x3c] ss:$28 sps:$4 sm:$0xff]  }
  0x4a   :  { %v4375_v17 = vld [vmem:[#allocation5 + $0x264] ss:$16 sps:$4 sm:$0xff]   ;;  %v4378_v19 = vld [vmem:[#allocation5 + $0x260] ss:$16 sps:$4 sm:$0xff]  }
  0x4b   :  { %1817 = vmatpush1.bf16.msra.mxu0 %v4365_v10  ;;  %v4379_v20 = vld [vmem:[#allocation5 + $0x44] ss:$16 sps:$4 sm:$0xff]   ;;  %v4383_v22 = vld [vmem:[#allocation5 + $0x40] ss:$16 sps:$4 sm:$0xff]  }
  0x4c   :  { %1930 = vmatpush1.bf16.msra.mxu1 %v4366_v11  ;;  %1818 = vmatprep.subr.bf16.mxu0 %v4367_v12  ;;  %v4381_v21 = vld [vmem:[#allocation5 + $0x244] ss:$16 sps:$4 sm:$0xff]   ;;  %v4384_v23 = vld [vmem:[#allocation5 + $0x240] ss:$16 sps:$4 sm:$0xff]  }
  0x4d   :  { %1931 = vmatprep.subr.bf16.mxu1 %v4369_v13  ;;  %v4385_v24 = vld [vmem:[#allocation5 + $0x24] ss:$16 sps:$4 sm:$0xff]   ;;  %v4389_v26 = vld [vmem:[#allocation5 + $0x20] ss:$16 sps:$4 sm:$0xff]  }
  0x4e   :  { %v4387_v25 = vld [vmem:[#allocation5 + $0x224] ss:$16 sps:$4 sm:$0xff]   ;;  %v4390_v27 = vld [vmem:[#allocation5 + $0x220] ss:$16 sps:$4 sm:$0xff]  }
  0x4f   :  { %1819 = vmatpush1.bf16.msra.mxu0 %v4371_v14  ;;  %v4391_v28 = vld [vmem:[#allocation5 + $0x4] ss:$16 sps:$4 sm:$0xff]   ;;  %v4395_v30 = vld [vmem:[#allocation5] ss:$16 sps:$4 sm:$0xff]  }
  0x50   :  { %1932 = vmatpush1.bf16.msra.mxu1 %v4372_v15  ;;  %1820 = vmatprep.subr.bf16.mxu0 %v4373_v16  ;;  %v4393_v29 = vld [vmem:[#allocation5 + $0x204] ss:$16 sps:$4 sm:$0xff]   ;;  %v4396_v31 = vld [vmem:[#allocation5 + $0x200] ss:$16 sps:$4 sm:$0xff]  }
  0x51   :  { %1933 = vmatprep.subr.bf16.mxu1 %v4375_v17  ;;  %v4397_v32 = vld [vmem:[#allocation5 + $0x1e4] ss:$16 sps:$4 sm:$0xff]   ;;  %v4401_v34 = vld [vmem:[#allocation5 + $0x1e0] ss:$16 sps:$4 sm:$0xff]  }
  0x52   :  { %v4399_v33 = vld [vmem:[#allocation5 + $0x3e4] ss:$16 sps:$4 sm:$0xff]   ;;  %v4402_v35 = vld [vmem:[#allocation5 + $0x3e0] ss:$16 sps:$4 sm:$0xff]  }
  0x53   :  { %1821 = vmatpush1.bf16.msra.mxu0 %v4377_v18  ;;  %v4403_v36 = vld [vmem:[#allocation5 + $0x1c4] ss:$16 sps:$4 sm:$0xff]   ;;  %v4407_v38 = vld [vmem:[#allocation5 + $0x1c0] ss:$16 sps:$4 sm:$0xff]  }
  0x54   :  { %1934 = vmatpush1.bf16.msra.mxu1 %v4378_v19  ;;  %1822 = vmatprep.subr.bf16.mxu0 %v4379_v20  ;;  %v4405_v37 = vld [vmem:[#allocation5 + $0x3c4] ss:$16 sps:$4 sm:$0xff]   ;;  %v4408_v39 = vld [vmem:[#allocation5 + $0x3c0] ss:$16 sps:$4 sm:$0xff]  }
  0x55   :  { %1935 = vmatprep.subr.bf16.mxu1 %v4381_v21  ;;  %v4409_v40 = vld [vmem:[#allocation5 + $0x1a4] ss:$16 sps:$4 sm:$0xff]   ;;  %v4413_v42 = vld [vmem:[#allocation5 + $0x1a0] ss:$16 sps:$4 sm:$0xff]   ;;  %v4477_v21 = vld [vmem:[#allocation2 + $0x7c] ss:$28 sps:$4 sm:$0xff]  }
  0x56   :  { %v4411_v41 = vld [vmem:[#allocation5 + $0x3a4] ss:$16 sps:$4 sm:$0xff]   ;;  %v4414_v43 = vld [vmem:[#allocation5 + $0x3a0] ss:$16 sps:$4 sm:$0xff]  }
  0x57   :  { %1823 = vmatpush1.bf16.msra.mxu0 %v4383_v22  ;;  %v4415_v44 = vld [vmem:[#allocation5 + $0x184] ss:$16 sps:$4 sm:$0xff]   ;;  %v4419_v46 = vld [vmem:[#allocation5 + $0x180] ss:$16 sps:$4 sm:$0xff]  }
  0x58   :  { %1936 = vmatpush1.bf16.msra.mxu1 %v4384_v23  ;;  %1824 = vmatprep.subr.bf16.mxu0 %v4385_v24  ;;  %v4417_v45 = vld [vmem:[#allocation5 + $0x384] ss:$16 sps:$4 sm:$0xff]   ;;  %v4420_v47 = vld [vmem:[#allocation5 + $0x380] ss:$16 sps:$4 sm:$0xff]  }
  0x59   :  { %1937 = vmatprep.subr.bf16.mxu1 %v4387_v25  ;;  %v4421_v48 = vld [vmem:[#allocation5 + $0x164] ss:$16 sps:$4 sm:$0xff]   ;;  %v4425_v52 = vld [vmem:[#allocation5 + $0x160] ss:$16 sps:$4 sm:$0xff]  }
  0x5a   :  { %v4447_v49 = vld [vmem:[#allocation2 + $0x4] ss:$28 sps:$4 sm:$0xff]   ;;  %v4464_v16 = vld [vmem:[#allocation2 + $0x38] ss:$28 sps:$4 sm:$0xff]   ;;  %v4479_v25 = vld [vmem:[#allocation2 + $0x70] ss:$28 sps:$4 sm:$0xff]  }
  0x5b   :  { %1825 = vmatpush1.bf16.msra.mxu0 %v4389_v26  ;;  %v4423_v50 = vld [vmem:[#allocation5 + $0x364] ss:$16 sps:$4 sm:$0xff]   ;;  %1844 = vmatprep.mubr.bf16.mxu0 %v4447_v49  ;;  %v4426_v53 = vld [vmem:[#allocation5 + $0x360] ss:$16 sps:$4 sm:$0xff]  }
  0x5c   :  { %1938 = vmatpush1.bf16.msra.mxu1 %v4390_v27  ;;  %1826 = vmatprep.subr.bf16.mxu0 %v4391_v28  ;;  %v4427_v54 = vld [vmem:[#allocation5 + $0x144] ss:$16 sps:$4 sm:$0xff]   ;;  %v4431_v56 = vld [vmem:[#allocation5 + $0x140] ss:$16 sps:$4 sm:$0xff]  }
  0x5d   :  { %1939 = vmatprep.subr.bf16.mxu1 %v4393_v29  ;;  %v4429_v55 = vld [vmem:[#allocation5 + $0x344] ss:$16 sps:$4 sm:$0xff]   ;;  %v4432_v57 = vld [vmem:[#allocation5 + $0x340] ss:$16 sps:$4 sm:$0xff]  }
  0x5e   :  { %v4433_v58 = vld [vmem:[#allocation5 + $0x124] ss:$16 sps:$4 sm:$0xff]   ;;  %v4437_v60 = vld [vmem:[#allocation5 + $0x120] ss:$16 sps:$4 sm:$0xff]  }
  0x5f   :  { %1827 = vmatpush1.bf16.msra.mxu0 %v4395_v30  ;;  %v4435_v59 = vld [vmem:[#allocation5 + $0x324] ss:$16 sps:$4 sm:$0xff]   ;;  %v4438_v61 = vld [vmem:[#allocation5 + $0x320] ss:$16 sps:$4 sm:$0xff]  }
  0x60   :  { %1940 = vmatpush1.bf16.msra.mxu1 %v4396_v31  ;;  %1828 = vmatprep.subr.bf16.mxu0 %v4397_v32  ;;  %v4439_v62 = vld [vmem:[#allocation5 + $0x104] ss:$16 sps:$4 sm:$0xff]   ;;  %v4443_v0 = vld [vmem:[#allocation5 + $0x100] ss:$16 sps:$4 sm:$0xff]   ;;  %v4490_v31 = vld [vmem:[#allocation2 + $0xac] ss:$28 sps:$4 sm:$0xff]  }
  0x61   :  { %1941 = vmatprep.subr.bf16.mxu1 %v4399_v33  ;;  %v4441_v63 = vld [vmem:[#allocation5 + $0x304] ss:$16 sps:$4 sm:$0xff]   ;;  %v4444_v1 = vld [vmem:[#allocation5 + $0x300] ss:$16 sps:$4 sm:$0xff]  }
  0x62   :  { %v4453_v2 = vld [vmem:[#allocation5 + $0x4e4] ss:$16 sps:$4 sm:$0xff]   ;;  %v4445_v4 = vld [vmem:[#allocation2] ss:$28 sps:$4 sm:$0xff]  }
  0x63   :  { %1829 = vmatpush2.bf16.msra.mxu0 %v4401_v34  ;;  %v4456_v3 = vld [vmem:[#allocation5 + $0x6e4] ss:$16 sps:$4 sm:$0xff]   ;;  %v4451_v6 = vld [vmem:[#allocation5 + $0x4e0] ss:$16 sps:$4 sm:$0xff]  }
  0x64   :  { %1942 = vmatpush2.bf16.msra.mxu1 %v4402_v35  ;;  %1830 = vmatprep.subr.bf16.mxu0 %v4403_v36  ;;  %v4448_v5 = vld [vmem:[#allocation2 + $0x8] ss:$28 sps:$4 sm:$0xff]   ;;  %v4454_v7 = vld [vmem:[#allocation5 + $0x6e0] ss:$16 sps:$4 sm:$0xff]   ;;  %v4480_v27 = vld [vmem:[#allocation2 + $0x78] ss:$28 sps:$4 sm:$0xff]  }
  0x65   :  { %1943 = vmatprep.subr.bf16.mxu1 %v4405_v37  ;;  %v4459_v8 = vld [vmem:[#allocation5 + $0x4c4] ss:$16 sps:$4 sm:$0xff]   ;;  %v4457_v12 = vld [vmem:[#allocation5 + $0x4c0] ss:$16 sps:$4 sm:$0xff]  }
  0x66   :  { %v4462_v10 = vld [vmem:[#allocation2 + $0x44] ss:$28 sps:$4 sm:$0xff]   ;;  %v4475_v20 = vld [vmem:[#allocation2 + $0x74] ss:$28 sps:$4 sm:$0xff]  }
  0x67   :  { %1831 = vmatpush2.bf16.msra.mxu0 %v4407_v38  ;;  %v4471_v11 = vld [vmem:[#allocation5 + $0x6c4] ss:$16 sps:$4 sm:$0xff]   ;;  %v4469_v14 = vld [vmem:[#allocation5 + $0x6c0] ss:$16 sps:$4 sm:$0xff]  }
  0x68   :  { %1944 = vmatpush2.bf16.msra.mxu1 %v4408_v39  ;;  %1832 = vmatprep.subr.bf16.mxu0 %v4409_v40  ;;  %v4468_v13 = vld [vmem:[#allocation5 + $0x4a4] ss:$16 sps:$4 sm:$0xff]   ;;  %v4465_v17 = vld [vmem:[#allocation2 + $0x40] ss:$28 sps:$4 sm:$0xff]   ;;  %v4495_v39 = vld [vmem:[#allocation2 + $0xb0] ss:$28 sps:$4 sm:$0xff]  }
  0x69   :  { %1945 = vmatprep.subr.bf16.mxu1 %v4411_v41  ;;  %v4486_v15 = vld [vmem:[#allocation5 + $0x6a4] ss:$16 sps:$4 sm:$0xff]   ;;  %v4466_v18 = vld [vmem:[#allocation5 + $0x4a0] ss:$16 sps:$4 sm:$0xff]  }
  0x6a   :  { %v4474_v19 = vld [vmem:[#allocation5 + $0x484] ss:$16 sps:$4 sm:$0xff]   ;;  %v4484_v22 = vld [vmem:[#allocation5 + $0x6a0] ss:$16 sps:$4 sm:$0xff]  }
  0x6b   :  { %1833 = vmatpush2.bf16.msra.mxu0 %v4413_v42  ;;  %v4501_v23 = vld [vmem:[#allocation5 + $0x684] ss:$16 sps:$4 sm:$0xff]   ;;  %v4472_v24 = vld [vmem:[#allocation5 + $0x480] ss:$16 sps:$4 sm:$0xff]  }
  0x6c   :  { %1946 = vmatpush2.bf16.msra.mxu1 %v4414_v43  ;;  %1834 = vmatprep.subr.bf16.mxu0 %v4415_v44  ;;  %v4483_v26 = vld [vmem:[#allocation5 + $0x464] ss:$16 sps:$4 sm:$0xff]   ;;  %v4499_v28 = vld [vmem:[#allocation5 + $0x680] ss:$16 sps:$4 sm:$0xff]   ;;  %v4507_v43 = vld [vmem:[#allocation2 + $0xec] ss:$28 sps:$4 sm:$0xff]  }
  0x6d   :  { %1947 = vmatprep.subr.bf16.mxu1 %v4417_v45  ;;  %v4481_v29 = vld [vmem:[#allocation5 + $0x460] ss:$16 sps:$4 sm:$0xff]   ;;  %v4489_v30 = vld [vmem:[#allocation5 + $0x444] ss:$16 sps:$4 sm:$0xff]  }
  0x6e   :  { %v4492_v32 = vld [vmem:[#allocation2 + $0xb4] ss:$28 sps:$4 sm:$0xff]   ;;  %v4494_v38 = vld [vmem:[#allocation2 + $0xa8] ss:$28 sps:$4 sm:$0xff]  }
  0x6f   :  { %1835 = vmatpush2.bf16.msra.mxu0 %v4419_v46  ;;  %v4516_v33 = vld [vmem:[#allocation5 + $0x664] ss:$16 sps:$4 sm:$0xff]   ;;  %v4514_v34 = vld [vmem:[#allocation5 + $0x660] ss:$16 sps:$4 sm:$0xff]  }
  0x70   :  { %1948 = vmatpush2.bf16.msra.mxu1 %v4420_v47  ;;  %1836 = vmatprep.subr.bf16.mxu0 %v4421_v48  ;;  %v4487_v35 = vld [vmem:[#allocation5 + $0x440] ss:$16 sps:$4 sm:$0xff]   ;;  %v4531_v36 = vld [vmem:[#allocation5 + $0x644] ss:$16 sps:$4 sm:$0xff]  }
  0x71   :  { %1949 = vmatprep.subr.bf16.mxu1 %v4423_v50  ;;  %v4498_v37 = vld [vmem:[#allocation5 + $0x424] ss:$16 sps:$4 sm:$0xff]   ;;  %v4496_v40 = vld [vmem:[#allocation5 + $0x420] ss:$16 sps:$4 sm:$0xff]  }
  0x72   :  { %v4504_v41 = vld [vmem:[#allocation5 + $0x404] ss:$16 sps:$4 sm:$0xff]   ;;  %v4529_v44 = vld [vmem:[#allocation5 + $0x640] ss:$16 sps:$4 sm:$0xff]  }
  0x73   :  { %1837 = vmatpush2.bf16.msra.mxu0 %v4425_v52  ;;  %v4505_v42 = vld [vmem:[#allocation2 + $0xe4] ss:$28 sps:$4 sm:$0xff]  }
  0x74   :  { %1950 = vmatpush2.bf16.msra.mxu1 %v4426_v53  ;;  %1838 = vmatprep.subr.bf16.mxu0 %v4427_v54  ;;  %v4546_v45 = vld [vmem:[#allocation5 + $0x624] ss:$16 sps:$4 sm:$0xff]   ;;  %v4502_v46 = vld [vmem:[#allocation5 + $0x400] ss:$16 sps:$4 sm:$0xff]   ;;  %v4520_v53 = vld [vmem:[#allocation2 + $0x11c] ss:$28 sps:$4 sm:$0xff]  }
  0x75   :  { %1951 = vmatprep.subr.bf16.mxu1 %v4429_v55  ;;  %v4509_v47 = vld [vmem:[#allocation2 + $0xe0] ss:$28 sps:$4 sm:$0xff]   ;;  %v4513_v48 = vld [vmem:[#allocation5 + $0x5e4] ss:$16 sps:$4 sm:$0xff]  }
  0x76   :  { %v4510_v49 = vld [vmem:[#allocation2 + $0xe8] ss:$28 sps:$4 sm:$0xff]   ;;  %v4544_v50 = vld [vmem:[#allocation5 + $0x620] ss:$16 sps:$4 sm:$0xff]  }
  0x77   :  { %1839 = vmatpush2.bf16.msra.mxu0 %v4431_v56  ;;  %v4511_v51 = vld [vmem:[#allocation5 + $0x5e0] ss:$16 sps:$4 sm:$0xff]   ;;  %v4519_v52 = vld [vmem:[#allocation5 + $0x5c4] ss:$16 sps:$4 sm:$0xff]  }
  0x78   :  { %1952 = vmatpush2.bf16.msra.mxu1 %v4432_v57  ;;  %1840 = vmatprep.subr.bf16.mxu0 %v4433_v58  ;;  %v4522_v54 = vld [vmem:[#allocation2 + $0x124] ss:$28 sps:$4 sm:$0xff]   ;;  %v4574_v58 = vld [vmem:[#allocation5 + $0x2ec] ss:$16 sps:$4 sm:$0xff]  }
  0x79   :  { %1953 = vmatprep.subr.bf16.mxu1 %v4435_v59  ;;  %v4561_v55 = vld [vmem:[#allocation5 + $0x604] ss:$16 sps:$4 sm:$0xff]   ;;  %v4559_v56 = vld [vmem:[#allocation5 + $0x600] ss:$16 sps:$4 sm:$0xff]  }
  0x7a   :  { %v4517_v57 = vld [vmem:[#allocation5 + $0x5c0] ss:$16 sps:$4 sm:$0xff]   ;;  %v4528_v59 = vld [vmem:[#allocation5 + $0x5a4] ss:$16 sps:$4 sm:$0xff]  }
  0x7b   :  { %1841 = vmatpush2.bf16.msra.mxu0 %v4437_v60  ;;  %v4524_v60 = vld [vmem:[#allocation2 + $0x118] ss:$28 sps:$4 sm:$0xff]  }
  0x7c   :  { %1954 = vmatpush2.bf16.msra.mxu1 %v4438_v61  ;;  %1842 = vmatprep.subr.bf16.mxu0 %v4439_v62  ;;  %v4525_v61 = vld [vmem:[#allocation2 + $0x120] ss:$28 sps:$4 sm:$0xff]  }
  0x7d   :  { %1955 = vmatprep.subr.bf16.mxu1 %v4441_v63  ;;  %v4526_v62 = vld [vmem:[#allocation5 + $0x5a0] ss:$16 sps:$4 sm:$0xff]   ;;  %v4534_v63 = vld [vmem:[#allocation5 + $0x584] ss:$16 sps:$4 sm:$0xff]  }
  0x7f   :  { %1843 = vmatpush2.bf16.msra.mxu0 %v4443_v0  ;;  %v4535_v0 = vld [vmem:[#allocation2 + $0x154] ss:$28 sps:$4 sm:$0xff]  }
  0x80   :  { %1956 = vmatpush2.bf16.msra.mxu1 %v4444_v1  ;;  %2038 = vmatprep.subr.bf16.mxu0 %v4453_v2  ;;  %v4537_v1 = vld [vmem:[#allocation2 + $0x15c] ss:$28 sps:$4 sm:$0xff]   ;;  %v4532_v2 = vld [vmem:[#allocation5 + $0x580] ss:$16 sps:$4 sm:$0xff]  }
  0x81   :  { %2151 = vmatprep.subr.bf16.mxu1 %v4456_v3  ;;  %v4539_v3 = vld [vmem:[#allocation2 + $0x150] ss:$28 sps:$4 sm:$0xff]  }
  0x82   :  { %1845 = vmatmul.mubr.bf16.vlgmr.msra.gmra.mxu0 %v4445_v4  ;;  %v4543_v4 = vld [vmem:[#allocation5 + $0x564] ss:$16 sps:$4 sm:$0xff]  }
  0x83   :  { %1958 = vmatmul.mubr.bf16.vlgmr.msra.gmra.mxu1 %v4448_v5  ;;  %2039 = vmatpush1.bf16.msra.mxu0 %v4451_v6  ;;  %v4540_v5 = vld [vmem:[#allocation2 + $0x158] ss:$28 sps:$4 sm:$0xff]   ;;  %v4541_v6 = vld [vmem:[#allocation5 + $0x560] ss:$16 sps:$4 sm:$0xff]  }
  0x84   :  { %2152 = vmatpush1.bf16.msra.mxu1 %v4454_v7  ;;  %2040 = vmatprep.subr.bf16.mxu0 %v4459_v8  ;;  %v4549_v7 = vld [vmem:[#allocation5 + $0x544] ss:$16 sps:$4 sm:$0xff]   ;;  %v4550_v8 = vld [vmem:[#allocation2 + $0x18c] ss:$28 sps:$4 sm:$0xff]  }
  0x85   :  { %1854 = vmatprep.mubr.bf16.mxu0 %v4460_v9  ;;  %1967 = vmatprep.mubr.bf16.mxu1 %v4462_v10  ;;  %v4552_v9 = vld [vmem:[#allocation2 + $0x194] ss:$28 sps:$4 sm:$0xff]  }
  0x86   :  { %2153 = vmatprep.subr.bf16.mxu1 %v4471_v11  ;;  %v4547_v10 = vld [vmem:[#allocation5 + $0x540] ss:$16 sps:$4 sm:$0xff]   ;;  %v4558_v11 = vld [vmem:[#allocation5 + $0x524] ss:$16 sps:$4 sm:$0xff]  }
  0x87   :  { %2041 = vmatpush1.bf16.msra.mxu0 %v4457_v12  ;;  %v4554_v12 = vld [vmem:[#allocation2 + $0x188] ss:$28 sps:$4 sm:$0xff]  }
  0x88   :  { %2154 = vmatpush1.bf16.msra.mxu1 %v4469_v14  ;;  %2042 = vmatprep.subr.bf16.mxu0 %v4468_v13  ;;  %v4555_v13 = vld [vmem:[#allocation2 + $0x190] ss:$28 sps:$4 sm:$0xff]  }
  0x89   :  { %2155 = vmatprep.subr.bf16.mxu1 %v4486_v15  ;;  %v4556_v14 = vld [vmem:[#allocation5 + $0x520] ss:$16 sps:$4 sm:$0xff]  }
  0x8a   :  { %1855 = vmatmul.mubr.bf16.gmra.mxu0 %v4464_v16  ;;  %v4567_v15 = vld [vmem:[#allocation2 + $0x14] ss:$28 sps:$4 sm:$0xff]  }
  0x8b   :  { %1968 = vmatmul.mubr.bf16.gmra.mxu1 %v4465_v17  ;;  %2043 = vmatpush1.bf16.msra.mxu0 %v4466_v18  ;;  %v4564_v16 = vld [vmem:[#allocation5 + $0x504] ss:$16 sps:$4 sm:$0xff]   ;;  %v4562_v17 = vld [vmem:[#allocation5 + $0x500] ss:$16 sps:$4 sm:$0xff]   ;;  %v5117_v18 = vmov 0  }
  0x8c   :  { %1864 = vmatprep.mubr.bf16.mxu0 %v4475_v20  ;;  %2044 = vmatprep.subr.bf16.mxu0 %v4474_v19  ;;  %v4571_v19 = vld [vmem:[#allocation5 + $0xec] ss:$16 sps:$4 sm:$0xff]  }
  0x8d   :  { %1977 = vmatprep.mubr.bf16.mxu1 %v4477_v21  ;;  %2156 = vmatpush1.bf16.msra.mxu1 %v4484_v22  ;;  %v4565_v20 = vld [vmem:[#allocation2 + $0x10] ss:$28 sps:$4 sm:$0xff]   ;;  %v4568_v21 = vld [vmem:[#allocation2 + $0x18] ss:$28 sps:$4 sm:$0xff]  }
  0x8e   :  { %2157 = vmatprep.subr.bf16.mxu1 %v4501_v23  ;;  %v4569_v22 = vld [vmem:[#allocation5 + $0xe8] ss:$16 sps:$4 sm:$0xff]  }
  0x8f   :  { %2045 = vmatpush1.bf16.msra.mxu0 %v4472_v24  ;;  %v4572_v23 = vld [vmem:[#allocation5 + $0x2e8] ss:$16 sps:$4 sm:$0xff]   ;;  %v4577_v24 = vld [vmem:[#allocation5 + $0xcc] ss:$16 sps:$4 sm:$0xff]  }
  0x90   :  { %2046 = vmatprep.subr.bf16.mxu0 %v4483_v26  ;;  %v5178_v26 = vld [vmem:[#allocation2 + $0x4c] ss:$28 sps:$4 sm:$0xff]  }
  0x91   :  { %2158 = vmatpush1.bf16.msra.mxu1 %v4499_v28  ;;  %v4578_v28 = vld [vmem:[#allocation5 + $0x2c8] ss:$16 sps:$4 sm:$0xff]  }
  0x92   :  { %1865 = vmatmul.mubr.bf16.gmra.mxu0 %v4479_v25  ;;  %2159 = vmatprep.subr.bf16.mxu1 %v4516_v33  ;;  %v4580_v25 = vld [vmem:[#allocation5 + $0x2cc] ss:$16 sps:$4 sm:$0xff]   ;;  %v4585_v33 = vld [vmem:[#allocation5 + $0xa8] ss:$16 sps:$4 sm:$0xff]  }
  0x93   :  { %1978 = vmatmul.mubr.bf16.gmra.mxu1 %v4480_v27  ;;  %2047 = vmatpush1.bf16.msra.mxu0 %v4481_v29  ;;  %v4575_v27 = vld [vmem:[#allocation5 + $0xc8] ss:$16 sps:$4 sm:$0xff]   ;;  %v4587_v29 = vld [vmem:[#allocation5 + $0xac] ss:$16 sps:$4 sm:$0xff]  }
  0x94   :  { %1874 = vmatprep.mubr.bf16.mxu0 %v4490_v31  ;;  %2048 = vmatprep.subr.bf16.mxu0 %v4489_v30  ;;  %v4590_v30 = vld [vmem:[#allocation5 + $0x2ac] ss:$16 sps:$4 sm:$0xff]   ;;  %v5182_v31 = vld [vmem:[#allocation2 + $0x48] ss:$28 sps:$4 sm:$0xff]  }
  0x95   :  { %1987 = vmatprep.mubr.bf16.mxu1 %v4492_v32  ;;  %2160 = vmatpush1.bf16.msra.mxu1 %v4514_v34  ;;  %v5184_v32 = vld [vmem:[#allocation2 + $0x50] ss:$28 sps:$4 sm:$0xff]   ;;  %v4588_v34 = vld [vmem:[#allocation5 + $0x2a8] ss:$16 sps:$4 sm:$0xff]  }
  0x96   :  { %2161 = vmatprep.subr.bf16.mxu1 %v4531_v36  ;;  %v4596_v36 = vld [vmem:[#allocation5 + $0x28c] ss:$16 sps:$4 sm:$0xff]  }
  0x97   :  { %2049 = vmatpush1.bf16.msra.mxu0 %v4487_v35  ;;  %v4593_v35 = vld [vmem:[#allocation5 + $0x8c] ss:$16 sps:$4 sm:$0xff]  }
  0x98   :  { %2050 = vmatprep.subr.bf16.mxu0 %v4498_v37  ;;  %v5186_v37 = vld [vmem:[#allocation2 + $0x84] ss:$28 sps:$4 sm:$0xff]  }
  0x99   :  { %2162 = vmatpush1.bf16.msra.mxu1 %v4529_v44  ;;  %v4601_v44 = vld [vmem:[#allocation5 + $0x68] ss:$16 sps:$4 sm:$0xff]  }
  0x9a   :  { %1875 = vmatmul.mubr.bf16.gmra.mxu0 %v4494_v38  ;;  %2163 = vmatprep.subr.bf16.mxu1 %v4546_v45  ;;  %v4591_v38 = vld [vmem:[#allocation5 + $0x88] ss:$16 sps:$4 sm:$0xff]  }
  0x9b   :  { %1988 = vmatmul.mubr.bf16.gmra.mxu1 %v4495_v39  ;;  %2051 = vmatpush1.bf16.msra.mxu0 %v4496_v40  ;;  %v4594_v39 = vld [vmem:[#allocation5 + $0x288] ss:$16 sps:$4 sm:$0xff]   ;;  %v5190_v40 = vld [vmem:[#allocation2 + $0x80] ss:$28 sps:$4 sm:$0xff]  }
  0x9c   :  { %1884 = vmatprep.mubr.bf16.mxu0 %v4505_v42  ;;  %2052 = vmatprep.subr.bf16.mxu0 %v4504_v41  ;;  %v4603_v41 = vld [vmem:[#allocation5 + $0x6c] ss:$16 sps:$4 sm:$0xff]   ;;  %v4604_v45 = vld [vmem:[#allocation5 + $0x268] ss:$16 sps:$4 sm:$0xff]  }
  0x9d   :  { %1997 = vmatprep.mubr.bf16.mxu1 %v4507_v43  ;;  %2164 = vmatpush1.bf16.msra.mxu1 %v4544_v50  ;;  %v4606_v42 = vld [vmem:[#allocation5 + $0x26c] ss:$16 sps:$4 sm:$0xff]   ;;  %v5194_v43 = vld [vmem:[#allocation2 + $0x88] ss:$28 sps:$4 sm:$0xff]  }
  0x9e   :  { %2165 = vmatprep.subr.bf16.mxu1 %v4561_v55  ;;  %v4610_v50 = vld [vmem:[#allocation5 + $0x248] ss:$16 sps:$4 sm:$0xff]  }
  0x9f   :  { %2053 = vmatpush1.bf16.msra.mxu0 %v4502_v46  ;;  %v4609_v46 = vld [vmem:[#allocation5 + $0x4c] ss:$16 sps:$4 sm:$0xff]   ;;  %v4617_v55 = vld [vmem:[#allocation5 + $0x28] ss:$16 sps:$4 sm:$0xff]  }
  0xa0   :  { %2054 = vmatprep.subr.bf16.mxu0 %v4513_v48  ;;  %v5196_v48 = vld [vmem:[#allocation2 + $0xbc] ss:$28 sps:$4 sm:$0xff]  }
  0xa1   :  { %2166 = vmatpush1.bf16.msra.mxu1 %v4559_v56  ;;  %v4620_v56 = vld [vmem:[#allocation5 + $0x228] ss:$16 sps:$4 sm:$0xff]  }
  0xa2   :  { %1885 = vmatmul.mubr.bf16.gmra.mxu0 %v4509_v47  ;;  %2377 = vmatprep.subr.bf16.mxu1 %v4574_v58  ;;  %v4612_v47 = vld [vmem:[#allocation5 + $0x24c] ss:$16 sps:$4 sm:$0xff]  }
  0xa3   :  { %1998 = vmatmul.mubr.bf16.gmra.mxu1 %v4510_v49  ;;  %2055 = vmatpush2.bf16.msra.mxu0 %v4511_v51  ;;  %v4607_v49 = vld [vmem:[#allocation5 + $0x48] ss:$16 sps:$4 sm:$0xff]   ;;  %v4628_v58 = vld [vmem:[#allocation5 + $0x20c] ss:$16 sps:$4 sm:$0xff]  }
  0xa4   :  { %1894 = vmatprep.mubr.bf16.mxu0 %v4520_v53  ;;  %2056 = vmatprep.subr.bf16.mxu0 %v4519_v52  ;;  %v5200_v51 = vld [vmem:[#allocation2 + $0xb8] ss:$28 sps:$4 sm:$0xff]   ;;  %v4619_v52 = vld [vmem:[#allocation5 + $0x2c] ss:$16 sps:$4 sm:$0xff]  }
  0xa5   :  { %2007 = vmatprep.mubr.bf16.mxu1 %v4522_v54  ;;  %v4622_v53 = vld [vmem:[#allocation5 + $0x22c] ss:$16 sps:$4 sm:$0xff]  }
  0xa6   :  { %v5204_v54 = vld [vmem:[#allocation2 + $0xc0] ss:$28 sps:$4 sm:$0xff]  }
  0xa7   :  { %2057 = vmatpush2.bf16.msra.mxu0 %v4517_v57  ;;  %v4625_v57 = vld [vmem:[#allocation5 + $0xc] ss:$16 sps:$4 sm:$0xff]  }
  0xa8   :  { %2058 = vmatprep.subr.bf16.mxu0 %v4528_v59  ;;  %v5206_v59 = vld [vmem:[#allocation2 + $0xf4] ss:$28 sps:$4 sm:$0xff]  }
  0xaa   :  { %1895 = vmatmul.mubr.bf16.gmra.mxu0 %v4524_v60  ;;  %v4623_v60 = vld [vmem:[#allocation5 + $0x8] ss:$16 sps:$4 sm:$0xff]  }
  0xab   :  { %2008 = vmatmul.mubr.bf16.gmra.mxu1 %v4525_v61  ;;  %2059 = vmatpush2.bf16.msra.mxu0 %v4526_v62  ;;  %v4626_v61 = vld [vmem:[#allocation5 + $0x208] ss:$16 sps:$4 sm:$0xff]   ;;  %v4635_v62 = vld [vmem:[#allocation5 + $0x1ec] ss:$16 sps:$4 sm:$0xff]  }
  0xac   :  { %1904 = vmatprep.mubr.bf16.mxu0 %v4535_v0  ;;  %2060 = vmatprep.subr.bf16.mxu0 %v4534_v63  ;;  %v4638_v63 = vld [vmem:[#allocation5 + $0x3ec] ss:$16 sps:$4 sm:$0xff]  }
  0xad   :  { %2017 = vmatprep.mubr.bf16.mxu1 %v4537_v1  ;;  %v5212_v0 = vld [vmem:[#allocation2 + $0xf0] ss:$28 sps:$4 sm:$0xff]   ;;  %v5214_v1 = vld [vmem:[#allocation2 + $0xf8] ss:$28 sps:$4 sm:$0xff]  }
  0xaf   :  { %2061 = vmatpush2.bf16.msra.mxu0 %v4532_v2  ;;  %v4633_v2 = vld [vmem:[#allocation5 + $0x1e8] ss:$16 sps:$4 sm:$0xff]  }
  0xb0   :  { %2062 = vmatprep.subr.bf16.mxu0 %v4543_v4  ;;  %v4641_v4 = vld [vmem:[#allocation5 + $0x1cc] ss:$16 sps:$4 sm:$0xff]  }
  0xb2   :  { %1905 = vmatmul.mubr.bf16.gmra.mxu0 %v4539_v3  ;;  %v4636_v3 = vld [vmem:[#allocation5 + $0x3e8] ss:$16 sps:$4 sm:$0xff]  }
  0xb3   :  { %2018 = vmatmul.mubr.bf16.gmra.mxu1 %v4540_v5  ;;  %2063 = vmatpush2.bf16.msra.mxu0 %v4541_v6  ;;  %v4644_v5 = vld [vmem:[#allocation5 + $0x3cc] ss:$16 sps:$4 sm:$0xff]  }
  0xb4   :  { %1914 = vmatprep.mubr.bf16.mxu0 %v4550_v8  ;;  %2064 = vmatprep.subr.bf16.mxu0 %v4549_v7  ;;  %v5216_v6 = vld [vmem:[#allocation2 + $0x12c] ss:$28 sps:$4 sm:$0xff]  }
  0xb5   :  { %2027 = vmatprep.mubr.bf16.mxu1 %v4552_v9  ;;  %v4639_v7 = vld [vmem:[#allocation5 + $0x1c8] ss:$16 sps:$4 sm:$0xff]   ;;  %v4651_v9 = vld [vmem:[#allocation5 + $0x1ac] ss:$16 sps:$4 sm:$0xff]  }
  0xb6   :  { %v4642_v8 = vld [vmem:[#allocation5 + $0x3c8] ss:$16 sps:$4 sm:$0xff]  }
  0xb7   :  { %2065 = vmatpush2.bf16.msra.mxu0 %v4547_v10  ;;  %v4654_v10 = vld [vmem:[#allocation5 + $0x3ac] ss:$16 sps:$4 sm:$0xff]  }
  0xb8   :  { %2066 = vmatprep.subr.bf16.mxu0 %v4558_v11  ;;  %v5222_v11 = vld [vmem:[#allocation2 + $0x128] ss:$28 sps:$4 sm:$0xff]  }
  0xba   :  { %1915 = vmatmul.mubr.bf16.gmra.mxu0 %v4554_v12  ;;  %v5224_v12 = vld [vmem:[#allocation2 + $0x130] ss:$28 sps:$4 sm:$0xff]  }
  0xbb   :  { %2028 = vmatmul.mubr.bf16.gmra.mxu1 %v4555_v13  ;;  %2067 = vmatpush2.bf16.msra.mxu0 %v4556_v14  ;;  %v4649_v13 = vld [vmem:[#allocation5 + $0x1a8] ss:$16 sps:$4 sm:$0xff]  }
  0xbc   :  { %2070 = vmatprep.mubr.bf16.mxu0 %v4567_v15  ;;  %2068 = vmatprep.subr.bf16.mxu0 %v4564_v16  ;;  %v4652_v14 = vld [vmem:[#allocation5 + $0x3a8] ss:$16 sps:$4 sm:$0xff]   ;;  %v4657_v15 = vld [vmem:[#allocation5 + $0x18c] ss:$16 sps:$4 sm:$0xff]  }
  0xbd   :  { %2183 = vmatprep.mubr.bf16.mxu1 %v5117_v18  ;;  %v4660_v16 = vld [vmem:[#allocation5 + $0x38c] ss:$16 sps:$4 sm:$0xff]  }
  0xbf   :  { %2069 = vmatpush2.bf16.msra.mxu0 %v4562_v17  ;;  %v5226_v17 = vld [vmem:[#allocation2 + $0x164] ss:$28 sps:$4 sm:$0xff]  }
  0xc0   :  { %2264 = vmatprep.subr.bf16.mxu0 %v4571_v19  ;;  %v4655_v19 = vld [vmem:[#allocation5 + $0x188] ss:$16 sps:$4 sm:$0xff]  }
  0xc2   :  { %2071 = vmatmul.mubr.bf16.vlgmr.msra.gmra.mxu0 %v4565_v20  ;;  %v4658_v20 = vld [vmem:[#allocation5 + $0x388] ss:$16 sps:$4 sm:$0xff]  }
  0xc3   :  { %2184 = vmatmul.mubr.bf16.vlgmr.msra.gmra.mxu1 %v4568_v21  ;;  %2265 = vmatpush1.bf16.msra.mxu0 %v4569_v22  ;;  %v4667_v21 = vld [vmem:[#allocation5 + $0x16c] ss:$16 sps:$4 sm:$0xff]  }
  0xc4   :  { %2378 = vmatpush1.bf16.msra.mxu1 %v4572_v23  ;;  %2266 = vmatprep.subr.bf16.mxu0 %v4577_v24  ;;  %v4670_v22 = vld [vmem:[#allocation5 + $0x36c] ss:$16 sps:$4 sm:$0xff]   ;;  %v5234_v24 = vld [vmem:[#allocation2 + $0x168] ss:$28 sps:$4 sm:$0xff]  }
  0xc5   :  { %2379 = vmatprep.subr.bf16.mxu1 %v4580_v25  ;;  %2080 = vmatprep.mubr.bf16.mxu0 %v5178_v26  ;;  %v5232_v23 = vld [vmem:[#allocation2 + $0x160] ss:$28 sps:$4 sm:$0xff]   ;;  %v4665_v25 = vld [vmem:[#allocation5 + $0x168] ss:$16 sps:$4 sm:$0xff]  }
  0xc6   :  { %2193 = vmatprep.mubr.bf16.mxu1 %v5117_v18 }
  0xc7   :  { %2267 = vmatpush1.bf16.msra.mxu0 %v4575_v27  ;;  %v4668_v27 = vld [vmem:[#allocation5 + $0x368] ss:$16 sps:$4 sm:$0xff]  }
  0xc8   :  { %2380 = vmatpush1.bf16.msra.mxu1 %v4578_v28  ;;  %2268 = vmatprep.subr.bf16.mxu0 %v4587_v29  ;;  %v4673_v28 = vld [vmem:[#allocation5 + $0x14c] ss:$16 sps:$4 sm:$0xff]  }
  0xc9   :  { %2381 = vmatprep.subr.bf16.mxu1 %v4590_v30  ;;  %v4676_v29 = vld [vmem:[#allocation5 + $0x34c] ss:$16 sps:$4 sm:$0xff]  }
  0xca   :  { %2081 = vmatmul.mubr.bf16.gmra.mxu0 %v5182_v31  ;;  %v5236_v30 = vld [vmem:[#allocation2 + $0x19c] ss:$28 sps:$4 sm:$0xff]  }
  0xcb   :  { %2194 = vmatmul.mubr.bf16.gmra.mxu1 %v5184_v32  ;;  %2269 = vmatpush1.bf16.msra.mxu0 %v4585_v33  ;;  %v4671_v33 = vld [vmem:[#allocation5 + $0x148] ss:$16 sps:$4 sm:$0xff]  }
  0xcc   :  { %2382 = vmatpush1.bf16.msra.mxu1 %v4588_v34  ;;  %2270 = vmatprep.subr.bf16.mxu0 %v4593_v35  ;;  %v4674_v34 = vld [vmem:[#allocation5 + $0x348] ss:$16 sps:$4 sm:$0xff]   ;;  %v4683_v35 = vld [vmem:[#allocation5 + $0x12c] ss:$16 sps:$4 sm:$0xff]  }
  0xcd   :  { %2383 = vmatprep.subr.bf16.mxu1 %v4596_v36  ;;  %2090 = vmatprep.mubr.bf16.mxu0 %v5186_v37  ;;  %v4686_v36 = vld [vmem:[#allocation5 + $0x32c] ss:$16 sps:$4 sm:$0xff]  }
  0xce   :  { %2203 = vmatprep.mubr.bf16.mxu1 %v5117_v18 }
  0xcf   :  { %2271 = vmatpush1.bf16.msra.mxu0 %v4591_v38  ;;  %v5242_v38 = vld [vmem:[#allocation2 + $0x198] ss:$28 sps:$4 sm:$0xff]  }
  0xd0   :  { %2384 = vmatpush1.bf16.msra.mxu1 %v4594_v39  ;;  %2272 = vmatprep.subr.bf16.mxu0 %v4603_v41  ;;  %v5244_v39 = vld [vmem:[#allocation2 + $0x1a0] ss:$28 sps:$4 sm:$0xff]   ;;  %v4681_v41 = vld [vmem:[#allocation5 + $0x128] ss:$16 sps:$4 sm:$0xff]  }
  0xd1   :  { %2385 = vmatprep.subr.bf16.mxu1 %v4606_v42  ;;  %v4684_v42 = vld [vmem:[#allocation5 + $0x328] ss:$16 sps:$4 sm:$0xff]  }
  0xd2   :  { %2091 = vmatmul.mubr.bf16.gmra.mxu0 %v5190_v40 }
  0xd3   :  { %2204 = vmatmul.mubr.bf16.gmra.mxu1 %v5194_v43  ;;  %2273 = vmatpush1.bf16.msra.mxu0 %v4601_v44  ;;  %v4689_v44 = vld [vmem:[#allocation5 + $0x10c] ss:$16 sps:$4 sm:$0xff]  }
  0xd4   :  { %2386 = vmatpush1.bf16.msra.mxu1 %v4604_v45  ;;  %2274 = vmatprep.subr.bf16.mxu0 %v4609_v46  ;;  %v4692_v45 = vld [vmem:[#allocation5 + $0x30c] ss:$16 sps:$4 sm:$0xff]   ;;  %v4687_v46 = vld [vmem:[#allocation5 + $0x108] ss:$16 sps:$4 sm:$0xff]  }
  0xd5   :  { %2387 = vmatprep.subr.bf16.mxu1 %v4612_v47  ;;  %2100 = vmatprep.mubr.bf16.mxu0 %v5196_v48  ;;  %v4690_v47 = vld [vmem:[#allocation5 + $0x308] ss:$16 sps:$4 sm:$0xff]  }
  0xd6   :  { %2213 = vmatprep.mubr.bf16.mxu1 %v5117_v18 }
  0xd7   :  { %2275 = vmatpush1.bf16.msra.mxu0 %v4607_v49  ;;  %v4695_v49 = vld [vmem:[#allocation5 + $0x4ec] ss:$16 sps:$4 sm:$0xff]  }
  0xd8   :  { %2388 = vmatpush1.bf16.msra.mxu1 %v4610_v50  ;;  %2276 = vmatprep.subr.bf16.mxu0 %v4619_v52  ;;  %v4698_v50 = vld [vmem:[#allocation5 + $0x6ec] ss:$16 sps:$4 sm:$0xff]   ;;  %v4941_v52 = vld [vmem:[#allocation2 + $0x4] ss:$28 sps:$4 sm:$0xff]  }
  0xd9   :  { %2389 = vmatprep.subr.bf16.mxu1 %v4622_v53  ;;  %v4942_v53 = vld [vmem:[#allocation2 + $0xc] ss:$28 sps:$4 sm:$0xff]  }
  0xda   :  { %2101 = vmatmul.mubr.bf16.gmra.mxu0 %v5200_v51 }
  0xdb   :  { %2214 = vmatmul.mubr.bf16.gmra.mxu1 %v5204_v54  ;;  %2277 = vmatpush1.bf16.msra.mxu0 %v4617_v55  ;;  %v4693_v55 = vld [vmem:[#allocation5 + $0x4e8] ss:$16 sps:$4 sm:$0xff]  }
  0xdc   :  { %2390 = vmatpush1.bf16.msra.mxu1 %v4620_v56  ;;  %2278 = vmatprep.subr.bf16.mxu0 %v4625_v57  ;;  %v4696_v56 = vld [vmem:[#allocation5 + $0x6e8] ss:$16 sps:$4 sm:$0xff]   ;;  %v4701_v57 = vld [vmem:[#allocation5 + $0x4cc] ss:$16 sps:$4 sm:$0xff]  }
  0xdd   :  { %2391 = vmatprep.subr.bf16.mxu1 %v4628_v58  ;;  %2110 = vmatprep.mubr.bf16.mxu0 %v5206_v59  ;;  %v4707_v58 = vld [vmem:[#allocation5 + $0x6cc] ss:$16 sps:$4 sm:$0xff]  }
  0xde   :  { %2223 = vmatprep.mubr.bf16.mxu1 %v5117_v18 }
  0xdf   :  { %2279 = vmatpush1.bf16.msra.mxu0 %v4623_v60  ;;  %v4943_v60 = vld [vmem:[#allocation2] ss:$28 sps:$4 sm:$0xff]  }
  0xe0   :  { %2392 = vmatpush1.bf16.msra.mxu1 %v4626_v61  ;;  %2280 = vmatprep.subr.bf16.mxu0 %v4635_v62  ;;  %v4944_v61 = vld [vmem:[#allocation2 + $0x8] ss:$28 sps:$4 sm:$0xff]  }
  0xe1   :  { %2393 = vmatprep.subr.bf16.mxu1 %v4638_v63  ;;  %v4699_v62 = vld [vmem:[#allocation5 + $0x4c8] ss:$16 sps:$4 sm:$0xff]  }
  0xe2   :  { %2111 = vmatmul.mubr.bf16.gmra.mxu0 %v5212_v0  ;;  %v4705_v63 = vld [vmem:[#allocation5 + $0x6c8] ss:$16 sps:$4 sm:$0xff]  }
  0xe3   :  { %2224 = vmatmul.mubr.bf16.gmra.mxu1 %v5214_v1  ;;  %2281 = vmatpush2.bf16.msra.mxu0 %v4633_v2  ;;  %v4945_v2 = vld [vmem:[#allocation2 + $0x3c] ss:$28 sps:$4 sm:$0xff]  }
  0xe4   :  { %2394 = vmatpush2.bf16.msra.mxu1 %v4636_v3  ;;  %2282 = vmatprep.subr.bf16.mxu0 %v4641_v4  ;;  %v4704_v3 = vld [vmem:[#allocation5 + $0x4ac] ss:$16 sps:$4 sm:$0xff]  }
  0xe5   :  { %2395 = vmatprep.subr.bf16.mxu1 %v4644_v5  ;;  %2120 = vmatprep.mubr.bf16.mxu0 %v5216_v6  ;;  %v4716_v4 = vld [vmem:[#allocation5 + $0x6ac] ss:$16 sps:$4 sm:$0xff]   ;;  %v4946_v5 = vld [vmem:[#allocation2 + $0x44] ss:$28 sps:$4 sm:$0xff]  }
  0xe6   :  { %2233 = vmatprep.mubr.bf16.mxu1 %v5117_v18 }
  0xe7   :  { %2283 = vmatpush2.bf16.msra.mxu0 %v4639_v7  ;;  %v4702_v7 = vld [vmem:[#allocation5 + $0x4a8] ss:$16 sps:$4 sm:$0xff]  }
  0xe8   :  { %2396 = vmatpush2.bf16.msra.mxu1 %v4642_v8  ;;  %2284 = vmatprep.subr.bf16.mxu0 %v4651_v9  ;;  %v4710_v8 = vld [vmem:[#allocation5 + $0x48c] ss:$16 sps:$4 sm:$0xff]   ;;  %v4714_v9 = vld [vmem:[#allocation5 + $0x6a8] ss:$16 sps:$4 sm:$0xff]  }
  0xe9   :  { %2397 = vmatprep.subr.bf16.mxu1 %v4654_v10  ;;  %v4947_v10 = vld [vmem:[#allocation2 + $0x38] ss:$28 sps:$4 sm:$0xff]  }
  0xea   :  { %2121 = vmatmul.mubr.bf16.gmra.mxu0 %v5222_v11 }
  0xeb   :  { %2234 = vmatmul.mubr.bf16.gmra.mxu1 %v5224_v12  ;;  %2285 = vmatpush2.bf16.msra.mxu0 %v4649_v13  ;;  %v4948_v13 = vld [vmem:[#allocation2 + $0x40] ss:$28 sps:$4 sm:$0xff]  }
  0xec   :  { %2398 = vmatpush2.bf16.msra.mxu1 %v4652_v14  ;;  %2286 = vmatprep.subr.bf16.mxu0 %v4657_v15  ;;  %v4725_v14 = vld [vmem:[#allocation5 + $0x68c] ss:$16 sps:$4 sm:$0xff]   ;;  %v4708_v15 = vld [vmem:[#allocation5 + $0x488] ss:$16 sps:$4 sm:$0xff]  }
  0xed   :  { %2399 = vmatprep.subr.bf16.mxu1 %v4660_v16  ;;  %2130 = vmatprep.mubr.bf16.mxu0 %v5226_v17  ;;  %v4949_v16 = vld [vmem:[#allocation2 + $0x74] ss:$28 sps:$4 sm:$0xff]  }
  0xee   :  { %2243 = vmatprep.mubr.bf16.mxu1 %v5117_v18 }
  0xef   :  { %2287 = vmatpush2.bf16.msra.mxu0 %v4655_v19  ;;  %v4950_v19 = vld [vmem:[#allocation2 + $0x7c] ss:$28 sps:$4 sm:$0xff]  }
  0xf0   :  { %2400 = vmatpush2.bf16.msra.mxu1 %v4658_v20  ;;  %2288 = vmatprep.subr.bf16.mxu0 %v4667_v21  ;;  %v4713_v20 = vld [vmem:[#allocation5 + $0x46c] ss:$16 sps:$4 sm:$0xff]   ;;  %v4723_v21 = vld [vmem:[#allocation5 + $0x688] ss:$16 sps:$4 sm:$0xff]  }
  0xf1   :  { %2401 = vmatprep.subr.bf16.mxu1 %v4670_v22  ;;  %v4711_v22 = vld [vmem:[#allocation5 + $0x468] ss:$16 sps:$4 sm:$0xff]  }
  0xf2   :  { %2131 = vmatmul.mubr.bf16.gmra.mxu0 %v5232_v23 }
  0xf3   :  { %2244 = vmatmul.mubr.bf16.gmra.mxu1 %v5234_v24  ;;  %2289 = vmatpush2.bf16.msra.mxu0 %v4665_v25  ;;  %v4719_v25 = vld [vmem:[#allocation5 + $0x44c] ss:$16 sps:$4 sm:$0xff]  }
  0xf4   :  { %2402 = vmatpush2.bf16.msra.mxu1 %v4668_v27  ;;  %2290 = vmatprep.subr.bf16.mxu0 %v4673_v28  ;;  %v4732_v27 = vld [vmem:[#allocation5 + $0x668] ss:$16 sps:$4 sm:$0xff]  }
  0xf5   :  { %2403 = vmatprep.subr.bf16.mxu1 %v4676_v29  ;;  %2140 = vmatprep.mubr.bf16.mxu0 %v5236_v30  ;;  %v4717_v28 = vld [vmem:[#allocation5 + $0x448] ss:$16 sps:$4 sm:$0xff]   ;;  %v4734_v29 = vld [vmem:[#allocation5 + $0x66c] ss:$16 sps:$4 sm:$0xff]  }
  0xf6   :  { %2253 = vmatprep.mubr.bf16.mxu1 %v5117_v18 }
  0xf7   :  { %2291 = vmatpush2.bf16.msra.mxu0 %v4671_v33  ;;  %v4743_v33 = vld [vmem:[#allocation5 + $0x64c] ss:$16 sps:$4 sm:$0xff]  }
  0xf8   :  { %2404 = vmatpush2.bf16.msra.mxu1 %v4674_v34  ;;  %2292 = vmatprep.subr.bf16.mxu0 %v4683_v35  ;;  %v4951_v34 = vld [vmem:[#allocation2 + $0x70] ss:$28 sps:$4 sm:$0xff]   ;;  %v4952_v35 = vld [vmem:[#allocation2 + $0x78] ss:$28 sps:$4 sm:$0xff]  }
  0xf9   :  { %2405 = vmatprep.subr.bf16.mxu1 %v4686_v36  ;;  %v4722_v36 = vld [vmem:[#allocation5 + $0x42c] ss:$16 sps:$4 sm:$0xff]  }
  0xfa   :  { %2141 = vmatmul.mubr.bf16.gmra.mxu0 %v5242_v38 }
  0xfb   :  { %2254 = vmatmul.mubr.bf16.gmra.mxu1 %v5244_v39  ;;  %2293 = vmatpush2.bf16.msra.mxu0 %v4681_v41  ;;  %v4953_v41 = vld [vmem:[#allocation2 + $0xac] ss:$28 sps:$4 sm:$0xff]  }
  0xfc   :  { %2406 = vmatpush2.bf16.msra.mxu1 %v4684_v42  ;;  %2294 = vmatprep.subr.bf16.mxu0 %v4689_v44  ;;  %v4954_v42 = vld [vmem:[#allocation2 + $0xb4] ss:$28 sps:$4 sm:$0xff]   ;;  %v4720_v44 = vld [vmem:[#allocation5 + $0x428] ss:$16 sps:$4 sm:$0xff]  }
  0xfd   :  { %2407 = vmatprep.subr.bf16.mxu1 %v4692_v45  ;;  %2296 = vmatprep.mubr.bf16.mxu0 %v4941_v52  ;;  %v4728_v45 = vld [vmem:[#allocation5 + $0x40c] ss:$16 sps:$4 sm:$0xff]  }
  0xfe   :  { %2409 = vmatprep.mubr.bf16.mxu1 %v4942_v53  ;;  %v4956_v52 = vld [vmem:[#allocation2 + $0xb0] ss:$28 sps:$4 sm:$0xff]  }
  0xff   :  { %2295 = vmatpush2.bf16.msra.mxu0 %v4687_v46  ;;  %v4741_v46 = vld [vmem:[#allocation5 + $0x648] ss:$16 sps:$4 sm:$0xff]   ;;  %v4731_v53 = vld [vmem:[#allocation5 + $0x5ec] ss:$16 sps:$4 sm:$0xff]  }
 0x100   :  { %2408 = vmatpush2.bf16.msra.mxu1 %v4690_v47  ;;  %2490 = vmatprep.subr.bf16.mxu0 %v4695_v49  ;;  %v4752_v47 = vld [vmem:[#allocation5 + $0x62c] ss:$16 sps:$4 sm:$0xff]   ;;  %v4726_v49 = vld [vmem:[#allocation5 + $0x408] ss:$16 sps:$4 sm:$0xff]  }
 0x101   :  { %2603 = vmatprep.subr.bf16.mxu1 %v4698_v50  ;;  %v4955_v50 = vld [vmem:[#allocation2 + $0xa8] ss:$28 sps:$4 sm:$0xff]  }
 0x102   :  { %2297 = vmatmul.mubr.bf16.vlgmr.msra.gmra.mxu0 %v4943_v60  ;;  %v4737_v60 = vld [vmem:[#allocation5 + $0x5cc] ss:$16 sps:$4 sm:$0xff]  }
 0x103   :  { %2410 = vmatmul.mubr.bf16.vlgmr.msra.gmra.mxu1 %v4944_v61  ;;  %2491 = vmatpush1.bf16.msra.mxu0 %v4693_v55  ;;  %v4957_v55 = vld [vmem:[#allocation2 + $0xe4] ss:$28 sps:$4 sm:$0xff]   ;;  %v4761_v61 = vld [vmem:[#allocation5 + $0x60c] ss:$16 sps:$4 sm:$0xff]  }
 0x104   :  { %2604 = vmatpush1.bf16.msra.mxu1 %v4696_v56  ;;  %2492 = vmatprep.subr.bf16.mxu0 %v4701_v57  ;;  %v4750_v56 = vld [vmem:[#allocation5 + $0x628] ss:$16 sps:$4 sm:$0xff]  }
 0x105   :  { %2306 = vmatprep.mubr.bf16.mxu0 %v4945_v2  ;;  %2419 = vmatprep.mubr.bf16.mxu1 %v4946_v5  ;;  %v4958_v57 = vld [vmem:[#allocation2 + $0xec] ss:$28 sps:$4 sm:$0xff]   ;;  %v4959_v2 = vld [vmem:[#allocation2 + $0xe0] ss:$28 sps:$4 sm:$0xff]  }
 0x106   :  { %2605 = vmatprep.subr.bf16.mxu1 %v4707_v58  ;;  %v4729_v58 = vld [vmem:[#allocation5 + $0x5e8] ss:$16 sps:$4 sm:$0xff]  }
 0x107   :  { %2493 = vmatpush1.bf16.msra.mxu0 %v4699_v62  ;;  %v4759_v62 = vld [vmem:[#allocation5 + $0x608] ss:$16 sps:$4 sm:$0xff]  }
 0x108   :  { %2606 = vmatpush1.bf16.msra.mxu1 %v4705_v63  ;;  %2494 = vmatprep.subr.bf16.mxu0 %v4704_v3  ;;  %v4735_v63 = vld [vmem:[#allocation5 + $0x5c8] ss:$16 sps:$4 sm:$0xff]  }
 0x109   :  { %2607 = vmatprep.subr.bf16.mxu1 %v4716_v4  ;;  %v4960_v3 = vld [vmem:[#allocation2 + $0xe8] ss:$28 sps:$4 sm:$0xff]   ;;  %v4740_v4 = vld [vmem:[#allocation5 + $0x5ac] ss:$16 sps:$4 sm:$0xff]  }
 0x10a   :  { %2307 = vmatmul.mubr.bf16.gmra.mxu0 %v4947_v10  ;;  %v4961_v5 = vld [vmem:[#allocation2 + $0x11c] ss:$28 sps:$4 sm:$0xff]  }
 0x10b   :  { %2420 = vmatmul.mubr.bf16.gmra.mxu1 %v4948_v13  ;;  %2495 = vmatpush1.bf16.msra.mxu0 %v4702_v7  ;;  %v4962_v7 = vld [vmem:[#allocation2 + $0x124] ss:$28 sps:$4 sm:$0xff]   ;;  %v4963_v10 = vld [vmem:[#allocation2 + $0x118] ss:$28 sps:$4 sm:$0xff]  }
 0x10c   :  { %2316 = vmatprep.mubr.bf16.mxu0 %v4949_v16  ;;  %2496 = vmatprep.subr.bf16.mxu0 %v4710_v8  ;;  %v4738_v8 = vld [vmem:[#allocation5 + $0x5a8] ss:$16 sps:$4 sm:$0xff]   ;;  %v4964_v13 = vld [vmem:[#allocation2 + $0x120] ss:$28 sps:$4 sm:$0xff]  }
 0x10d   :  { %2429 = vmatprep.mubr.bf16.mxu1 %v4950_v19  ;;  %2608 = vmatpush1.bf16.msra.mxu1 %v4714_v9  ;;  %v4746_v9 = vld [vmem:[#allocation5 + $0x58c] ss:$16 sps:$4 sm:$0xff]  }
 0x10e   :  { %2609 = vmatprep.subr.bf16.mxu1 %v4725_v14  ;;  %v4744_v14 = vld [vmem:[#allocation5 + $0x588] ss:$16 sps:$4 sm:$0xff]   ;;  %v4749_v19 = vld [vmem:[#allocation5 + $0x56c] ss:$16 sps:$4 sm:$0xff]  }
 0x10f   :  { %2497 = vmatpush1.bf16.msra.mxu0 %v4708_v15  ;;  %v4965_v15 = vld [vmem:[#allocation2 + $0x154] ss:$28 sps:$4 sm:$0xff]   ;;  %v4966_v16 = vld [vmem:[#allocation2 + $0x15c] ss:$28 sps:$4 sm:$0xff]  }
 0x110   :  { %2498 = vmatprep.subr.bf16.mxu0 %v4713_v20  ;;  %v4747_v20 = vld [vmem:[#allocation5 + $0x568] ss:$16 sps:$4 sm:$0xff]  }
 0x111   :  { %2610 = vmatpush1.bf16.msra.mxu1 %v4723_v21  ;;  %v4755_v21 = vld [vmem:[#allocation5 + $0x54c] ss:$16 sps:$4 sm:$0xff]  }
 0x112   :  { %2317 = vmatmul.mubr.bf16.gmra.mxu0 %v4951_v34  ;;  %2611 = vmatprep.subr.bf16.mxu1 %v4734_v29  ;;  %v384_v29 = vlaneseq  ;;  %v4758_v34 = vld [vmem:[#allocation5 + $0x52c] ss:$16 sps:$4 sm:$0xff]  }
 0x113   :  { %2430 = vmatmul.mubr.bf16.gmra.mxu1 %v4952_v35  ;;  %2499 = vmatpush1.bf16.msra.mxu0 %v4711_v22  ;;  %v4967_v22 = vld [vmem:[#allocation2 + $0x150] ss:$28 sps:$4 sm:$0xff]   ;;  %v4756_v35 = vld [vmem:[#allocation5 + $0x528] ss:$16 sps:$4 sm:$0xff]  }
 0x114   :  { %2326 = vmatprep.mubr.bf16.mxu0 %v4953_v41  ;;  %2500 = vmatprep.subr.bf16.mxu0 %v4719_v25  ;;  %v4968_v25 = vld [vmem:[#allocation2 + $0x158] ss:$28 sps:$4 sm:$0xff]   ;;  %v4764_v41 = vld [vmem:[#allocation5 + $0x50c] ss:$16 sps:$4 sm:$0xff]  }
 0x115   :  { %2439 = vmatprep.mubr.bf16.mxu1 %v4954_v42  ;;  %2612 = vmatpush1.bf16.msra.mxu1 %v4732_v27  ;;  %v4753_v27 = vld [vmem:[#allocation5 + $0x548] ss:$16 sps:$4 sm:$0xff]  }
 0x116   :  { %2613 = vmatprep.subr.bf16.mxu1 %v4743_v33  ;;  %v4970_v33 = vld [vmem:[#allocation2 + $0x194] ss:$28 sps:$4 sm:$0xff]   ;;  %v4971_v42 = vld [vmem:[#allocation2 + $0x188] ss:$28 sps:$4 sm:$0xff]  }
 0x117   :  { %2501 = vmatpush1.bf16.msra.mxu0 %v4717_v28  ;;  %v4969_v28 = vld [vmem:[#allocation2 + $0x18c] ss:$28 sps:$4 sm:$0xff]  }
 0x118   :  { %2502 = vmatprep.subr.bf16.mxu0 %v4722_v36  ;;  %v5248_v36 = vshrl.u32 %v384_v29, 7 }
 0x119   :  { %2614 = vmatpush1.bf16.msra.mxu1 %v4741_v46  ;;  %v4973_v46 = vld [vmem:[#allocation2 + $0x14] ss:$28 sps:$4 sm:$0xff]  }
 0x11a   :  { %2327 = vmatmul.mubr.bf16.gmra.mxu0 %v4955_v50  ;;  %2615 = vmatprep.subr.bf16.mxu1 %v4752_v47  ;;  %5896 = vst [vmem:[#allocation16_spill] sm:$0xff] %v5248_v36  ;;  %v5889_v47 = vsub.s32 0, %v5248_v36  ;;  %v4767_v50 = vld [vmem:[#allocation8 + $0x74] ss:$8 sps:$4 sm:$0xff]  }
 0x11b   :  { %2440 = vmatmul.mubr.bf16.gmra.mxu1 %v4956_v52  ;;  %2503 = vmatpush1.bf16.msra.mxu0 %v4720_v44  ;;  %v4972_v44 = vld [vmem:[#allocation2 + $0x190] ss:$28 sps:$4 sm:$0xff]   ;;  %v5890_v52 = vsub.s32 1, %v5248_v36 }
 0x11c   :  { %2336 = vmatprep.mubr.bf16.mxu0 %v4957_v55  ;;  %2504 = vmatprep.subr.bf16.mxu0 %v4728_v45  ;;  %v4762_v45 = vld [vmem:[#allocation5 + $0x508] ss:$16 sps:$4 sm:$0xff]   ;;  %v4765_v55 = vld [vmem:[#allocation8 + $0x70] ss:$8 sps:$4 sm:$0xff]  }
 0x11d   :  { %2449 = vmatprep.mubr.bf16.mxu1 %v4958_v57  ;;  %2616 = vmatpush1.bf16.msra.mxu1 %v4750_v56  ;;  %v4770_v57 = vld [vmem:[#allocation8 + $0x64] ss:$8 sps:$4 sm:$0xff]  }
 0x11e   :  { %2617 = vmatprep.subr.bf16.mxu1 %v4761_v61  ;;  %v4974_v61 = vld [vmem:[#allocation2 + $0x10] ss:$28 sps:$4 sm:$0xff]  }
 0x11f   :  { %2505 = vmatpush1.bf16.msra.mxu0 %v4726_v49  ;;  %v5252_v49 = vld [vmem:[#allocation7] sm:$0xf] }
 0x120   :  { %2506 = vmatprep.subr.bf16.mxu0 %v4731_v53  ;;  %5897 = vst [vmem:[#allocation17_spill] sm:$0xff] %v5252_v49  ;;  %v5258_v53 = vrot.slane %v5252_v49, %v5889_v47  ;;  %v5263_v56 = vrot.slane %v5252_v49, %v5890_v52 }
 0x121   :  { %2618 = vmatpush1.bf16.msra.mxu1 %v4759_v62  ;;  %v4975_v62 = vld [vmem:[#allocation2 + $0x18] ss:$28 sps:$4 sm:$0xff]  }
 0x122   :  { %2337 = vmatmul.mubr.bf16.gmra.mxu0 %v4959_v2 }
 0x123   :  { %2450 = vmatmul.mubr.bf16.gmra.mxu1 %v4960_v3  ;;  %2507 = vmatpush2.bf16.msra.mxu0 %v4729_v58 }
 0x124   :  { %2346 = vmatprep.mubr.bf16.mxu0 %v4961_v5  ;;  %2508 = vmatprep.subr.bf16.mxu0 %v4737_v60 }
 0x125   :  { %2459 = vmatprep.mubr.bf16.mxu1 %v4962_v7 }
 0x127   :  { %2509 = vmatpush2.bf16.msra.mxu0 %v4735_v63 }
 0x128   :  { %2510 = vmatprep.subr.bf16.mxu0 %v4740_v4  ;;  %v4768_v4 = vld [vmem:[#allocation8 + $0x60] ss:$8 sps:$4 sm:$0xff]  }
 0x12a   :  { %2347 = vmatmul.mubr.bf16.gmra.mxu0 %v4963_v10 }
 0x12b   :  { %2460 = vmatmul.mubr.bf16.gmra.mxu1 %v4964_v13  ;;  %2511 = vmatpush2.bf16.msra.mxu0 %v4738_v8  ;;  %v4773_v8 = vld [vmem:[#allocation8 + $0x54] ss:$8 sps:$4 sm:$0xff]  }
 0x12c   :  { %2356 = vmatprep.mubr.bf16.mxu0 %v4965_v15  ;;  %2512 = vmatprep.subr.bf16.mxu0 %v4746_v9  ;;  %v4771_v15 = vld [vmem:[#allocation8 + $0x50] ss:$8 sps:$4 sm:$0xff]  }
 0x12d   :  { %2469 = vmatprep.mubr.bf16.mxu1 %v4966_v16  ;;  %v4776_v16 = vld [vmem:[#allocation8 + $0x44] ss:$8 sps:$4 sm:$0xff]  }
 0x12f   :  { %2513 = vmatpush2.bf16.msra.mxu0 %v4744_v14 }
 0x130   :  { %2514 = vmatprep.subr.bf16.mxu0 %v4749_v19 }
 0x132   :  { %2357 = vmatmul.mubr.bf16.gmra.mxu0 %v4967_v22 }
 0x133   :  { %2470 = vmatmul.mubr.bf16.gmra.mxu1 %v4968_v25  ;;  %2515 = vmatpush2.bf16.msra.mxu0 %v4747_v20 }
 0x134   :  { %2366 = vmatprep.mubr.bf16.mxu0 %v4969_v28  ;;  %2516 = vmatprep.subr.bf16.mxu0 %v4755_v21 }
 0x135   :  { %2479 = vmatprep.mubr.bf16.mxu1 %v4970_v33  ;;  %v4779_v33 = vld [vmem:[#allocation8 + $0x34] ss:$8 sps:$4 sm:$0xff]  }
 0x137   :  { %2517 = vmatpush2.bf16.msra.mxu0 %v4753_v27  ;;  %v4774_v27 = vld [vmem:[#allocation8 + $0x40] ss:$8 sps:$4 sm:$0xff]  }
 0x138   :  { %2518 = vmatprep.subr.bf16.mxu0 %v4758_v34 }
 0x13a   :  { %2367 = vmatmul.mubr.bf16.gmra.mxu0 %v4971_v42  ;;  %v4815_v42 = vld [vmem:[#allocation8 + $0x174] ss:$8 sps:$4 sm:$0xff]  }
 0x13b   :  { %2480 = vmatmul.mubr.bf16.gmra.mxu1 %v4972_v44  ;;  %2519 = vmatpush2.bf16.msra.mxu0 %v4756_v35  ;;  %v4782_v44 = vld [vmem:[#allocation8 + $0x24] ss:$8 sps:$4 sm:$0xff]  }
 0x13c   :  { %2522 = vmatprep.mubr.bf16.mxu0 %v4973_v46  ;;  %2520 = vmatprep.subr.bf16.mxu0 %v4764_v41  ;;  %v4777_v41 = vld [vmem:[#allocation8 + $0x30] ss:$8 sps:$4 sm:$0xff]  }
 0x13d   :  { %2635 = vmatprep.mubr.bf16.mxu1 %v5117_v18  ;;  %3321 = vmatprep.subr.bf16.mxu1 %v4815_v42 }
 0x13f   :  { %2521 = vmatpush2.bf16.msra.mxu0 %v4762_v45  ;;  %v4813_v45 = vld [vmem:[#allocation8 + $0x170] ss:$8 sps:$4 sm:$0xff]  }
 0x140   :  { %3208 = vmatprep.subr.bf16.mxu0 %v4767_v50 }
 0x142   :  { %v1846_v58 = vpop.f32.mrf.mxu0  ;;  %2523 = vmatmul.mubr.bf16.vlgmr.msra.gmra.mxu0 %v4974_v61  ;;  %v4818_v61 = vld [vmem:[#allocation8 + $0x164] ss:$8 sps:$4 sm:$0xff]  }
 0x143   :  { %v1959_v60 = vpop.f32.mrf.mxu1  ;;  %2636 = vmatmul.mubr.bf16.vlgmr.msra.gmra.mxu1 %v4975_v62  ;;  %v1847_v63 = vadd.f32 %v1846_v58, %v5258_v53  ;;  %2532 = vmatprep.mubr.bf16.mxu0 %v5178_v26 }
 0x144   :  { %2645 = vmatprep.mubr.bf16.mxu1 %v5117_v18  ;;  %v1848_v2 = vpop.f32.mrf.mxu0  ;;  %3209 = vmatpush1.bf16.msra.mxu0 %v4765_v55 }
 0x145   :  { %v1961_v3 = vpop.f32.mrf.mxu1  ;;  %v5268_v5 = vadd.f32 %v1959_v60, %v1847_v63  ;;  %v1849_v7 = vadd.f32 %v1848_v2, %v5263_v56  ;;  %3210 = vmatprep.subr.bf16.mxu0 %v4770_v57  ;;  %v4780_v60 = vld [vmem:[#allocation8 + $0x20] ss:$8 sps:$4 sm:$0xff]   ;;  %3322 = vmatpush1.bf16.msra.mxu1 %v4813_v45 }
 0x146   :  { %v5271_v9 = vpop.f32.mrf.mxu0  ;;  %3323 = vmatprep.subr.bf16.mxu1 %v4818_v61 }
 0x147   :  { %v5273_v10 = vpop.f32.mrf.mxu1  ;;  %v5275_v13 = vadd.f32 %v1961_v3, %v1849_v7 }
 0x148   :  { %v5277_v14 = vpop.f32.mrf.mxu0  ;;  %3211 = vmatpush1.bf16.msra.mxu0 %v4768_v4 }
 0x149   :  { %v5279_v26 = vpop.f32.mrf.mxu1  ;;  %3212 = vmatprep.subr.bf16.mxu0 %v4773_v8  ;;  %v4783_v8 = vld [vmem:[#allocation8 + $0x10] ss:$8 sps:$4 sm:$0xff]  }
 0x14a   :  { %v1856_v19 = vpop.f32.mrf.mxu0  ;;  %2533 = vmatmul.mubr.bf16.gmra.mxu0 %v5182_v31 }
 0x14b   :  { %v1969_v20 = vpop.f32.mrf.mxu1  ;;  %2646 = vmatmul.mubr.bf16.gmra.mxu1 %v5184_v32  ;;  %v1857_v21 = vadd.f32 %v1856_v19, %v5258_v53  ;;  %2542 = vmatprep.mubr.bf16.mxu0 %v5186_v37  ;;  %v4819_v19 = vld [vmem:[#allocation8 + $0x150] ss:$8 sps:$4 sm:$0xff]  }
 0x14c   :  { %2655 = vmatprep.mubr.bf16.mxu1 %v5117_v18  ;;  %v1858_v22 = vpop.f32.mrf.mxu0  ;;  %3213 = vmatpush1.bf16.msra.mxu0 %v4771_v15  ;;  %v4821_v15 = vld [vmem:[#allocation8 + $0x154] ss:$8 sps:$4 sm:$0xff]  }
 0x14d   :  { %v1971_v25 = vpop.f32.mrf.mxu1  ;;  %v5286_v28 = vadd.f32 %v1969_v20, %v1857_v21  ;;  %v1859_v29 = vadd.f32 %v1858_v22, %v5263_v56  ;;  %3214 = vmatprep.subr.bf16.mxu0 %v4776_v16  ;;  %v4788_v16 = vld [vmem:[#allocation8 + $0x4] ss:$8 sps:$4 sm:$0xff]  }
 0x14e   :  { %v5289_v34 = vpop.f32.mrf.mxu0 }
 0x14f   :  { %v5291_v31 = vpop.f32.mrf.mxu1  ;;  %v5293_v32 = vadd.f32 %v1971_v25, %v1859_v29  ;;  %v4786_v29 = vld [vmem:[#allocation8] ss:$8 sps:$4 sm:$0xff]   ;;  %v1861_v36 = vadd.f32 %v5289_v34, %v5258_v53 }
 0x150   :  { %v5295_v35 = vpop.f32.mrf.mxu0  ;;  %3215 = vmatpush1.bf16.msra.mxu0 %v4774_v27 }
 0x151   :  { %v5297_v37 = vpop.f32.mrf.mxu1  ;;  %3216 = vmatprep.subr.bf16.mxu0 %v4779_v33  ;;  %v4824_v33 = vld [vmem:[#allocation8 + $0x144] ss:$8 sps:$4 sm:$0xff]  }
 0x152   :  { %v1866_v46 = vpop.f32.mrf.mxu0  ;;  %2543 = vmatmul.mubr.bf16.gmra.mxu0 %v5190_v40  ;;  %v4785_v40 = vld [vmem:[#allocation8 + $0x14] ss:$8 sps:$4 sm:$0xff]  }
 0x153   :  { %v1979_v50 = vpop.f32.mrf.mxu1  ;;  %2656 = vmatmul.mubr.bf16.gmra.mxu1 %v5194_v43  ;;  %v1867_v55 = vadd.f32 %v1866_v46, %v5258_v53  ;;  %2552 = vmatprep.mubr.bf16.mxu0 %v5196_v48  ;;  %v4816_v43 = vld [vmem:[#allocation8 + $0x160] ss:$8 sps:$4 sm:$0xff]  }
 0x154   :  { %2665 = vmatprep.mubr.bf16.mxu1 %v5117_v18  ;;  %v1868_v57 = vpop.f32.mrf.mxu0  ;;  %3217 = vmatpush1.bf16.msra.mxu0 %v4777_v41 }
 0x155   :  { %v1981_v58 = vpop.f32.mrf.mxu1  ;;  %v5304_v62 = vadd.f32 %v1979_v50, %v1867_v55  ;;  %v1869_v63 = vadd.f32 %v1868_v57, %v5263_v56  ;;  %3218 = vmatprep.subr.bf16.mxu0 %v4782_v44  ;;  %3324 = vmatpush1.bf16.msra.mxu1 %v4816_v43  ;;  %v4789_v55 = vld [vmem:[#allocation8 + $0xf0] ss:$8 sps:$4 sm:$0xff]   ;;  %v4827_v57 = vld [vmem:[#allocation8 + $0x134] ss:$8 sps:$4 sm:$0xff]  }
 0x156   :  { %v5307_v2 = vpop.f32.mrf.mxu0  ;;  %3325 = vmatprep.subr.bf16.mxu1 %v4821_v15  ;;  %v4792_v15 = vld [vmem:[#allocation8 + $0xe0] ss:$8 sps:$4 sm:$0xff]  }
 0x157   :  { %v5309_v3 = vpop.f32.mrf.mxu1  ;;  %v5311_v48 = vadd.f32 %v1981_v58, %v1869_v63  ;;  %v4794_v58 = vld [vmem:[#allocation8 + $0xe4] ss:$8 sps:$4 sm:$0xff]  }
 0x158   :  { %v5313_v4 = vpop.f32.mrf.mxu0  ;;  %3219 = vmatpush1.bf16.msra.mxu0 %v4780_v60  ;;  %v4825_v60 = vld [vmem:[#allocation8 + $0x130] ss:$8 sps:$4 sm:$0xff]  }
 0x159   :  { %v5315_v7 = vpop.f32.mrf.mxu1  ;;  %3220 = vmatprep.subr.bf16.mxu0 %v4785_v40  ;;  %3326 = vmatpush1.bf16.msra.mxu1 %v4819_v19 }
 0x15a   :  { %v1876_v20 = vpop.f32.mrf.mxu0  ;;  %2553 = vmatmul.mubr.bf16.gmra.mxu0 %v5200_v51  ;;  %v4791_v51 = vld [vmem:[#allocation8 + $0xf4] ss:$8 sps:$4 sm:$0xff]   ;;  %3327 = vmatprep.subr.bf16.mxu1 %v4824_v33 }
 0x15b   :  { %v1989_v21 = vpop.f32.mrf.mxu1  ;;  %2666 = vmatmul.mubr.bf16.gmra.mxu1 %v5204_v54  ;;  %v1877_v22 = vadd.f32 %v1876_v20, %v5258_v53  ;;  %2562 = vmatprep.mubr.bf16.mxu0 %v5206_v59  ;;  %v4822_v54 = vld [vmem:[#allocation8 + $0x140] ss:$8 sps:$4 sm:$0xff]   ;;  %v4833_v33 = vld [vmem:[#allocation8 + $0x114] ss:$8 sps:$4 sm:$0xff]  }
 0x15c   :  { %2675 = vmatprep.mubr.bf16.mxu1 %v5117_v18  ;;  %v1878_v25 = vpop.f32.mrf.mxu0  ;;  %3221 = vmatpush1.bf16.msra.mxu0 %v4783_v8 }
 0x15d   :  { %v1991_v27 = vpop.f32.mrf.mxu1  ;;  %v5322_v41 = vadd.f32 %v1989_v21, %v1877_v22  ;;  %v1879_v42 = vadd.f32 %v1878_v25, %v5263_v56  ;;  %3222 = vmatprep.subr.bf16.mxu0 %v4788_v16  ;;  %3328 = vmatpush1.bf16.msra.mxu1 %v4822_v54  ;;  %v4830_v16 = vld [vmem:[#allocation8 + $0x124] ss:$8 sps:$4 sm:$0xff]  }
 0x15e   :  { %v5325_v44 = vpop.f32.mrf.mxu0  ;;  %3329 = vmatprep.subr.bf16.mxu1 %v4827_v57 }
 0x15f   :  { %v5327_v45 = vpop.f32.mrf.mxu1  ;;  %v5329_v59 = vadd.f32 %v1991_v27, %v1879_v42  ;;  %v4800_v42 = vld [vmem:[#allocation8 + $0xc4] ss:$8 sps:$4 sm:$0xff]  }
 0x160   :  { %v5331_v46 = vpop.f32.mrf.mxu0  ;;  %3223 = vmatpush1.bf16.msra.mxu0 %v4786_v29  ;;  %v4795_v29 = vld [vmem:[#allocation8 + $0xd0] ss:$8 sps:$4 sm:$0xff]  }
 0x161   :  { %v5333_v50 = vpop.f32.mrf.mxu1  ;;  %3224 = vmatprep.subr.bf16.mxu0 %v4791_v51  ;;  %3330 = vmatpush1.bf16.msra.mxu1 %v4825_v60  ;;  %v4831_v51 = vld [vmem:[#allocation8 + $0x110] ss:$8 sps:$4 sm:$0xff]  }
 0x162   :  { %v1886_v61 = vpop.f32.mrf.mxu0  ;;  %2563 = vmatmul.mubr.bf16.gmra.mxu0 %v5212_v0  ;;  %v4797_v0 = vld [vmem:[#allocation8 + $0xd4] ss:$8 sps:$4 sm:$0xff]   ;;  %3331 = vmatprep.subr.bf16.mxu1 %v4830_v16 }
 0x163   :  { %v1999_v63 = vpop.f32.mrf.mxu1  ;;  %2676 = vmatmul.mubr.bf16.gmra.mxu1 %v5214_v1  ;;  %v1887_v40 = vadd.f32 %v1886_v61, %v5258_v53  ;;  %2572 = vmatprep.mubr.bf16.mxu0 %v5216_v6  ;;  %v4828_v1 = vld [vmem:[#allocation8 + $0x120] ss:$8 sps:$4 sm:$0xff]  }
 0x164   :  { %2685 = vmatprep.mubr.bf16.mxu1 %v5117_v18  ;;  %v1888_v43 = vpop.f32.mrf.mxu0  ;;  %3225 = vmatpush2.bf16.msra.mxu0 %v4789_v55  ;;  %v4798_v61 = vld [vmem:[#allocation8 + $0xc0] ss:$8 sps:$4 sm:$0xff]  }
 0x165   :  { %v2001_v8 = vpop.f32.mrf.mxu1  ;;  %v5340_v19 = vadd.f32 %v1999_v63, %v1887_v40  ;;  %v1889_v20 = vadd.f32 %v1888_v43, %v5263_v56  ;;  %3226 = vmatprep.subr.bf16.mxu0 %v4794_v58  ;;  %3332 = vmatpush1.bf16.msra.mxu1 %v4828_v1  ;;  %v4836_v63 = vld [vmem:[#allocation8 + $0x104] ss:$8 sps:$4 sm:$0xff]   ;;  %v4839_v1 = vld [vmem:[#allocation8 + $0x1f4] ss:$8 sps:$4 sm:$0xff]  }
 0x166   :  { %v5343_v21 = vpop.f32.mrf.mxu0  ;;  %3333 = vmatprep.subr.bf16.mxu1 %v4833_v33  ;;  %v4837_v33 = vld [vmem:[#allocation8 + $0x1f0] ss:$8 sps:$4 sm:$0xff]  }
 0x167   :  { %v5345_v22 = vpop.f32.mrf.mxu1  ;;  %v5347_v6 = vadd.f32 %v2001_v8, %v1889_v20 }
 0x168   :  { %v5349_v25 = vpop.f32.mrf.mxu0  ;;  %3227 = vmatpush2.bf16.msra.mxu0 %v4792_v15 }
 0x169   :  { %v5351_v27 = vpop.f32.mrf.mxu1  ;;  %3228 = vmatprep.subr.bf16.mxu0 %v4797_v0  ;;  %3334 = vmatpush1.bf16.msra.mxu1 %v4831_v51  ;;  %v4801_v0 = vld [vmem:[#allocation8 + $0xb0] ss:$8 sps:$4 sm:$0xff]  }
 0x16a   :  { %v1896_v54 = vpop.f32.mrf.mxu0  ;;  %2573 = vmatmul.mubr.bf16.gmra.mxu0 %v5222_v11  ;;  %v4803_v11 = vld [vmem:[#allocation8 + $0xb4] ss:$8 sps:$4 sm:$0xff]   ;;  %3335 = vmatprep.subr.bf16.mxu1 %v4836_v63 }
 0x16b   :  { %v2009_v55 = vpop.f32.mrf.mxu1  ;;  %2686 = vmatmul.mubr.bf16.gmra.mxu1 %v5224_v12  ;;  %v1897_v57 = vadd.f32 %v1896_v54, %v5258_v53  ;;  %2582 = vmatprep.mubr.bf16.mxu0 %v5226_v17  ;;  %v4834_v12 = vld [vmem:[#allocation8 + $0x100] ss:$8 sps:$4 sm:$0xff]  }
 0x16c   :  { %2695 = vmatprep.mubr.bf16.mxu1 %v5117_v18  ;;  %v1898_v58 = vpop.f32.mrf.mxu0  ;;  %3229 = vmatpush2.bf16.msra.mxu0 %v4795_v29  ;;  %v4806_v29 = vld [vmem:[#allocation8 + $0xa4] ss:$8 sps:$4 sm:$0xff]  }
 0x16d   :  { %v2011_v60 = vpop.f32.mrf.mxu1  ;;  %v5358_v40 = vadd.f32 %v2009_v55, %v1897_v57  ;;  %v1899_v43 = vadd.f32 %v1898_v58, %v5263_v56  ;;  %3230 = vmatprep.subr.bf16.mxu0 %v4800_v42  ;;  %3336 = vmatpush1.bf16.msra.mxu1 %v4834_v12  ;;  %v4804_v58 = vld [vmem:[#allocation8 + $0xa0] ss:$8 sps:$4 sm:$0xff]  }
 0x16e   :  { %v5361_v8 = vpop.f32.mrf.mxu0  ;;  %3337 = vmatprep.subr.bf16.mxu1 %v4839_v1  ;;  %v4845_v1 = vld [vmem:[#allocation8 + $0x1d4] ss:$8 sps:$4 sm:$0xff]  }
 0x16f   :  { %v5363_v15 = vpop.f32.mrf.mxu1  ;;  %v5365_v17 = vadd.f32 %v2011_v60, %v1899_v43  ;;  %v4842_v60 = vld [vmem:[#allocation8 + $0x1e4] ss:$8 sps:$4 sm:$0xff]  }
 0x170   :  { %v5367_v16 = vpop.f32.mrf.mxu0  ;;  %3231 = vmatpush2.bf16.msra.mxu0 %v4798_v61 }
 0x171   :  { %v5369_v20 = vpop.f32.mrf.mxu1  ;;  %3232 = vmatprep.subr.bf16.mxu0 %v4803_v11  ;;  %3338 = vmatpush2.bf16.msra.mxu1 %v4837_v33 }
 0x172   :  { %v1906_v42 = vpop.f32.mrf.mxu0  ;;  %2583 = vmatmul.mubr.bf16.gmra.mxu0 %v5232_v23  ;;  %v4809_v23 = vld [vmem:[#allocation8 + $0x94] ss:$8 sps:$4 sm:$0xff]   ;;  %3339 = vmatprep.subr.bf16.mxu1 %v4842_v60  ;;  %v4810_v60 = vld [vmem:[#allocation8 + $0x80] ss:$8 sps:$4 sm:$0xff]  }
 0x173   :  { %v2019_v51 = vpop.f32.mrf.mxu1  ;;  %2696 = vmatmul.mubr.bf16.gmra.mxu1 %v5234_v24  ;;  %v1907_v54 = vadd.f32 %v1906_v42, %v5258_v53  ;;  %2592 = vmatprep.mubr.bf16.mxu0 %v5236_v30  ;;  %v4840_v24 = vld [vmem:[#allocation8 + $0x1e0] ss:$8 sps:$4 sm:$0xff]   ;;  %v4812_v42 = vld [vmem:[#allocation8 + $0x84] ss:$8 sps:$4 sm:$0xff]  }
 0x174   :  { %2705 = vmatprep.mubr.bf16.mxu1 %v5117_v18  ;;  %v1908_v55 = vpop.f32.mrf.mxu0  ;;  %3233 = vmatpush2.bf16.msra.mxu0 %v4801_v0  ;;  %v4807_v0 = vld [vmem:[#allocation8 + $0x90] ss:$8 sps:$4 sm:$0xff]  }
 0x175   :  { %v2021_v57 = vpop.f32.mrf.mxu1  ;;  %v5376_v61 = vadd.f32 %v2019_v51, %v1907_v54  ;;  %v1909_v63 = vadd.f32 %v1908_v55, %v5263_v56  ;;  %3234 = vmatprep.subr.bf16.mxu0 %v4806_v29  ;;  %3340 = vmatpush2.bf16.msra.mxu1 %v4840_v24  ;;  %v4843_v29 = vld [vmem:[#allocation8 + $0x1d0] ss:$8 sps:$4 sm:$0xff]   ;;  %v4846_v24 = vld [vmem:[#allocation8 + $0x1c0] ss:$8 sps:$4 sm:$0xff]  }
 0x176   :  { %v5379_v43 = vpop.f32.mrf.mxu0  ;;  %3341 = vmatprep.subr.bf16.mxu1 %v4845_v1 }
 0x177   :  { %v5381_v11 = vpop.f32.mrf.mxu1  ;;  %v5383_v18 = vadd.f32 %v2021_v57, %v1909_v63 }
 0x178   :  { %v5385_v30 = vpop.f32.mrf.mxu0  ;;  %3235 = vmatpush2.bf16.msra.mxu0 %v4804_v58  ;;  %v4848_v58 = vld [vmem:[#allocation8 + $0x1c4] ss:$8 sps:$4 sm:$0xff]  }
 0x179   :  { %v5387_v12 = vpop.f32.mrf.mxu1  ;;  %3236 = vmatprep.subr.bf16.mxu0 %v4809_v23  ;;  %3342 = vmatpush2.bf16.msra.mxu1 %v4843_v29 }
 0x17a   :  { %v1916_v33 = vpop.f32.mrf.mxu0  ;;  %2593 = vmatmul.mubr.bf16.gmra.mxu0 %v5242_v38  ;;  %3343 = vmatprep.subr.bf16.mxu1 %v4848_v58 }
 0x17b   :  { %v2029_v51 = vpop.f32.mrf.mxu1  ;;  %2706 = vmatmul.mubr.bf16.gmra.mxu1 %v5244_v39  ;;  %v1917_v54 = vadd.f32 %v1916_v33, %v5258_v53 }
 0x17c   :  { %v1918_v55 = vpop.f32.mrf.mxu0  ;;  %3237 = vmatpush2.bf16.msra.mxu0 %v4807_v0  ;;  %v4851_v0 = vld [vmem:[#allocation8 + $0x1b4] ss:$8 sps:$4 sm:$0xff]  }
 0x17d   :  { %v2031_v57 = vpop.f32.mrf.mxu1  ;;  %v5392_v63 = vadd.f32 %v2029_v51, %v1917_v54  ;;  %v1919_v23 = vadd.f32 %v1918_v55, %v5263_v56  ;;  %3238 = vmatprep.subr.bf16.mxu0 %v4812_v42  ;;  %v1851_v51 = vadd.f32 %v5271_v9, %v5258_v53  ;;  %3344 = vmatpush2.bf16.msra.mxu1 %v4846_v24  ;;  %v4849_v42 = vld [vmem:[#allocation8 + $0x1b0] ss:$8 sps:$4 sm:$0xff]  }
 0x17e   :  { %v5395_v47 = vpop.f32.mrf.mxu0  ;;  %3345 = vmatprep.subr.bf16.mxu1 %v4851_v0  ;;  %v1853_v55 = vadd.f32 %v5277_v14, %v5263_v56  ;;  %v4857_v14 = vld [vmem:[#allocation8 + $0x194] ss:$8 sps:$4 sm:$0xff]  }
 0x17f   :  { %5898 = vst [vmem:[#allocation18_spill] sm:$0xff] %v5392_v63  ;;  %5899 = vst [vmem:[#allocation19_spill] sm:$0xff] %v5395_v47  ;;  %v5397_v38 = vpop.f32.mrf.mxu1  ;;  %v5399_v39 = vadd.f32 %v2031_v57, %v1919_v23  ;;  %v4854_v23 = vld [vmem:[#allocation8 + $0x1a4] ss:$8 sps:$4 sm:$0xff]   ;;  %v1964_v52 = vadd.f32 %v5273_v10, %v1851_v51  ;;  %v1974_v47 = vadd.f32 %v5291_v31, %v1861_v36 }
 0x180   :  { %5900 = vst [vmem:[#allocation20_spill] sm:$0xff] %v5397_v38  ;;  %v5401_v1 = vpop.f32.mrf.mxu0  ;;  %3239 = vmatpush2.bf16.msra.mxu0 %v4810_v60  ;;  %v4852_v60 = vld [vmem:[#allocation8 + $0x1a0] ss:$8 sps:$4 sm:$0xff]   ;;  %v1966_v63 = vadd.f32 %v5279_v26, %v1853_v55 }
 0x181   :  { %5901 = vst [vmem:[#allocation21_spill] sm:$0xff] %v5399_v39  ;;  %5902 = vst [vmem:[#allocation22_spill] sm:$0xff] %v5401_v1  ;;  %v5403_v33 = vpop.f32.mrf.mxu1  ;;  %3346 = vmatpush2.bf16.msra.mxu1 %v4849_v42 }
 0x182   :  { %5903 = vst [vmem:[#allocation23_spill] sm:$0xff] %v5403_v33  ;;  %v2072_v29 = vpop.f32.mrf.mxu0  ;;  %3347 = vmatprep.subr.bf16.mxu1 %v4854_v23 }
 0x183   :  { %v2185_v54 = vpop.f32.mrf.mxu1  ;;  %v2073_v33 = vadd.f32 %v2072_v29, %v5268_v5  ;;  %v1863_v29 = vadd.f32 %v5295_v35, %v5263_v56 }
 0x184   :  { %v2074_v58 = vpop.f32.mrf.mxu0 }
 0x185   :  { %v2187_v57 = vpop.f32.mrf.mxu1  ;;  %v2075_v49 = vadd.f32 %v2074_v58, %v5275_v13  ;;  %3348 = vmatpush2.bf16.msra.mxu1 %v4852_v60  ;;  %v4855_v13 = vld [vmem:[#allocation8 + $0x190] ss:$8 sps:$4 sm:$0xff]   ;;  %v2186_v42 = vadd.f32 %v2185_v54, %v2073_v33  ;;  %v1976_v35 = vadd.f32 %v5297_v37, %v1863_v29  ;;  %v1873_v37 = vadd.f32 %v5313_v4, %v5263_v56 }
 0x186   :  { %v2076_v9 = vpop.f32.mrf.mxu0  ;;  %3349 = vmatprep.subr.bf16.mxu1 %v4857_v14 }
 0x187   :  { %v2189_v24 = vpop.f32.mrf.mxu1  ;;  %v2077_v0 = vadd.f32 %v2076_v9, %v1964_v52  ;;  %v2188_v1 = vadd.f32 %v2187_v57, %v2075_v49  ;;  %v4860_v9 = vld [vmem:[#allocation8 + $0x184] ss:$8 sps:$4 sm:$0xff]   ;;  %v2716_v33 = vmax.f32 %v2186_v42, 0.0 }
 0x188   :  { %v2078_v39 = vpop.f32.mrf.mxu0 }
 0x189   :  { %v2191_v38 = vpop.f32.mrf.mxu1  ;;  %v2190_v10 = vadd.f32 %v2189_v24, %v2077_v0  ;;  %v2079_v51 = vadd.f32 %v2078_v39, %v1966_v63  ;;  %v2717_v34 = vmax.f32 %v2188_v1, 0.0  ;;  %3350 = vmatpush2.bf16.msra.mxu1 %v4855_v13  ;;  %v4858_v39 = vld [vmem:[#allocation8 + $0x180] ss:$8 sps:$4 sm:$0xff]   ;;  %v1871_v0 = vadd.f32 %v5307_v2, %v5258_v53 }
 0x18a   :  { %v2082_v58 = vpop.f32.mrf.mxu0  ;;  %3351 = vmatprep.subr.bf16.mxu1 %v4860_v9 }
 0x18b   :  { %v2195_v5 = vpop.f32.mrf.mxu1  ;;  %v2192_v26 = vadd.f32 %v2191_v38, %v2079_v51  ;;  %v2720_v52 = vmax.f32 %v2190_v10, 0.0  ;;  %v2083_v54 = vadd.f32 %v2082_v58, %v5286_v28  ;;  %v1984_v2 = vadd.f32 %v5309_v3, %v1871_v0 }
 0x18c   :  { %v2084_v55 = vpop.f32.mrf.mxu0 }
 0x18d   :  { %v2197_v23 = vpop.f32.mrf.mxu1  ;;  %v2721_v49 = vmax.f32 %v2192_v26, 0.0  ;;  %v2085_v63 = vadd.f32 %v2084_v55, %v5293_v32  ;;  %v2780_v36 = vpack.c.bf16 %v2720_v52, %v2716_v33  ;;  %3352 = vmatpush2.bf16.msra.mxu1 %v4858_v39  ;;  %v2196_v51 = vadd.f32 %v2195_v5, %v2083_v54 }
 0x18e   :  { %v2086_v57 = vpop.f32.mrf.mxu0 }
 0x18f   :  { %v2199_v60 = vpop.f32.mrf.mxu1  ;;  %v2087_v38 = vadd.f32 %v2086_v57, %v1974_v47  ;;  %v2781_v24 = vpack.c.bf16 %v2721_v49, %v2717_v34  ;;  %v2198_v14 = vadd.f32 %v2197_v23, %v2085_v63  ;;  %v2724_v23 = vmax.f32 %v2196_v51, 0.0 }
 0x190   :  { %v2088_v31 = vpop.f32.mrf.mxu0  ;;  %v1986_v49 = vadd.f32 %v5315_v7, %v1873_v37  ;;  %v1881_v57 = vadd.f32 %v5325_v44, %v5258_v53 }
 0x191   :  { %v2201_v1 = vpop.f32.mrf.mxu1  ;;  %v2200_v32 = vadd.f32 %v2199_v60, %v2087_v38  ;;  %v2089_v10 = vadd.f32 %v2088_v31, %v1976_v35  ;;  %3240 = vmatprep.mubr.bf16.mxu0 %v2781_v24  ;;  %v2725_v26 = vmax.f32 %v2198_v14, 0.0 }
 0x192   :  { %v2092_v28 = vpop.f32.mrf.mxu0  ;;  %3241 = vmatmul.mubr.bf16.vlgmr.msra.gmra.mxu0 %v2780_v36 }
 0x193   :  { %v2205_v13 = vpop.f32.mrf.mxu1  ;;  %v2202_v47 = vadd.f32 %v2201_v1, %v2089_v10  ;;  %v2728_v42 = vmax.f32 %v2200_v32, 0.0  ;;  %v2093_v9 = vadd.f32 %v2092_v28, %v5304_v62  ;;  %v1883_v62 = vadd.f32 %v5331_v46, %v5263_v56 }
 0x194   :  { %v2094_v58 = vpop.f32.mrf.mxu0  ;;  %v1994_v1 = vadd.f32 %v5327_v45, %v1881_v57 }
 0x195   :  { %v2207_v29 = vpop.f32.mrf.mxu1  ;;  %v2729_v52 = vmax.f32 %v2202_v47, 0.0  ;;  %v2095_v55 = vadd.f32 %v2094_v58, %v5311_v48  ;;  %v2784_v4 = vpack.c.bf16 %v2728_v42, %v2724_v23  ;;  %v2206_v48 = vadd.f32 %v2205_v13, %v2093_v9 }
 0x196   :  { %v2096_v5 = vpop.f32.mrf.mxu0  ;;  %v1996_v37 = vadd.f32 %v5333_v50, %v1883_v62 }
 0x197   :  { %v2209_v34 = vpop.f32.mrf.mxu1  ;;  %v2097_v63 = vadd.f32 %v2096_v5, %v1984_v2  ;;  %v2785_v39 = vpack.c.bf16 %v2729_v52, %v2725_v26  ;;  %v2208_v3 = vadd.f32 %v2207_v29, %v2095_v55  ;;  %v2732_v10 = vmax.f32 %v2206_v48, 0.0 }
 0x198   :  { %v2098_v33 = vpop.f32.mrf.mxu0  ;;  %v1891_v2 = vadd.f32 %v5343_v21, %v5258_v53 }
 0x199   :  { %v2211_v54 = vpop.f32.mrf.mxu1  ;;  %v2210_v60 = vadd.f32 %v2209_v34, %v2097_v63  ;;  %v2099_v35 = vadd.f32 %v2098_v33, %v1986_v49  ;;  %3250 = vmatprep.mubr.bf16.mxu0 %v2785_v39  ;;  %v2733_v14 = vmax.f32 %v2208_v3, 0.0 }
 0x19a   :  { %v2102_v38 = vpop.f32.mrf.mxu0  ;;  %3251 = vmatmul.mubr.bf16.gmra.mxu0 %v2784_v4  ;;  %v2004_v49 = vadd.f32 %v5345_v22, %v1891_v2  ;;  %v1911_v2 = vadd.f32 %v5379_v43, %v5258_v53 }
 0x19b   :  { %v2215_v24 = vpop.f32.mrf.mxu1  ;;  %v2212_v7 = vadd.f32 %v2211_v54, %v2099_v35  ;;  %v2736_v0 = vmax.f32 %v2210_v60, 0.0  ;;  %v2103_v51 = vadd.f32 %v2102_v38, %v5322_v41  ;;  %v1893_v41 = vadd.f32 %v5349_v25, %v5263_v56 }
 0x19c   :  { %v2104_v36 = vpop.f32.mrf.mxu0 }
 0x19d   :  { %v2217_v31 = vpop.f32.mrf.mxu1  ;;  %v2737_v32 = vmax.f32 %v2212_v7, 0.0  ;;  %v2105_v44 = vadd.f32 %v2104_v36, %v5329_v59  ;;  %v2788_v46 = vpack.c.bf16 %v2736_v0, %v2732_v10  ;;  %v2216_v59 = vadd.f32 %v2215_v24, %v2103_v51 }
 0x19e   :  { %v2106_v28 = vpop.f32.mrf.mxu0  ;;  %v2006_v3 = vadd.f32 %v5351_v27, %v1893_v41  ;;  %v1901_v24 = vadd.f32 %v5361_v8, %v5258_v53 }
 0x19f   :  { %v2219_v13 = vpop.f32.mrf.mxu1  ;;  %v2107_v47 = vadd.f32 %v2106_v28, %v1994_v1  ;;  %v2789_v42 = vpack.c.bf16 %v2737_v32, %v2733_v14  ;;  %v2218_v45 = vadd.f32 %v2217_v31, %v2105_v44  ;;  %v2740_v4 = vmax.f32 %v2216_v59, 0.0 }
 0x1a0   :  { %v2108_v58 = vpop.f32.mrf.mxu0  ;;  %v2014_v32 = vadd.f32 %v5363_v15, %v1901_v24 }
 0x1a1   :  { %v2221_v29 = vpop.f32.mrf.mxu1  ;;  %v2220_v26 = vadd.f32 %v2219_v13, %v2107_v47  ;;  %v2109_v52 = vadd.f32 %v2108_v58, %v1996_v37  ;;  %3260 = vmatprep.mubr.bf16.mxu0 %v2789_v42  ;;  %v2741_v63 = vmax.f32 %v2218_v45, 0.0 }
 0x1a2   :  { %v2112_v55 = vpop.f32.mrf.mxu0  ;;  %3261 = vmatmul.mubr.bf16.gmra.mxu0 %v2788_v46 }
 0x1a3   :  { %v2225_v23 = vpop.f32.mrf.mxu1  ;;  %v2222_v50 = vadd.f32 %v2221_v29, %v2109_v52  ;;  %v2744_v9 = vmax.f32 %v2220_v26, 0.0  ;;  %v2113_v33 = vadd.f32 %v2112_v55, %v5340_v19  ;;  %v1903_v19 = vadd.f32 %v5367_v16, %v5263_v56 }
 0x1a4   :  { %v2114_v5 = vpop.f32.mrf.mxu0 }
 0x1a5   :  { %v2227_v34 = vpop.f32.mrf.mxu1  ;;  %v2745_v39 = vmax.f32 %v2222_v50, 0.0  ;;  %v2115_v21 = vadd.f32 %v2114_v5, %v5347_v6  ;;  %v2792_v25 = vpack.c.bf16 %v2744_v9, %v2740_v4  ;;  %v2226_v6 = vadd.f32 %v2225_v23, %v2113_v33 }
 0x1a6   :  { %v2116_v54 = vpop.f32.mrf.mxu0  ;;  %v2016_v47 = vadd.f32 %v5369_v20, %v1903_v19  ;;  %v2024_v50 = vadd.f32 %v5381_v11, %v1911_v2 }
 0x1a7   :  { %v2229_v57 = vpop.f32.mrf.mxu1  ;;  %v2117_v60 = vadd.f32 %v2116_v54, %v2004_v49  ;;  %v2793_v35 = vpack.c.bf16 %v2745_v39, %v2741_v63  ;;  %v2228_v22 = vadd.f32 %v2227_v34, %v2115_v21  ;;  %v2748_v51 = vmax.f32 %v2226_v6, 0.0 }
 0x1a8   :  { %v2118_v48 = vpop.f32.mrf.mxu0 }
 0x1a9   :  { %v2231_v38 = vpop.f32.mrf.mxu1  ;;  %v2230_v62 = vadd.f32 %v2229_v57, %v2117_v60  ;;  %v2119_v7 = vadd.f32 %v2118_v48, %v2006_v3  ;;  %3270 = vmatprep.mubr.bf16.mxu0 %v2793_v35  ;;  %v2749_v44 = vmax.f32 %v2228_v22, 0.0  ;;  %v5904_v3 = vld [vmem:[#allocation19_spill] sm:$0xff]  ;;  %v5906_v22 = vld [vmem:[#allocation16_spill] sm:$0xff] }
 0x1aa   :  { %v2122_v0 = vpop.f32.mrf.mxu0  ;;  %3271 = vmatmul.mubr.bf16.gmra.mxu0 %v2792_v25  ;;  %v1921_v60 = vadd.f32 %v5904_v3, %v5258_v53  ;;  %v5907_v53 = vld [vmem:[#allocation20_spill] sm:$0xff] }
 0x1ab   :  { %v2235_v36 = vpop.f32.mrf.mxu1  ;;  %v2232_v27 = vadd.f32 %v2231_v38, %v2119_v7  ;;  %v2752_v31 = vmax.f32 %v2230_v62, 0.0  ;;  %v2123_v28 = vadd.f32 %v2122_v0, %v5358_v40  ;;  %v1913_v40 = vadd.f32 %v5385_v30, %v5263_v56 }
 0x1ac   :  { %v2124_v1 = vpop.f32.mrf.mxu0  ;;  %v394_v62 = vsub.s32 2, %v5906_v22  ;;  %v2034_v19 = vadd.f32 %v5907_v53, %v1921_v60 }
 0x1ad   :  { %v2237_v14 = vpop.f32.mrf.mxu1  ;;  %v2753_v10 = vmax.f32 %v2232_v27, 0.0  ;;  %v2125_v8 = vadd.f32 %v2124_v1, %v5365_v17  ;;  %v2796_v16 = vpack.c.bf16 %v2752_v31, %v2748_v51  ;;  %v2236_v17 = vadd.f32 %v2235_v36, %v2123_v28  ;;  %v5908_v1 = vld [vmem:[#allocation21_spill] sm:$0xff] }
 0x1ae   :  { %v2126_v13 = vpop.f32.mrf.mxu0  ;;  %v2026_v21 = vadd.f32 %v5387_v12, %v1913_v40  ;;  %v398_v36 = vsub.s32 3, %v5906_v22 }
 0x1af   :  { %v2239_v37 = vpop.f32.mrf.mxu1  ;;  %v2127_v42 = vadd.f32 %v2126_v13, %v2014_v32  ;;  %v2797_v46 = vpack.c.bf16 %v2753_v10, %v2749_v44  ;;  %v2238_v15 = vadd.f32 %v2237_v14, %v2125_v8  ;;  %v2756_v34 = vmax.f32 %v2236_v17, 0.0  ;;  %v5909_v44 = vld [vmem:[#allocation18_spill] sm:$0xff] }
 0x1b0   :  { %v2128_v58 = vpop.f32.mrf.mxu0 }
 0x1b1   :  { %v2241_v29 = vpop.f32.mrf.mxu1  ;;  %v2240_v45 = vadd.f32 %v2239_v37, %v2127_v42  ;;  %v2129_v26 = vadd.f32 %v2128_v58, %v2016_v47  ;;  %3280 = vmatprep.mubr.bf16.mxu0 %v2797_v46  ;;  %v2757_v9 = vmax.f32 %v2238_v15, 0.0  ;;  %v5911_v47 = vld [vmem:[#allocation17_spill] sm:$0xff] }
 0x1b2   :  { %v2132_v52 = vpop.f32.mrf.mxu0  ;;  %3281 = vmatmul.mubr.bf16.gmra.mxu0 %v2796_v16  ;;  %v5472_v42 = vrot.slane %v5911_v47, %v394_v62 }
 0x1b3   :  { %v2245_v59 = vpop.f32.mrf.mxu1  ;;  %v2242_v20 = vadd.f32 %v2241_v29, %v2129_v26  ;;  %v2760_v55 = vmax.f32 %v2240_v45, 0.0  ;;  %v2133_v49 = vadd.f32 %v2132_v52, %v5376_v61  ;;  %v5905_v61 = vld [vmem:[#allocation22_spill] sm:$0xff]  ;;  %v5475_v45 = vrot.slane %v5911_v47, %v398_v36 }
 0x1b4   :  { %v2134_v23 = vpop.f32.mrf.mxu0  ;;  %v1923_v24 = vadd.f32 %v5905_v61, %v5263_v56  ;;  %v5910_v56 = vld [vmem:[#allocation23_spill] sm:$0xff] }
 0x1b5   :  { %v2247_v41 = vpop.f32.mrf.mxu1  ;;  %v2761_v5 = vmax.f32 %v2242_v20, 0.0  ;;  %v2135_v43 = vadd.f32 %v2134_v23, %v5383_v18  ;;  %v2800_v30 = vpack.c.bf16 %v2760_v55, %v2756_v34  ;;  %v2246_v18 = vadd.f32 %v2245_v59, %v2133_v49 }
 0x1b6   :  { %v2136_v63 = vpop.f32.mrf.mxu0  ;;  %v2036_v28 = vadd.f32 %v5910_v56, %v1923_v24 }
 0x1b7   :  { %v2249_v39 = vpop.f32.mrf.mxu1  ;;  %v2137_v4 = vadd.f32 %v2136_v63, %v2024_v50  ;;  %v2801_v33 = vpack.c.bf16 %v2761_v5, %v2757_v9  ;;  %v2248_v11 = vadd.f32 %v2247_v41, %v2135_v43  ;;  %v2764_v32 = vmax.f32 %v2246_v18, 0.0 }
 0x1b8   :  { %v2138_v54 = vpop.f32.mrf.mxu0 }
 0x1b9   :  { %v2251_v57 = vpop.f32.mrf.mxu1  ;;  %v2250_v35 = vadd.f32 %v2249_v39, %v2137_v4  ;;  %v2139_v25 = vadd.f32 %v2138_v54, %v2026_v21  ;;  %3290 = vmatprep.mubr.bf16.mxu0 %v2801_v33  ;;  %v2765_v27 = vmax.f32 %v2248_v11, 0.0 }
 0x1ba   :  { %v2142_v48 = vpop.f32.mrf.mxu0  ;;  %3291 = vmatmul.mubr.bf16.gmra.mxu0 %v2800_v30 }
 0x1bb   :  { %v2255_v38 = vpop.f32.mrf.mxu1  ;;  %v2252_v12 = vadd.f32 %v2251_v57, %v2139_v25  ;;  %v2768_v7 = vmax.f32 %v2250_v35, 0.0  ;;  %v2143_v10 = vadd.f32 %v2142_v48, %v5909_v44 }
 0x1bc   :  { %v2144_v6 = vpop.f32.mrf.mxu0 }
 0x1bd   :  { %v2257_v0 = vpop.f32.mrf.mxu1  ;;  %v2769_v31 = vmax.f32 %v2252_v12, 0.0  ;;  %v2145_v14 = vadd.f32 %v2144_v6, %v5908_v1  ;;  %v2804_v46 = vpack.c.bf16 %v2768_v7, %v2764_v32  ;;  %v2256_v26 = vadd.f32 %v2255_v38, %v2143_v10 }
 0x1be   :  { %v2146_v8 = vpop.f32.mrf.mxu0 }
 0x1bf   :  { %v2259_v51 = vpop.f32.mrf.mxu1  ;;  %v2147_v13 = vadd.f32 %v2146_v8, %v2034_v19  ;;  %v2805_v37 = vpack.c.bf16 %v2769_v31, %v2765_v27  ;;  %v2258_v29 = vadd.f32 %v2257_v0, %v2145_v14  ;;  %v2772_v43 = vmax.f32 %v2256_v26, 0.0 }
 0x1c0   :  { %v2148_v16 = vpop.f32.mrf.mxu0 }
 0x1c1   :  { %v2261_v58 = vpop.f32.mrf.mxu1  ;;  %v2260_v2 = vadd.f32 %v2259_v51, %v2147_v13  ;;  %v2149_v15 = vadd.f32 %v2148_v16, %v2036_v28  ;;  %3300 = vmatprep.mubr.bf16.mxu0 %v2805_v37  ;;  %v2773_v41 = vmax.f32 %v2258_v29, 0.0 }
 0x1c2   :  { %v2298_v17 = vpop.f32.mrf.mxu0  ;;  %3301 = vmatmul.mubr.bf16.gmra.mxu0 %v2804_v46 }
 0x1c3   :  { %v2411_v52 = vpop.f32.mrf.mxu1  ;;  %v2262_v59 = vadd.f32 %v2261_v58, %v2149_v15  ;;  %v2299_v40 = vadd.f32 %v2298_v17, %v5472_v42  ;;  %v2776_v20 = vmax.f32 %v2260_v2, 0.0 }
 0x1c4   :  { %v2300_v55 = vpop.f32.mrf.mxu0 }
 0x1c5   :  { %v2413_v23 = vpop.f32.mrf.mxu1  ;;  %v2777_v50 = vmax.f32 %v2262_v59, 0.0  ;;  %v5478_v9 = vadd.f32 %v2411_v52, %v2299_v40  ;;  %v2301_v5 = vadd.f32 %v2300_v55, %v5475_v45  ;;  %v2808_v21 = vpack.c.bf16 %v2776_v20, %v2772_v43 }
 0x1c6   :  { %v5481_v34 = vpop.f32.mrf.mxu0 }
 0x1c7   :  { %v5483_v49 = vpop.f32.mrf.mxu1  ;;  %v5485_v63 = vadd.f32 %v2413_v23, %v2301_v5  ;;  %v2809_v39 = vpack.c.bf16 %v2777_v50, %v2773_v41 }
 0x1c8   :  { %v5487_v4 = vpop.f32.mrf.mxu0 }
 0x1c9   :  { %v5489_v33 = vpop.f32.mrf.mxu1  ;;  %3310 = vmatprep.mubr.bf16.mxu0 %v2809_v39 }
 0x1ca   :  { %v2308_v30 = vpop.f32.mrf.mxu0  ;;  %3311 = vmatmul.mubr.bf16.gmra.mxu0 %v2808_v21 }
 0x1cb   :  { %v2421_v54 = vpop.f32.mrf.mxu1  ;;  %v2309_v57 = vadd.f32 %v2308_v30, %v5472_v42 }
 0x1cc   :  { %v2310_v3 = vpop.f32.mrf.mxu0 }
 0x1cd   :  { %v2423_v60 = vpop.f32.mrf.mxu1  ;;  %v5492_v11 = vadd.f32 %v2421_v54, %v2309_v57  ;;  %v2311_v35 = vadd.f32 %v2310_v3, %v5475_v45 }
 0x1ce   :  { %v5495_v25 = vpop.f32.mrf.mxu0 }
 0x1cf   :  { %v5497_v18 = vpop.f32.mrf.mxu1  ;;  %v5499_v48 = vadd.f32 %v2423_v60, %v2311_v35 }
 0x1d0   :  { %v5501_v38 = vpop.f32.mrf.mxu0 }
 0x1d1   :  { %v5503_v61 = vpop.f32.mrf.mxu1 }
 0x1d2   :  { %v2318_v24 = vpop.f32.mrf.mxu0 }
 0x1d3   :  { %v2431_v12 = vpop.f32.mrf.mxu1  ;;  %v2319_v62 = vadd.f32 %v2318_v24, %v5472_v42 }
 0x1d4   :  { %v2320_v7 = vpop.f32.mrf.mxu0 }
 0x1d5   :  { %v2433_v6 = vpop.f32.mrf.mxu1  ;;  %v5506_v0 = vadd.f32 %v2431_v12, %v2319_v62  ;;  %v2321_v36 = vadd.f32 %v2320_v7, %v5475_v45 }
 0x1d6   :  { %v5509_v53 = vpop.f32.mrf.mxu0 }
 0x1d7   :  { %v5511_v19 = vpop.f32.mrf.mxu1  ;;  %v5513_v27 = vadd.f32 %v2433_v6, %v2321_v36 }
 0x1d8   :  { %v5515_v31 = vpop.f32.mrf.mxu0 }
 0x1d9   :  { %v5517_v1 = vpop.f32.mrf.mxu1 }
 0x1da   :  { %v2328_v14 = vpop.f32.mrf.mxu0 }
 0x1db   :  { %v2441_v32 = vpop.f32.mrf.mxu1  ;;  %v2329_v44 = vadd.f32 %v2328_v14, %v5472_v42 }
 0x1dc   :  { %v2330_v10 = vpop.f32.mrf.mxu0 }
 0x1dd   :  { %v2443_v8 = vpop.f32.mrf.mxu1  ;;  %v5520_v51 = vadd.f32 %v2441_v32, %v2329_v44  ;;  %v2331_v56 = vadd.f32 %v2330_v10, %v5475_v45 }
 0x1de   :  { %v5523_v28 = vpop.f32.mrf.mxu0 }
 0x1df   :  { %v5525_v13 = vpop.f32.mrf.mxu1  ;;  %v5527_v37 = vadd.f32 %v2443_v8, %v2331_v56 }
 0x1e0   :  { %v5529_v47 = vpop.f32.mrf.mxu0 }
 0x1e1   :  { %v5531_v46 = vpop.f32.mrf.mxu1 }
 0x1e2   :  { %v2338_v16 = vpop.f32.mrf.mxu0 }
 0x1e3   :  { %v2451_v58 = vpop.f32.mrf.mxu1  ;;  %v2339_v29 = vadd.f32 %v2338_v16, %v5472_v42 }
 0x1e4   :  { %v2340_v2 = vpop.f32.mrf.mxu0 }
 0x1e5   :  { %v2453_v15 = vpop.f32.mrf.mxu1  ;;  %v5534_v26 = vadd.f32 %v2451_v58, %v2339_v29  ;;  %v2341_v17 = vadd.f32 %v2340_v2, %v5475_v45 }
 0x1e6   :  { %v5537_v52 = vpop.f32.mrf.mxu0 }
 0x1e7   :  { %v5539_v59 = vpop.f32.mrf.mxu1  ;;  %v5541_v40 = vadd.f32 %v2453_v15, %v2341_v17 }
 0x1e8   :  { %v5543_v20 = vpop.f32.mrf.mxu0 }
 0x1e9   :  { %v5545_v55 = vpop.f32.mrf.mxu1 }
 0x1ea   :  { %v2348_v23 = vpop.f32.mrf.mxu0 }
 0x1eb   :  { %v2461_v41 = vpop.f32.mrf.mxu1  ;;  %v2349_v50 = vadd.f32 %v2348_v23, %v5472_v42 }
 0x1ec   :  { %v2350_v5 = vpop.f32.mrf.mxu0 }
 0x1ed   :  { %v2463_v43 = vpop.f32.mrf.mxu1  ;;  %v5548_v39 = vadd.f32 %v2461_v41, %v2349_v50  ;;  %v2351_v21 = vadd.f32 %v2350_v5, %v5475_v45 }
 0x1ee   :  { %v5551_v30 = vpop.f32.mrf.mxu0 }
 0x1ef   :  { %v5553_v54 = vpop.f32.mrf.mxu1  ;;  %v5555_v57 = vadd.f32 %v2463_v43, %v2351_v21  ;;  %v2303_v21 = vadd.f32 %v5481_v34, %v5472_v42 }
 0x1f0   :  { %v5557_v3 = vpop.f32.mrf.mxu0 }
 0x1f1   :  { %v5559_v60 = vpop.f32.mrf.mxu1 }
 0x1f2   :  { %v2358_v35 = vpop.f32.mrf.mxu0 }
 0x1f3   :  { %v2471_v24 = vpop.f32.mrf.mxu1  ;;  %v2359_v12 = vadd.f32 %v2358_v35, %v5472_v42 }
 0x1f4   :  { %v2360_v62 = vpop.f32.mrf.mxu0 }
 0x1f5   :  { %v2473_v7 = vpop.f32.mrf.mxu1  ;;  %v5562_v6 = vadd.f32 %v2471_v24, %v2359_v12  ;;  %v2361_v36 = vadd.f32 %v2360_v62, %v5475_v45  ;;  %v2305_v12 = vadd.f32 %v5487_v4, %v5475_v45 }
 0x1f6   :  { %v5565_v14 = vpop.f32.mrf.mxu0 }
 0x1f7   :  { %v5567_v32 = vpop.f32.mrf.mxu1  ;;  %v5569_v44 = vadd.f32 %v2473_v7, %v2361_v36  ;;  %v2416_v36 = vadd.f32 %v5483_v49, %v2303_v21 }
 0x1f8   :  { %v5571_v10 = vpop.f32.mrf.mxu0 }
 0x1f9   :  { %v5573_v8 = vpop.f32.mrf.mxu1 }
 0x1fa   :  { %v2368_v56 = vpop.f32.mrf.mxu0 }
 0x1fb   :  { %v2481_v16 = vpop.f32.mrf.mxu1  ;;  %v2369_v58 = vadd.f32 %v2368_v56, %v5472_v42 }
 0x1fc   :  { %v2370_v29 = vpop.f32.mrf.mxu0 }
 0x1fd   :  { %v2483_v2 = vpop.f32.mrf.mxu1  ;;  %v5576_v15 = vadd.f32 %v2481_v16, %v2369_v58  ;;  %v2371_v17 = vadd.f32 %v2370_v29, %v5475_v45 }
 0x1fe   :  { %v5579_v23 = vpop.f32.mrf.mxu0 }
 0x1ff   :  { %5912 = vst [vmem:[#allocation19_spill] sm:$0xff] %v5576_v15  ;;  %v5581_v41 = vpop.f32.mrf.mxu1  ;;  %v5583_v50 = vadd.f32 %v2483_v2, %v2371_v17  ;;  %v2418_v2 = vadd.f32 %v5489_v33, %v2305_v12 }
 0x200   :  { %5913 = vst [vmem:[#allocation22_spill] sm:$0xff] %v5581_v41  ;;  %v5585_v5 = vpop.f32.mrf.mxu0 }
 0x201   :  { %5914 = vst [vmem:[#allocation20_spill] sm:$0xff] %v5583_v50  ;;  %5915 = vst [vmem:[#allocation21_spill] sm:$0xff] %v5585_v5  ;;  %v5587_v43 = vpop.f32.mrf.mxu1 }
 0x202   :  { %5916 = vst [vmem:[#allocation18_spill] sm:$0xff] %v5587_v43  ;;  %v2524_v35 = vpop.f32.mrf.mxu0  ;;  %v2313_v43 = vadd.f32 %v5495_v25, %v5472_v42 }
 0x203   :  { %v2637_v24 = vpop.f32.mrf.mxu1  ;;  %v2525_v16 = vadd.f32 %v2524_v35, %v5478_v9 }
 0x204   :  { %v2526_v62 = vpop.f32.mrf.mxu0  ;;  %v2426_v33 = vadd.f32 %v5497_v18, %v2313_v43 }
 0x205   :  { %v2639_v7 = vpop.f32.mrf.mxu1  ;;  %v2527_v56 = vadd.f32 %v2526_v62, %v5485_v63  ;;  %v2638_v41 = vadd.f32 %v2637_v24, %v2525_v16  ;;  %v2315_v63 = vadd.f32 %v5501_v38, %v5475_v45 }
 0x206   :  { %v2528_v58 = vpop.f32.mrf.mxu0 }
 0x207   :  { %v2641_v29 = vpop.f32.mrf.mxu1  ;;  %v2529_v17 = vadd.f32 %v2528_v58, %v2416_v36  ;;  %v2640_v15 = vadd.f32 %v2639_v7, %v2527_v56  ;;  %v2718_v25 = vmax.f32 %v2638_v41, 0.0  ;;  %v2428_v56 = vadd.f32 %v5503_v61, %v2315_v63  ;;  %v4862_v41 = vld [vmem:[#allocation10 + $0x38] sm:$0xff]  }
 0x208   :  { %v2530_v22 = vpop.f32.mrf.mxu0  ;;  %v2325_v61 = vadd.f32 %v5515_v31, %v5475_v45 }
 0x209   :  { %v2643_v34 = vpop.f32.mrf.mxu1  ;;  %v2642_v4 = vadd.f32 %v2641_v29, %v2529_v17  ;;  %v2531_v50 = vadd.f32 %v2530_v22, %v2418_v2  ;;  %v2719_v12 = vmax.f32 %v2640_v15, 0.0  ;;  %v2323_v17 = vadd.f32 %v5509_v53, %v5472_v42 }
 0x20a   :  { %v2534_v5 = vpop.f32.mrf.mxu0 }
 0x20b   :  { %v2647_v49 = vpop.f32.mrf.mxu1  ;;  %v2644_v9 = vadd.f32 %v2643_v34, %v2531_v50  ;;  %v2722_v21 = vmax.f32 %v2642_v4, 0.0  ;;  %v2535_v7 = vadd.f32 %v2534_v5, %v5492_v11  ;;  %v4863_v34 = vld [vmem:[#allocation10 + $0x70] sm:$0xff]  }
 0x20c   :  { %v2536_v35 = vpop.f32.mrf.mxu0 }
 0x20d   :  { %v2649_v62 = vpop.f32.mrf.mxu1  ;;  %v2723_v36 = vmax.f32 %v2644_v9, 0.0  ;;  %v2537_v58 = vadd.f32 %v2536_v35, %v5499_v48  ;;  %v2782_v38 = vpack.c.bf16 %v2722_v21, %v2718_v25  ;;  %v4861_v48 = vld [vmem:[#allocation10 + $0x78] sm:$0xff]   ;;  %v2648_v11 = vadd.f32 %v2647_v49, %v2535_v7  ;;  %v4864_v35 = vld [vmem:[#allocation10 + $0x30] sm:$0xff]  }
 0x20e   :  { %v2538_v22 = vpop.f32.mrf.mxu0  ;;  %4254 = vmatprep.subr.bf16.mxu0 %v4861_v48  ;;  %4318 = vmatprep.subr.bf16.mxu1 %v4861_v48 }
 0x20f   :  { %v2651_v24 = vpop.f32.mrf.mxu1  ;;  %v2783_v16 = vpack.c.bf16 %v2723_v36, %v2719_v12  ;;  %v2539_v29 = vadd.f32 %v2538_v22, %v2426_v33  ;;  %v2650_v18 = vadd.f32 %v2649_v62, %v2537_v58  ;;  %4255 = vmatpush3.bf16.msra.mxu0 %v4862_v41  ;;  %v2436_v62 = vadd.f32 %v5511_v19, %v2323_v17  ;;  %v4865_v36 = vld [vmem:[#allocation10 + $0x68] sm:$0xff]  }
 0x210   :  { %v2540_v50 = vpop.f32.mrf.mxu0  ;;  %4256 = vmatprep.subr.bf16.mxu0 %v4863_v34  ;;  %v2726_v58 = vmax.f32 %v2648_v11, 0.0  ;;  %v2438_v22 = vadd.f32 %v5517_v1, %v2325_v61  ;;  %v4868_v11 = vld [vmem:[#allocation10 + $0x20] sm:$0xff]  }
 0x211   :  { %v2653_v2 = vpop.f32.mrf.mxu1  ;;  %v2652_v15 = vadd.f32 %v2651_v24, %v2539_v29  ;;  %v2541_v43 = vadd.f32 %v2540_v50, %v2428_v56  ;;  %3353 = vmatprep.mubr.bf16.mxu1 %v2783_v16  ;;  %v2727_v33 = vmax.f32 %v2650_v18, 0.0  ;;  %v2333_v16 = vadd.f32 %v5523_v28, %v5472_v42 }
 0x212   :  { %v2544_v5 = vpop.f32.mrf.mxu0  ;;  %3354 = vmatmul.mubr.bf16.vlgmr.msra.gmra.mxu1 %v2782_v38  ;;  %v2335_v28 = vadd.f32 %v5529_v47, %v5475_v45 }
 0x213   :  { %v2657_v4 = vpop.f32.mrf.mxu1  ;;  %v2654_v63 = vadd.f32 %v2653_v2, %v2541_v43  ;;  %v2730_v9 = vmax.f32 %v2652_v15, 0.0  ;;  %4326 = vmatpush3.bf16.msra.mxu1 %v4862_v41  ;;  %v2545_v31 = vadd.f32 %v2544_v5, %v5506_v0  ;;  %4257 = vmatpush3.bf16.msra.mxu0 %v4864_v35  ;;  %v4867_v0 = vld [vmem:[#allocation10 + $0x60] sm:$0xff]   ;;  %v2446_v5 = vadd.f32 %v5525_v13, %v2333_v16 }
 0x214   :  { %v2546_v21 = vpop.f32.mrf.mxu0  ;;  %4319 = vmatprep.subr.bf16.mxu1 %v4863_v34  ;;  %4258 = vmatprep.subr.bf16.mxu0 %v4865_v36 }
 0x215   :  { %v2659_v53 = vpop.f32.mrf.mxu1  ;;  %v2731_v12 = vmax.f32 %v2654_v63, 0.0  ;;  %v2547_v49 = vadd.f32 %v2546_v21, %v5513_v27  ;;  %v2786_v19 = vpack.c.bf16 %v2730_v9, %v2726_v58  ;;  %v4866_v27 = vld [vmem:[#allocation10 + $0x28] sm:$0xff]   ;;  %v2658_v18 = vadd.f32 %v2657_v4, %v2545_v31  ;;  %v4869_v9 = vld [vmem:[#allocation10 + $0x58] sm:$0xff]  }
 0x216   :  { %v2548_v25 = vpop.f32.mrf.mxu0 }
 0x217   :  { %v2661_v7 = vpop.f32.mrf.mxu1  ;;  %v2787_v24 = vpack.c.bf16 %v2731_v12, %v2727_v33  ;;  %v2549_v56 = vadd.f32 %v2548_v25, %v2436_v62  ;;  %4327 = vmatpush3.bf16.msra.mxu1 %v4864_v35  ;;  %v2660_v50 = vadd.f32 %v2659_v53, %v2547_v49  ;;  %4259 = vmatpush3.bf16.msra.mxu0 %v4866_v27  ;;  %v2734_v21 = vmax.f32 %v2658_v18, 0.0 }
 0x218   :  { %v2550_v29 = vpop.f32.mrf.mxu0  ;;  %4320 = vmatprep.subr.bf16.mxu1 %v4865_v36  ;;  %4260 = vmatprep.subr.bf16.mxu0 %v4867_v0  ;;  %v2448_v62 = vadd.f32 %v5531_v46, %v2335_v28  ;;  %v2343_v49 = vadd.f32 %v5537_v52, %v5472_v42  ;;  %v2345_v46 = vadd.f32 %v5543_v20, %v5475_v45 }
 0x219   :  { %v2663_v38 = vpop.f32.mrf.mxu1  ;;  %v2662_v2 = vadd.f32 %v2661_v7, %v2549_v56  ;;  %v2551_v17 = vadd.f32 %v2550_v29, %v2438_v22  ;;  %3363 = vmatprep.mubr.bf16.mxu1 %v2787_v24  ;;  %v2735_v61 = vmax.f32 %v2660_v50, 0.0 }
 0x21a   :  { %v2554_v15 = vpop.f32.mrf.mxu0  ;;  %3364 = vmatmul.mubr.bf16.gmra.mxu1 %v2786_v19  ;;  %v2456_v29 = vadd.f32 %v5539_v59, %v2343_v49 }
 0x21b   :  { %v2667_v1 = vpop.f32.mrf.mxu1  ;;  %v2664_v43 = vadd.f32 %v2663_v38, %v2551_v17  ;;  %v2738_v48 = vmax.f32 %v2662_v2, 0.0  ;;  %4328 = vmatpush3.bf16.msra.mxu1 %v4866_v27  ;;  %v2555_v53 = vadd.f32 %v2554_v15, %v5520_v51  ;;  %4261 = vmatpush3.bf16.msra.mxu0 %v4868_v11  ;;  %v2458_v15 = vadd.f32 %v5545_v55, %v2345_v46 }
 0x21c   :  { %v2556_v41 = vpop.f32.mrf.mxu0  ;;  %4321 = vmatprep.subr.bf16.mxu1 %v4867_v0  ;;  %4262 = vmatprep.subr.bf16.mxu0 %v4869_v9 }
 0x21d   :  { %v2669_v34 = vpop.f32.mrf.mxu1  ;;  %v2739_v63 = vmax.f32 %v2664_v43, 0.0  ;;  %v2557_v4 = vadd.f32 %v2556_v41, %v5527_v37  ;;  %v2790_v13 = vpack.c.bf16 %v2738_v48, %v2734_v21  ;;  %v4870_v37 = vld [vmem:[#allocation10 + $0x18] sm:$0xff]   ;;  %v2668_v51 = vadd.f32 %v2667_v1, %v2555_v53 }
 0x21e   :  { %v2558_v47 = vpop.f32.mrf.mxu0  ;;  %v2353_v41 = vadd.f32 %v5551_v30, %v5472_v42 }
 0x21f   :  { %v2671_v35 = vpop.f32.mrf.mxu1  ;;  %v2791_v33 = vpack.c.bf16 %v2739_v63, %v2735_v61  ;;  %v2559_v12 = vadd.f32 %v2558_v47, %v2446_v5  ;;  %4329 = vmatpush3.bf16.msra.mxu1 %v4868_v11  ;;  %v2670_v31 = vadd.f32 %v2669_v34, %v2557_v4  ;;  %4263 = vmatpush3.bf16.msra.mxu0 %v4870_v37  ;;  %v2742_v2 = vmax.f32 %v2668_v51, 0.0 }
 0x220   :  { %v2560_v36 = vpop.f32.mrf.mxu0  ;;  %4322 = vmatprep.subr.bf16.mxu1 %v4869_v9  ;;  %v2466_v21 = vadd.f32 %v5553_v54, %v2353_v41 }
 0x221   :  { %v2673_v58 = vpop.f32.mrf.mxu1  ;;  %v2672_v25 = vadd.f32 %v2671_v35, %v2559_v12  ;;  %v2561_v7 = vadd.f32 %v2560_v36, %v2448_v62  ;;  %3373 = vmatprep.mubr.bf16.mxu1 %v2791_v33  ;;  %v2743_v38 = vmax.f32 %v2670_v31, 0.0  ;;  %v2363_v31 = vadd.f32 %v5565_v14, %v5472_v42 }
 0x222   :  { %v2564_v22 = vpop.f32.mrf.mxu0  ;;  %3374 = vmatmul.mubr.bf16.gmra.mxu1 %v2790_v13 }
 0x223   :  { %v2677_v24 = vpop.f32.mrf.mxu1  ;;  %v2674_v52 = vadd.f32 %v2673_v58, %v2561_v7  ;;  %v2746_v56 = vmax.f32 %v2672_v25, 0.0  ;;  %4330 = vmatpush3.bf16.msra.mxu1 %v4870_v37  ;;  %v2565_v17 = vadd.f32 %v2564_v22, %v5534_v26  ;;  %v2355_v26 = vadd.f32 %v5557_v3, %v5475_v45 }
 0x224   :  { %v2566_v16 = vpop.f32.mrf.mxu0 }
 0x225   :  { %v2679_v19 = vpop.f32.mrf.mxu1  ;;  %v2747_v27 = vmax.f32 %v2674_v52, 0.0  ;;  %v2567_v50 = vadd.f32 %v2566_v16, %v5541_v40  ;;  %v2794_v28 = vpack.c.bf16 %v2746_v56, %v2742_v2  ;;  %v2678_v40 = vadd.f32 %v2677_v24, %v2565_v17 }
 0x226   :  { %v2568_v0 = vpop.f32.mrf.mxu0  ;;  %v2468_v49 = vadd.f32 %v5559_v60, %v2355_v26  ;;  %v2476_v56 = vadd.f32 %v5567_v32, %v2363_v31 }
 0x227   :  { %v2681_v18 = vpop.f32.mrf.mxu1  ;;  %v2795_v20 = vpack.c.bf16 %v2747_v27, %v2743_v38  ;;  %v2569_v1 = vadd.f32 %v2568_v0, %v2456_v29  ;;  %v2680_v59 = vadd.f32 %v2679_v19, %v2567_v50  ;;  %v2750_v35 = vmax.f32 %v2678_v40, 0.0  ;;  %v5918_v40 = vld [vmem:[#allocation22_spill] sm:$0xff] }
 0x228   :  { %v2570_v43 = vpop.f32.mrf.mxu0 }
 0x229   :  { %v2683_v48 = vpop.f32.mrf.mxu1  ;;  %v2682_v34 = vadd.f32 %v2681_v18, %v2569_v1  ;;  %v2571_v11 = vadd.f32 %v2570_v43, %v2458_v15  ;;  %3383 = vmatprep.mubr.bf16.mxu1 %v2795_v20  ;;  %v2751_v53 = vmax.f32 %v2680_v59, 0.0  ;;  %v2373_v20 = vadd.f32 %v5579_v23, %v5472_v42  ;;  %v5919_v42 = vld [vmem:[#allocation20_spill] sm:$0xff] }
 0x22a   :  { %v2574_v5 = vpop.f32.mrf.mxu0  ;;  %3384 = vmatmul.mubr.bf16.gmra.mxu1 %v2794_v28 }
 0x22b   :  { %v2687_v61 = vpop.f32.mrf.mxu1  ;;  %v2684_v55 = vadd.f32 %v2683_v48, %v2571_v11  ;;  %v2754_v63 = vmax.f32 %v2682_v34, 0.0  ;;  %v2575_v62 = vadd.f32 %v2574_v5, %v5548_v39  ;;  %v2365_v39 = vadd.f32 %v5571_v10, %v5475_v45 }
 0x22c   :  { %v2576_v4 = vpop.f32.mrf.mxu0  ;;  %v2486_v5 = vadd.f32 %v5918_v40, %v2373_v20  ;;  %v2876_v20 = vld [vmem:[%s5885_s4] sm:$0x3] }
 0x22d   :  { %v2689_v9 = vpop.f32.mrf.mxu1  ;;  %v2755_v47 = vmax.f32 %v2684_v55, 0.0  ;;  %v2577_v30 = vadd.f32 %v2576_v4, %v5555_v57  ;;  %v2798_v3 = vpack.c.bf16 %v2754_v63, %v2750_v35  ;;  %v2688_v57 = vadd.f32 %v2687_v61, %v2575_v62  ;;  %v5920_v63 = vld [vmem:[#allocation19_spill] sm:$0xff] }
 0x22e   :  { %v2578_v33 = vpop.f32.mrf.mxu0  ;;  %v2478_v2 = vadd.f32 %v5573_v8, %v2365_v39  ;;  %v4874_v39 = vld [vmem:[#allocation10 + $0x8] sm:$0xff]  }
 0x22f   :  { %v2691_v12 = vpop.f32.mrf.mxu1  ;;  %v2799_v13 = vpack.c.bf16 %v2755_v47, %v2751_v53  ;;  %v2579_v36 = vadd.f32 %v2578_v33, %v2466_v21  ;;  %v2690_v54 = vadd.f32 %v2689_v9, %v2577_v30  ;;  %v2758_v29 = vmax.f32 %v2688_v57, 0.0  ;;  %v5921_v53 = vld [vmem:[#allocation18_spill] sm:$0xff] }
 0x230   :  { %v2580_v58 = vpop.f32.mrf.mxu0  ;;  %v4871_v57 = vld [vmem:[#allocation10 + $0x50] sm:$0xff]  }
 0x231   :  { %v2693_v37 = vpop.f32.mrf.mxu1  ;;  %v2692_v25 = vadd.f32 %v2691_v12, %v2579_v36  ;;  %v2581_v7 = vadd.f32 %v2580_v58, %v2468_v49  ;;  %3393 = vmatprep.mubr.bf16.mxu1 %v2799_v13  ;;  %v2759_v16 = vmax.f32 %v2690_v54, 0.0  ;;  %4264 = vmatprep.subr.bf16.mxu0 %v4871_v57 }
 0x232   :  { %v2584_v51 = vpop.f32.mrf.mxu0  ;;  %3394 = vmatmul.mubr.bf16.gmra.mxu1 %v2798_v3  ;;  %4323 = vmatprep.subr.bf16.mxu1 %v4871_v57 }
 0x233   :  { %v2697_v22 = vpop.f32.mrf.mxu1  ;;  %v2694_v60 = vadd.f32 %v2693_v37, %v2581_v7  ;;  %v2762_v24 = vmax.f32 %v2692_v25, 0.0  ;;  %v2585_v38 = vadd.f32 %v2584_v51, %v5562_v6  ;;  %v5917_v6 = vld [vmem:[#allocation21_spill] sm:$0xff]  ;;  %v4872_v51 = vld [vmem:[#allocation10 + $0x10] sm:$0xff]  }
 0x234   :  { %v2586_v46 = vpop.f32.mrf.mxu0  ;;  %v2375_v41 = vadd.f32 %v5917_v6, %v5475_v45  ;;  %4265 = vmatpush3.bf16.msra.mxu0 %v4872_v51  ;;  %4331 = vmatpush3.bf16.msra.mxu1 %v4872_v51 }
 0x235   :  { %v2699_v52 = vpop.f32.mrf.mxu1  ;;  %v2763_v19 = vmax.f32 %v2694_v60, 0.0  ;;  %v2587_v14 = vadd.f32 %v2586_v46, %v5569_v44  ;;  %v2802_v10 = vpack.c.bf16 %v2762_v24, %v2758_v29  ;;  %v2698_v44 = vadd.f32 %v2697_v22, %v2585_v38  ;;  %v4873_v22 = vld [vmem:[#allocation10 + $0x48] sm:$0xff]   ;;  %v4875_v60 = vld [vmem:[#allocation10 + $0x40] sm:$0xff]  }
 0x236   :  { %v2588_v27 = vpop.f32.mrf.mxu0  ;;  %v2488_v47 = vadd.f32 %v5921_v53, %v2375_v41  ;;  %4266 = vmatprep.subr.bf16.mxu0 %v4873_v22  ;;  %4324 = vmatprep.subr.bf16.mxu1 %v4873_v22  ;;  %v4876_v24 = vld [vmem:[#allocation10] sm:$0xff]  }
 0x237   :  { %v2701_v50 = vpop.f32.mrf.mxu1  ;;  %v2803_v17 = vpack.c.bf16 %v2763_v19, %v2759_v16  ;;  %v2589_v0 = vadd.f32 %v2588_v27, %v2476_v56  ;;  %v2700_v32 = vadd.f32 %v2699_v52, %v2587_v14  ;;  %v2766_v55 = vmax.f32 %v2698_v44, 0.0 }
 0x238   :  { %v2590_v18 = vpop.f32.mrf.mxu0  ;;  %4267 = vmatpush3.bf16.msra.mxu0 %v4874_v39  ;;  %4332 = vmatpush3.bf16.msra.mxu1 %v4874_v39 }
 0x239   :  { %v2703_v15 = vpop.f32.mrf.mxu1  ;;  %v2702_v1 = vadd.f32 %v2701_v50, %v2589_v0  ;;  %v2591_v28 = vadd.f32 %v2590_v18, %v2478_v2  ;;  %3403 = vmatprep.mubr.bf16.mxu1 %v2803_v17  ;;  %v2767_v61 = vmax.f32 %v2700_v32, 0.0  ;;  %4268 = vmatprep.subr.bf16.mxu0 %v4875_v60 }
 0x23a   :  { %v2594_v43 = vpop.f32.mrf.mxu0  ;;  %3404 = vmatmul.mubr.bf16.gmra.mxu1 %v2802_v10  ;;  %4325 = vmatprep.subr.bf16.mxu1 %v4875_v60 }
 0x23b   :  { %v2707_v48 = vpop.f32.mrf.mxu1  ;;  %v2704_v8 = vadd.f32 %v2703_v15, %v2591_v28  ;;  %v2770_v59 = vmax.f32 %v2702_v1, 0.0  ;;  %v2595_v4 = vadd.f32 %v2594_v43, %v5920_v63  ;;  %v5922_v1 = vld [vmem:[#allocation16_spill] sm:$0xff] }
 0x23c   :  { %v2596_v34 = vpop.f32.mrf.mxu0  ;;  %4269 = vmatpush3.bf16.msra.mxu0 %v4876_v24  ;;  %4333 = vmatpush3.bf16.msra.mxu1 %v4876_v24  ;;  %v5923_v28 = vsub.s32 1, %v5922_v1  ;;  %v5924_v43 = vsub.s32 0, %v5922_v1 }
 0x23d   :  { %v2709_v11 = vpop.f32.mrf.mxu1  ;;  %v2771_v26 = vmax.f32 %v2704_v8, 0.0  ;;  %v2597_v23 = vadd.f32 %v2596_v34, %v5919_v42  ;;  %v2806_v45 = vpack.c.bf16 %v2770_v59, %v2766_v55  ;;  %v2708_v13 = vadd.f32 %v2707_v48, %v2595_v4 }
 0x23e   :  { %v2598_v9 = vpop.f32.mrf.mxu0  ;;  %v5668_v44 = vrot.slane %v2876_v20, %v5923_v28  ;;  %v5672_v48 = vrot.slane %v2876_v20, %v5924_v43 }
 0x23f   :  { %v2711_v21 = vpop.f32.mrf.mxu1  ;;  %v2807_v30 = vpack.c.bf16 %v2771_v26, %v2767_v61  ;;  %v2599_v35 = vadd.f32 %v2598_v9, %v2486_v5  ;;  %v2710_v33 = vadd.f32 %v2709_v11, %v2597_v23  ;;  %v2774_v54 = vmax.f32 %v2708_v13, 0.0 }
 0x240   :  { %v2600_v62 = vpop.f32.mrf.mxu0 }
 0x241   :  { %v2712_v12 = vadd.f32 %v2711_v21, %v2599_v35  ;;  %v2601_v49 = vadd.f32 %v2600_v62, %v2488_v47  ;;  %3413 = vmatprep.mubr.bf16.mxu1 %v2807_v30  ;;  %v2713_v36 = vpop.f32.mrf.mxu1  ;;  %v2775_v37 = vmax.f32 %v2710_v33, 0.0 }
 0x242   :  { %3414 = vmatmul.mubr.bf16.gmra.mxu1 %v2806_v45 }
 0x243   :  { %v2714_v3 = vadd.f32 %v2713_v36, %v2601_v49  ;;  %v2778_v58 = vmax.f32 %v2712_v12, 0.0 }
 0x245   :  { %v2779_v31 = vmax.f32 %v2714_v3, 0.0  ;;  %v2810_v7 = vpack.c.bf16 %v2778_v58, %v2774_v54 }
 0x247   :  { %v2811_v25 = vpack.c.bf16 %v2779_v31, %v2775_v37 }
 0x249   :  { %3423 = vmatprep.mubr.bf16.mxu1 %v2811_v25 }
 0x24a   :  { %3424 = vmatmul.mubr.bf16.gmra.mxu1 %v2810_v7 }
 0x252   :  { %v3242_v46 = vpop.f32.mrf.mxu0 }
 0x253   :  { %v3243_v11 = vadd.f32 %v3242_v46, %v5672_v48 }
 0x254   :  { %v3244_v52 = vpop.f32.mrf.mxu0 }
 0x255   :  { %v3245_v59 = vadd.f32 %v3244_v52, %v5668_v44 }
 0x256   :  { %v3246_v56 = vpop.f32.mrf.mxu0 }
 0x257   :  { %v3247_v34 = vadd.f32 %v3246_v56, %v5672_v48 }
 0x258   :  { %v3248_v16 = vpop.f32.mrf.mxu0 }
 0x259   :  { %v3249_v5 = vadd.f32 %v3248_v16, %v5668_v44 }
 0x25a   :  { %v3252_v19 = vpop.f32.mrf.mxu0 }
 0x25b   :  { %v3253_v12 = vadd.f32 %v3252_v19, %v5672_v48 }
 0x25c   :  { %v3254_v14 = vpop.f32.mrf.mxu0 }
 0x25d   :  { %v3255_v45 = vadd.f32 %v3254_v14, %v5668_v44 }
 0x25e   :  { %v3256_v29 = vpop.f32.mrf.mxu0 }
 0x25f   :  { %v3257_v62 = vadd.f32 %v3256_v29, %v5672_v48 }
 0x260   :  { %v3258_v38 = vpop.f32.mrf.mxu0 }
 0x261   :  { %v3259_v36 = vadd.f32 %v3258_v38, %v5668_v44 }
 0x262   :  { %v3262_v27 = vpop.f32.mrf.mxu0 }
 0x263   :  { %v3263_v16 = vadd.f32 %v3262_v27, %v5672_v48 }
 0x264   :  { %v3264_v50 = vpop.f32.mrf.mxu0 }
 0x265   :  { %v3265_v46 = vadd.f32 %v3264_v50, %v5668_v44 }
 0x266   :  { %v3266_v2 = vpop.f32.mrf.mxu0 }
 0x267   :  { %v3267_v52 = vadd.f32 %v3266_v2, %v5672_v48 }
 0x268   :  { %v3268_v17 = vpop.f32.mrf.mxu0 }
 0x269   :  { %v3269_v29 = vadd.f32 %v3268_v17, %v5668_v44 }
 0x26a   :  { %v5653_v0 = vpop.f32.mrf.mxu0 }
 0x26c   :  { %v5655_v10 = vpop.f32.mrf.mxu0 }
 0x26d   :  { %v3275_v27 = vadd.f32 %v5655_v10, %v5668_v44 }
 0x26e   :  { %v5657_v18 = vpop.f32.mrf.mxu0 }
 0x26f   :  { %v3277_v17 = vadd.f32 %v5657_v18, %v5672_v48 }
 0x270   :  { %v5659_v15 = vpop.f32.mrf.mxu0 }
 0x272   :  { %v5664_v32 = vpop.f32.mrf.mxu0 }
 0x274   :  { %v5674_v41 = vpop.f32.mrf.mxu0 }
 0x276   :  { %v5680_v42 = vpop.f32.mrf.mxu0 }
 0x278   :  { %v5682_v47 = vpop.f32.mrf.mxu0 }
 0x27a   :  { %v5688_v37 = vpop.f32.mrf.mxu0 }
 0x27c   :  { %v5690_v39 = vpop.f32.mrf.mxu0 }
 0x27e   :  { %v3296_v1 = vpop.f32.mrf.mxu0 }
 0x280   :  { %v3298_v2 = vpop.f32.mrf.mxu0 }
 0x2d2   :  { %v3355_v6 = vpop.f32.mrf.mxu1 }
 0x2d3   :  { %v3356_v23 = vadd.f32 %v3355_v6, %v3243_v11 }
 0x2d4   :  { %v3357_v8 = vpop.f32.mrf.mxu1 }
 0x2d5   :  { %v3358_v61 = vadd.f32 %v3357_v8, %v3245_v59  ;;  %v3434_v30 = vmax.f32 %v3356_v23, 0.0 }
 0x2d6   :  { %v3359_v40 = vpop.f32.mrf.mxu1 }
 0x2d7   :  { %v3360_v26 = vadd.f32 %v3359_v40, %v3247_v34  ;;  %v3435_v21 = vmax.f32 %v3358_v61, 0.0  ;;  %v3273_v61 = vadd.f32 %v5653_v0, %v5672_v48 }
 0x2d8   :  { %v3361_v55 = vpop.f32.mrf.mxu1 }
 0x2d9   :  { %v3362_v63 = vadd.f32 %v3361_v55, %v3249_v5  ;;  %v3436_v4 = vmax.f32 %v3360_v26, 0.0  ;;  %v3279_v55 = vadd.f32 %v5659_v15, %v5668_v44  ;;  %v3287_v15 = vadd.f32 %v5680_v42, %v5672_v48 }
 0x2da   :  { %v3365_v9 = vpop.f32.mrf.mxu1 }
 0x2db   :  { %v3437_v53 = vmax.f32 %v3362_v63, 0.0  ;;  %v3466_v49 = vpack.c.bf16 %v3436_v4, %v3434_v30  ;;  %v3366_v31 = vadd.f32 %v3365_v9, %v3253_v12  ;;  %v3302_v9 = vpop.f32.mrf.mxu0  ;;  %v3285_v12 = vadd.f32 %v5674_v41, %v5668_v44 }
 0x2dc   :  { %v3367_v35 = vpop.f32.mrf.mxu1 }
 0x2dd   :  { %v3467_v33 = vpack.c.bf16 %v3437_v53, %v3435_v21  ;;  %v3368_v3 = vadd.f32 %v3367_v35, %v3255_v45  ;;  %v3438_v60 = vmax.f32 %v3366_v31, 0.0 }
 0x2de   :  { %v3369_v13 = vpop.f32.mrf.mxu1 }
 0x2df   :  { %v3370_v58 = vadd.f32 %v3369_v13, %v3257_v62  ;;  %3649 = vmatprep.mubr.bf16.mxu0 %v3467_v33  ;;  %v3439_v51 = vmax.f32 %v3368_v3, 0.0  ;;  %v3304_v62 = vpop.f32.mrf.mxu0  ;;  %v3283_v13 = vadd.f32 %v5664_v32, %v5672_v48 }
 0x2e0   :  { %v3371_v54 = vpop.f32.mrf.mxu1  ;;  %3650 = vmatmul.mubr.bf16.vlgmr.msra.gmra.mxu0 %v3466_v49 }
 0x2e1   :  { %v3372_v25 = vadd.f32 %v3371_v54, %v3259_v36  ;;  %v3440_v7 = vmax.f32 %v3370_v58, 0.0  ;;  %v3289_v58 = vadd.f32 %v5682_v47, %v5668_v44  ;;  %v3297_v47 = vadd.f32 %v3296_v1, %v5672_v48 }
 0x2e2   :  { %v3375_v57 = vpop.f32.mrf.mxu1 }
 0x2e3   :  { %v3441_v22 = vmax.f32 %v3372_v25, 0.0  ;;  %v3468_v19 = vpack.c.bf16 %v3440_v7, %v3438_v60  ;;  %v3376_v28 = vadd.f32 %v3375_v57, %v3263_v16  ;;  %v3306_v25 = vpop.f32.mrf.mxu0  ;;  %v3293_v16 = vadd.f32 %v5688_v37, %v5672_v48 }
 0x2e4   :  { %v3377_v24 = vpop.f32.mrf.mxu1  ;;  %v3305_v37 = vadd.f32 %v3304_v62, %v5668_v44 }
 0x2e5   :  { %v3469_v56 = vpack.c.bf16 %v3441_v22, %v3439_v51  ;;  %v3378_v38 = vadd.f32 %v3377_v24, %v3265_v46  ;;  %v3442_v11 = vmax.f32 %v3376_v28, 0.0  ;;  %v3308_v24 = vpop.f32.mrf.mxu0 }
 0x2e6   :  { %v3379_v14 = vpop.f32.mrf.mxu1 }
 0x2e7   :  { %v3380_v20 = vadd.f32 %v3379_v14, %v3267_v52  ;;  %3657 = vmatprep.mubr.bf16.mxu0 %v3469_v56  ;;  %v3443_v50 = vmax.f32 %v3378_v38, 0.0  ;;  %v3295_v52 = vadd.f32 %v5690_v39, %v5668_v44  ;;  %v3312_v28 = vpop.f32.mrf.mxu0 }
 0x2e8   :  { %v3381_v43 = vpop.f32.mrf.mxu1  ;;  %3658 = vmatmul.mubr.bf16.gmra.mxu0 %v3468_v19 }
 0x2e9   :  { %v3382_v6 = vadd.f32 %v3381_v43, %v3269_v29  ;;  %v3444_v8 = vmax.f32 %v3380_v20, 0.0  ;;  %v3299_v29 = vadd.f32 %v3298_v2, %v5668_v44 }
 0x2ea   :  { %v3385_v59 = vpop.f32.mrf.mxu1 }
 0x2eb   :  { %v3445_v34 = vmax.f32 %v3382_v6, 0.0  ;;  %v3470_v26 = vpack.c.bf16 %v3444_v8, %v3442_v11  ;;  %v3386_v21 = vadd.f32 %v3385_v59, %v3273_v61 }
 0x2ec   :  { %v3387_v40 = vpop.f32.mrf.mxu1 }
 0x2ed   :  { %v3471_v5 = vpack.c.bf16 %v3445_v34, %v3443_v50  ;;  %v3388_v63 = vadd.f32 %v3387_v40, %v3275_v27  ;;  %v3446_v33 = vmax.f32 %v3386_v21, 0.0  ;;  %v3314_v34 = vpop.f32.mrf.mxu0  ;;  %v3307_v27 = vadd.f32 %v3306_v25, %v5672_v48 }
 0x2ee   :  { %v3389_v23 = vpop.f32.mrf.mxu1 }
 0x2ef   :  { %v3390_v4 = vadd.f32 %v3389_v23, %v3277_v17  ;;  %3665 = vmatprep.mubr.bf16.mxu0 %v3471_v5  ;;  %v3447_v18 = vmax.f32 %v3388_v63, 0.0  ;;  %v3303_v17 = vadd.f32 %v3302_v9, %v5672_v48  ;;  %v3316_v63 = vpop.f32.mrf.mxu0  ;;  %v3315_v9 = vadd.f32 %v3314_v34, %v5668_v44 }
 0x2f0   :  { %v3391_v53 = vpop.f32.mrf.mxu1  ;;  %3666 = vmatmul.mubr.bf16.gmra.mxu0 %v3470_v26  ;;  %v3309_v26 = vadd.f32 %v3308_v24, %v5668_v44 }
 0x2f1   :  { %v3392_v10 = vadd.f32 %v3391_v53, %v3279_v55  ;;  %v3448_v30 = vmax.f32 %v3390_v4, 0.0 }
 0x2f2   :  { %v3395_v35 = vpop.f32.mrf.mxu1 }
 0x2f3   :  { %v3449_v45 = vmax.f32 %v3392_v10, 0.0  ;;  %v3472_v36 = vpack.c.bf16 %v3448_v30, %v3446_v33  ;;  %v3396_v7 = vadd.f32 %v3395_v35, %v3283_v13 }
 0x2f4   :  { %v3397_v0 = vpop.f32.mrf.mxu1 }
 0x2f5   :  { %v3473_v49 = vpack.c.bf16 %v3449_v45, %v3447_v18  ;;  %v3398_v31 = vadd.f32 %v3397_v0, %v3285_v12  ;;  %v3450_v46 = vmax.f32 %v3396_v7, 0.0  ;;  %v3318_v45 = vpop.f32.mrf.mxu0  ;;  %v3317_v0 = vadd.f32 %v3316_v63, %v5672_v48 }
 0x2f6   :  { %v3399_v3 = vpop.f32.mrf.mxu1 }
 0x2f7   :  { %v3400_v54 = vadd.f32 %v3399_v3, %v3287_v15  ;;  %3673 = vmatprep.mubr.bf16.mxu0 %v3473_v49  ;;  %v3451_v42 = vmax.f32 %v3398_v31, 0.0  ;;  %v3313_v15 = vadd.f32 %v3312_v28, %v5672_v48 }
 0x2f8   :  { %v3401_v57 = vpop.f32.mrf.mxu1  ;;  %3674 = vmatmul.mubr.bf16.gmra.mxu0 %v3472_v36  ;;  %v3319_v36 = vadd.f32 %v3318_v45, %v5668_v44  ;;  %v5729_v44 = vld [vmem:[%s5887_s6] ss:$0 sm:$0xff]  ;;  %s5118_s6 = smov [#allocation11]  }
 0x2f9   :  { %v3402_v41 = vadd.f32 %v3401_v57, %v3289_v58  ;;  %v3452_v51 = vmax.f32 %v3400_v54, 0.0  ;;  %s3879_s9 = sshll.u32 %s5118_s6, 4  ;;  %s3880_s9 = int_to_ptr.vmem [resolvable:$true] %s3879_s9 }
 0x2fa   :  { %v3405_v22 = vpop.f32.mrf.mxu1  ;;  %s5076_s10 = scalar_lea.vmem %s3880_s9, 2048  ;;  %p5081_p12 = scmp.lt.s32.totalorder %s3880_s9, %s3880_s9 }
 0x2fb   :  { %v3453_v60 = vmax.f32 %v3402_v41, 0.0  ;;  %v3474_v19 = vpack.c.bf16 %v3452_v51, %v3450_v46  ;;  %v3406_v43 = vadd.f32 %v3405_v22, %v3293_v16  ;;  %p5077_p11 = scmp.ne.s32.totalorder %s3880_s9, %s5076_s10  ;;  %p5082_p13 = scmp.lt.s32.totalorder %s5076_s10, %s5076_s10 }
 0x2fc   :  { %v3407_v32 = vpop.f32.mrf.mxu1 }
 0x2fd   :  { %v3475_v56 = vpack.c.bf16 %v3453_v60, %v3451_v42  ;;  %v3408_v38 = vadd.f32 %v3407_v32, %v3295_v52  ;;  %v3454_v11 = vmax.f32 %v3406_v43, 0.0  ;;  %p5083_p0 = por %p5082_p13, %p5081_p12 }
 0x2fe   :  { %v3409_v14 = vpop.f32.mrf.mxu1 }
 0x2ff   :  { %v3410_v20 = vadd.f32 %v3409_v14, %v3297_v47  ;;  %3681 = vmatprep.mubr.bf16.mxu1 %v3475_v56  ;;  %v3455_v50 = vmax.f32 %v3408_v38, 0.0  ;;  %p5084_p1 = pnand %p5083_p0, %p5077_p11 }
 0x300   :  { %v3411_v6 = vpop.f32.mrf.mxu1  ;;  %3682 = vmatmul.mubr.bf16.vlgmr.msra.gmra.mxu1 %v3474_v19 }
 0x301   :  { %v3412_v8 = vadd.f32 %v3411_v6, %v3299_v29  ;;  %v3456_v59 = vmax.f32 %v3410_v20, 0.0 }
 0x302   :  { %v3415_v39 = vpop.f32.mrf.mxu1 }
 0x303   :  { %v3457_v1 = vmax.f32 %v3412_v8, 0.0  ;;  %v3476_v5 = vpack.c.bf16 %v3456_v59, %v3454_v11  ;;  %v3416_v4 = vadd.f32 %v3415_v39, %v3303_v17 }
 0x304   :  { %v3417_v40 = vpop.f32.mrf.mxu1 }
 0x305   :  { %v3477_v2 = vpack.c.bf16 %v3457_v1, %v3455_v50  ;;  %v3418_v23 = vadd.f32 %v3417_v40, %v3305_v37  ;;  %v3458_v62 = vmax.f32 %v3416_v4, 0.0 }
 0x306   :  { %v3419_v61 = vpop.f32.mrf.mxu1 }
 0x307   :  { %v3420_v55 = vadd.f32 %v3419_v61, %v3307_v27  ;;  %3689 = vmatprep.mubr.bf16.mxu1 %v3477_v2  ;;  %v3459_v35 = vmax.f32 %v3418_v23, 0.0 }
 0x308   :  { %v3421_v21 = vpop.f32.mrf.mxu1  ;;  %3690 = vmatmul.mubr.bf16.gmra.mxu1 %v3476_v5 }
 0x309   :  { %v3422_v53 = vadd.f32 %v3421_v21, %v3309_v26  ;;  %v3460_v10 = vmax.f32 %v3420_v55, 0.0 }
 0x30a   :  { %v3425_v30 = vpop.f32.mrf.mxu1 }
 0x30b   :  { %v3461_v18 = vmax.f32 %v3422_v53, 0.0  ;;  %v3478_v49 = vpack.c.bf16 %v3460_v10, %v3458_v62  ;;  %v3426_v31 = vadd.f32 %v3425_v30, %v3313_v15 }
 0x30c   :  { %v3427_v33 = vpop.f32.mrf.mxu1 }
 0x30d   :  { %v3479_v12 = vpack.c.bf16 %v3461_v18, %v3459_v35  ;;  %v3428_v3 = vadd.f32 %v3427_v33, %v3315_v9  ;;  %v3462_v51 = vmax.f32 %v3426_v31, 0.0 }
 0x30e   :  { %v3429_v13 = vpop.f32.mrf.mxu1 }
 0x30f   :  { %v3430_v58 = vadd.f32 %v3429_v13, %v3317_v0  ;;  %3697 = vmatprep.mubr.bf16.mxu1 %v3479_v12  ;;  %v3463_v57 = vmax.f32 %v3428_v3, 0.0 }
 0x310   :  { %v3431_v54 = vpop.f32.mrf.mxu1  ;;  %3698 = vmatmul.mubr.bf16.gmra.mxu1 %v3478_v49 }
 0x311   :  { %v3432_v25 = vadd.f32 %v3431_v54, %v3319_v36  ;;  %v3464_v7 = vmax.f32 %v3430_v58, 0.0 }
 0x313   :  { %v3465_v41 = vmax.f32 %v3432_v25, 0.0  ;;  %v3480_v42 = vpack.c.bf16 %v3464_v7, %v3462_v51 }
 0x315   :  { %v3481_v22 = vpack.c.bf16 %v3465_v41, %v3463_v57 }
 0x317   :  { %3705 = vmatprep.mubr.bf16.mxu1 %v3481_v22 }
 0x318   :  { %3706 = vmatmul.mubr.bf16.gmra.mxu1 %v3480_v42 }
 0x3a0   :  { %v4270_v48 = vpop.f32.mrf.mxu0 }
 0x3a2   :  { %v4271_v60 = vpop.f32.mrf.mxu0 }
 0x3a3   :  { %v4272_v24 = vadd.f32 %v4271_v60, %v4270_v48 }
 0x3a4   :  { %v4273_v46 = vpop.f32.mrf.mxu0 }
 0x3a5   :  { %v5732_v32 = vadd.f32 %v4272_v24, %v5729_v44 }
 0x3a6   :  { %v4274_v52 = vpop.f32.mrf.mxu0 }
 0x3a7   :  { %v4275_v47 = vadd.f32 %v4274_v52, %v4273_v46  ;;  %3714 = vmax.xlane.f32.xlu0 %v5732_v32 }
 0x3a8   :  { %v4276_v56 = vpop.f32.mrf.mxu0 }
 0x3a9   :  { %v5736_v16 = vadd.f32 %v4275_v47, %v5729_v44 }
 0x3aa   :  { %v4277_v19 = vpop.f32.mrf.mxu0 }
 0x3ab   :  { %v4278_v14 = vadd.f32 %v4277_v19, %v4276_v56  ;;  %3716 = vmax.xlane.f32.xlu0 %v5736_v16 }
 0x3ac   :  { %v4279_v29 = vpop.f32.mrf.mxu0 }
 0x3ad   :  { %v5740_v38 = vadd.f32 %v4278_v14, %v5729_v44 }
 0x3ae   :  { %v4280_v20 = vpop.f32.mrf.mxu0 }
 0x3af   :  { %v4281_v28 = vadd.f32 %v4280_v20, %v4279_v29  ;;  %3718 = vmax.xlane.f32.xlu1 %v5740_v38 }
 0x3b0   :  { %v4282_v43 = vpop.f32.mrf.mxu0 }
 0x3b1   :  { %v5744_v6 = vadd.f32 %v4281_v28, %v5729_v44 }
 0x3b2   :  { %v4283_v8 = vpop.f32.mrf.mxu0 }
 0x3b3   :  { %v4284_v59 = vadd.f32 %v4283_v8, %v4282_v43  ;;  %3720 = vmax.xlane.f32.xlu1 %v5744_v6 }
 0x3b4   :  { %v4285_v39 = vpop.f32.mrf.mxu0 }
 0x3b5   :  { %v5748_v50 = vadd.f32 %v4284_v59, %v5729_v44 }
 0x3b6   :  { %v4286_v1 = vpop.f32.mrf.mxu0 }
 0x3b7   :  { %v4287_v34 = vadd.f32 %v4286_v1, %v4285_v39  ;;  %3722 = vmax.xlane.f32.xlu0 %v5748_v50 }
 0x3b8   :  { %v4288_v11 = vpop.f32.mrf.mxu0 }
 0x3b9   :  { %v5752_v40 = vadd.f32 %v4287_v34, %v5729_v44 }
 0x3ba   :  { %v4289_v37 = vpop.f32.mrf.mxu0 }
 0x3bb   :  { %v4290_v27 = vadd.f32 %v4289_v37, %v4288_v11  ;;  %3724 = vmax.xlane.f32.xlu1 %v5752_v40 }
 0x3bc   :  { %v4291_v2 = vpop.f32.mrf.mxu0 }
 0x3bd   :  { %v5756_v17 = vadd.f32 %v4290_v27, %v5729_v44 }
 0x3be   :  { %v4292_v5 = vpop.f32.mrf.mxu0 }
 0x3bf   :  { %v4293_v61 = vadd.f32 %v4292_v5, %v4291_v2  ;;  %3726 = vmax.xlane.f32.xlu0 %v5756_v17 }
 0x3c0   :  { %v4294_v26 = vpop.f32.mrf.mxu1 }
 0x3c1   :  { %v5760_v23 = vadd.f32 %v4293_v61, %v5729_v44 }
 0x3c2   :  { %v4295_v55 = vpop.f32.mrf.mxu1 }
 0x3c3   :  { %v4296_v63 = vadd.f32 %v4295_v55, %v4294_v26  ;;  %3728 = vmax.xlane.f32.xlu1 %v5760_v23 }
 0x3c4   :  { %v4297_v4 = vpop.f32.mrf.mxu1 }
 0x3c5   :  { %v5764_v21 = vadd.f32 %v4296_v63, %v5729_v44 }
 0x3c6   :  { %v4298_v53 = vpop.f32.mrf.mxu1 }
 0x3c7   :  { %v4299_v10 = vadd.f32 %v4298_v53, %v4297_v4  ;;  %3730 = vmax.xlane.f32.xlu0 %v5764_v21 }
 0x3c8   :  { %v4300_v30 = vpop.f32.mrf.mxu1 }
 0x3c9   :  { %v5768_v35 = vadd.f32 %v4299_v10, %v5729_v44 }
 0x3ca   :  { %v4301_v18 = vpop.f32.mrf.mxu1 }
 0x3cb   :  { %v4302_v45 = vadd.f32 %v4301_v18, %v4300_v30  ;;  %3732 = vmax.xlane.f32.xlu1 %v5768_v35 }
 0x3cc   :  { %v4303_v62 = vpop.f32.mrf.mxu1 }
 0x3cd   :  { %v5772_v33 = vadd.f32 %v4302_v45, %v5729_v44 }
 0x3ce   :  { %v4304_v9 = vpop.f32.mrf.mxu1 }
 0x3cf   :  { %v4305_v0 = vadd.f32 %v4304_v9, %v4303_v62  ;;  %3734 = vmax.xlane.f32.xlu0 %v5772_v33 }
 0x3d0   :  { %v4306_v12 = vpop.f32.mrf.mxu1 }
 0x3d1   :  { %v5776_v15 = vadd.f32 %v4305_v0, %v5729_v44 }
 0x3d2   :  { %v4307_v49 = vpop.f32.mrf.mxu1 }
 0x3d3   :  { %v4308_v13 = vadd.f32 %v4307_v49, %v4306_v12  ;;  %3736 = vmax.xlane.f32.xlu1 %v5776_v15 }
 0x3d4   :  { %v4309_v36 = vpop.f32.mrf.mxu1 }
 0x3d5   :  { %v5780_v3 = vadd.f32 %v4308_v13, %v5729_v44 }
 0x3d6   :  { %v4310_v58 = vpop.f32.mrf.mxu1 }
 0x3d7   :  { %v4311_v31 = vadd.f32 %v4310_v58, %v4309_v36  ;;  %3738 = vmax.xlane.f32.xlu0 %v5780_v3 }
 0x3d8   :  { %v4312_v54 = vpop.f32.mrf.mxu1 }
 0x3d9   :  { %v5784_v25 = vadd.f32 %v4311_v31, %v5729_v44 }
 0x3da   :  { %v4313_v7 = vpop.f32.mrf.mxu1 }
 0x3db   :  { %v4314_v57 = vadd.f32 %v4313_v7, %v4312_v54  ;;  %3740 = vmax.xlane.f32.xlu1 %v5784_v25 }
 0x3dc   :  { %v4315_v41 = vpop.f32.mrf.mxu1 }
 0x3dd   :  { %v5788_v51 = vadd.f32 %v4314_v57, %v5729_v44 }
 0x3de   :  { %v4316_v22 = vpop.f32.mrf.mxu1 }
 0x3df   :  { %v4317_v42 = vadd.f32 %v4316_v22, %v4315_v41  ;;  %3742 = vmax.xlane.f32.xlu0 %v5788_v51 }
 0x3e1   :  { %v5792_v48 = vadd.f32 %v4317_v42, %v5729_v44 }
 0x3e3   :  { %3744 = vmax.xlane.f32.xlu1 %v5792_v48 }
 0x430   :  { %v3715_v60 = vpop.xlane.xlu0 %3714 }
 0x431   :  { %v3746_v24 = vsub.f32 %v5732_v32, %v3715_v60 }
 0x433   :  { %v3762_v46 = vmul.f32 1.442695, %v3746_v24 }
 0x434   :  { %v3717_v52 = vpop.xlane.xlu0 %3716 }
 0x435   :  { %4877 = vpow2.f32 %v3762_v46  ;;  %v3747_v47 = vsub.f32 %v5736_v16, %v3717_v52 }
 0x437   :  { %v3764_v56 = vmul.f32 1.442695, %v3747_v47 }
 0x438   :  { %v3719_v19 = vpop.xlane.xlu1 %3718 }
 0x439   :  { %4879 = vpow2.f32 %v3764_v56  ;;  %v3748_v14 = vsub.f32 %v5740_v38, %v3719_v19 }
 0x43b   :  { %v3766_v29 = vmul.f32 1.442695, %v3748_v14 }
 0x43c   :  { %v3721_v20 = vpop.xlane.xlu1 %3720 }
 0x43d   :  { %4881 = vpow2.f32 %v3766_v29  ;;  %v3749_v44 = vsub.f32 %v5744_v6, %v3721_v20 }
 0x43f   :  { %v3768_v28 = vmul.f32 1.442695, %v3749_v44 }
 0x440   :  { %v3723_v43 = vpop.xlane.xlu0 %3722 }
 0x441   :  { %4883 = vpow2.f32 %v3768_v28  ;;  %v3750_v32 = vsub.f32 %v5748_v50, %v3723_v43 }
 0x442   :  { %v5800_v8 = vpop.eup %4877 }
 0x443   :  { %v3770_v59 = vmul.f32 1.442695, %v3750_v32  ;;  %3794 = vadd.xlane.f32.xlu0 %v5800_v8 }
 0x444   :  { %v3725_v16 = vpop.xlane.xlu1 %3724 }
 0x445   :  { %4885 = vpow2.f32 %v3770_v59  ;;  %v3751_v39 = vsub.f32 %v5752_v40, %v3725_v16 }
 0x446   :  { %v5804_v38 = vpop.eup %4879 }
 0x447   :  { %v3772_v1 = vmul.f32 1.442695, %v3751_v39  ;;  %3796 = vadd.xlane.f32.xlu1 %v5804_v38 }
 0x448   :  { %v3727_v6 = vpop.xlane.xlu0 %3726 }
 0x449   :  { %4887 = vpow2.f32 %v3772_v1  ;;  %v3752_v34 = vsub.f32 %v5756_v17, %v3727_v6 }
 0x44a   :  { %v5808_v11 = vpop.eup %4881 }
 0x44b   :  { %v3774_v50 = vmul.f32 1.442695, %v3752_v34  ;;  %3798 = vadd.xlane.f32.xlu0 %v5808_v11 }
 0x44c   :  { %v3729_v37 = vpop.xlane.xlu1 %3728 }
 0x44d   :  { %4889 = vpow2.f32 %v3774_v50  ;;  %v3753_v27 = vsub.f32 %v5760_v23, %v3729_v37 }
 0x44e   :  { %v5812_v2 = vpop.eup %4883 }
 0x44f   :  { %v3776_v40 = vmul.f32 1.442695, %v3753_v27  ;;  %3800 = vadd.xlane.f32.xlu1 %v5812_v2 }
 0x450   :  { %v3731_v5 = vpop.xlane.xlu0 %3730 }
 0x451   :  { %4891 = vpow2.f32 %v3776_v40  ;;  %v3754_v61 = vsub.f32 %v5764_v21, %v3731_v5 }
 0x452   :  { %v5816_v26 = vpop.eup %4885 }
 0x453   :  { %v3778_v17 = vmul.f32 1.442695, %v3754_v61  ;;  %3802 = vadd.xlane.f32.xlu0 %v5816_v26 }
 0x454   :  { %v3733_v55 = vpop.xlane.xlu1 %3732 }
 0x455   :  { %4893 = vpow2.f32 %v3778_v17  ;;  %v3755_v63 = vsub.f32 %v5768_v35, %v3733_v55 }
 0x456   :  { %v5820_v4 = vpop.eup %4887 }
 0x457   :  { %v3780_v23 = vmul.f32 1.442695, %v3755_v63  ;;  %3804 = vadd.xlane.f32.xlu1 %v5820_v4 }
 0x458   :  { %v3735_v53 = vpop.xlane.xlu0 %3734 }
 0x459   :  { %4895 = vpow2.f32 %v3780_v23  ;;  %v3756_v10 = vsub.f32 %v5772_v33, %v3735_v53 }
 0x45a   :  { %v5824_v30 = vpop.eup %4889 }
 0x45b   :  { %v3782_v21 = vmul.f32 1.442695, %v3756_v10  ;;  %3806 = vadd.xlane.f32.xlu0 %v5824_v30 }
 0x45c   :  { %v3737_v18 = vpop.xlane.xlu1 %3736 }
 0x45d   :  { %4897 = vpow2.f32 %v3782_v21  ;;  %v3757_v45 = vsub.f32 %v5776_v15, %v3737_v18 }
 0x45e   :  { %v5828_v62 = vpop.eup %4891 }
 0x45f   :  { %v3784_v35 = vmul.f32 1.442695, %v3757_v45  ;;  %3808 = vadd.xlane.f32.xlu1 %v5828_v62 }
 0x460   :  { %v3739_v9 = vpop.xlane.xlu0 %3738 }
 0x461   :  { %4899 = vpow2.f32 %v3784_v35  ;;  %v3758_v0 = vsub.f32 %v5780_v3, %v3739_v9 }
 0x462   :  { %v5832_v12 = vpop.eup %4893 }
 0x463   :  { %v3786_v33 = vmul.f32 1.442695, %v3758_v0  ;;  %3810 = vadd.xlane.f32.xlu0 %v5832_v12 }
 0x464   :  { %v3741_v49 = vpop.xlane.xlu1 %3740 }
 0x465   :  { %4901 = vpow2.f32 %v3786_v33  ;;  %v3759_v13 = vsub.f32 %v5784_v25, %v3741_v49 }
 0x466   :  { %v5836_v36 = vpop.eup %4895 }
 0x467   :  { %v3788_v15 = vmul.f32 1.442695, %v3759_v13  ;;  %3812 = vadd.xlane.f32.xlu1 %v5836_v36 }
 0x468   :  { %v3743_v58 = vpop.xlane.xlu0 %3742 }
 0x469   :  { %4903 = vpow2.f32 %v3788_v15  ;;  %v3760_v31 = vsub.f32 %v5788_v51, %v3743_v58 }
 0x46a   :  { %v5840_v54 = vpop.eup %4897 }
 0x46b   :  { %v3790_v3 = vmul.f32 1.442695, %v3760_v31  ;;  %3814 = vadd.xlane.f32.xlu0 %v5840_v54 }
 0x46c   :  { %v3745_v7 = vpop.xlane.xlu1 %3744 }
 0x46d   :  { %4905 = vpow2.f32 %v3790_v3  ;;  %v3761_v57 = vsub.f32 %v5792_v48, %v3745_v7 }
 0x46e   :  { %v5844_v41 = vpop.eup %4899 }
 0x46f   :  { %v3792_v25 = vmul.f32 1.442695, %v3761_v57  ;;  %3816 = vadd.xlane.f32.xlu1 %v5844_v41 }
 0x471   :  { %4907 = vpow2.f32 %v3792_v25 }
 0x472   :  { %v5847_v22 = vpop.eup %4901 }
 0x473   :  { %3818 = vadd.xlane.f32.xlu0 %v5847_v22 }
 0x476   :  { %v5850_v51 = vpop.eup %4903 }
 0x477   :  { %3820 = vadd.xlane.f32.xlu1 %v5850_v51 }
 0x47a   :  { %v5853_v42 = vpop.eup %4905 }
 0x47b   :  { %3822 = vadd.xlane.f32.xlu0 %v5853_v42 }
 0x47e   :  { %v5856_v60 = vpop.eup %4907 }
 0x47f   :  { %3824 = vadd.xlane.f32.xlu1 %v5856_v60 }
 0x4cc   :  { %v3795_v48 = vpop.xlane.xlu0 %3794 }
 0x4cd   :  { %4909 = vrcp.f32 %v3795_v48 }
 0x4d0   :  { %v3797_v24 = vpop.xlane.xlu1 %3796 }
 0x4d1   :  { %4911 = vrcp.f32 %v3797_v24 }
 0x4d4   :  { %v3799_v46 = vpop.xlane.xlu0 %3798 }
 0x4d5   :  { %4913 = vrcp.f32 %v3799_v46 }
 0x4d8   :  { %v3801_v52 = vpop.xlane.xlu1 %3800 }
 0x4d9   :  { %4915 = vrcp.f32 %v3801_v52 }
 0x4da   :  { %v4910_v47 = vpop.eup %4909 }
 0x4db   :  { %v3842_v56 = vmul.f32 %v4910_v47, %v5800_v8 }
 0x4dc   :  { %v3803_v19 = vpop.xlane.xlu0 %3802 }
 0x4dd   :  { %3858 = vst [vmem:[#allocation11] sm:$0xff] %v3842_v56  ;;  %4917 = vrcp.f32 %v3803_v19 }
 0x4de   :  { %v4912_v14 = vpop.eup %4911 }
 0x4df   :  { %v3843_v29 = vmul.f32 %v4912_v14, %v5804_v38 }
 0x4e0   :  { %v3805_v20 = vpop.xlane.xlu1 %3804 }
 0x4e1   :  { %3859 = vst [vmem:[#allocation11 + $0x8] sm:$0xff] %v3843_v29  ;;  %4919 = vrcp.f32 %v3805_v20 }
 0x4e2   :  { %v4914_v44 = vpop.eup %4913 }
 0x4e3   :  { %v3844_v28 = vmul.f32 %v4914_v44, %v5808_v11 }
 0x4e4   :  { %v3807_v43 = vpop.xlane.xlu0 %3806 }
 0x4e5   :  { %3860 = vst [vmem:[#allocation11 + $0x10] sm:$0xff] %v3844_v28  ;;  %4921 = vrcp.f32 %v3807_v43 }
 0x4e6   :  { %v4916_v32 = vpop.eup %4915 }
 0x4e7   :  { %v3845_v59 = vmul.f32 %v4916_v32, %v5812_v2 }
 0x4e8   :  { %v3809_v16 = vpop.xlane.xlu1 %3808 }
 0x4e9   :  { %3861 = vst [vmem:[#allocation11 + $0x18] sm:$0xff] %v3845_v59  ;;  %4923 = vrcp.f32 %v3809_v16 }
 0x4ea   :  { %v4918_v8 = vpop.eup %4917 }
 0x4eb   :  { %v3846_v39 = vmul.f32 %v4918_v8, %v5816_v26 }
 0x4ec   :  { %v3811_v1 = vpop.xlane.xlu0 %3810 }
 0x4ed   :  { %3862 = vst [vmem:[#allocation11 + $0x20] sm:$0xff] %v3846_v39  ;;  %4925 = vrcp.f32 %v3811_v1 }
 0x4ee   :  { %v4920_v38 = vpop.eup %4919 }
 0x4ef   :  { %v3847_v6 = vmul.f32 %v4920_v38, %v5820_v4 }
 0x4f0   :  { %v3813_v34 = vpop.xlane.xlu1 %3812 }
 0x4f1   :  { %3863 = vst [vmem:[#allocation11 + $0x28] sm:$0xff] %v3847_v6  ;;  %4927 = vrcp.f32 %v3813_v34 }
 0x4f2   :  { %v4922_v11 = vpop.eup %4921 }
 0x4f3   :  { %v3848_v50 = vmul.f32 %v4922_v11, %v5824_v30 }
 0x4f4   :  { %v3815_v37 = vpop.xlane.xlu0 %3814 }
 0x4f5   :  { %3864 = vst [vmem:[#allocation11 + $0x30] sm:$0xff] %v3848_v50  ;;  %4929 = vrcp.f32 %v3815_v37 }
 0x4f6   :  { %v4924_v27 = vpop.eup %4923 }
 0x4f7   :  { %v3849_v2 = vmul.f32 %v4924_v27, %v5828_v62 }
 0x4f8   :  { %v3817_v40 = vpop.xlane.xlu1 %3816 }
 0x4f9   :  { %3865 = vst [vmem:[#allocation11 + $0x38] sm:$0xff] %v3849_v2  ;;  %4931 = vrcp.f32 %v3817_v40 }
 0x4fa   :  { %v4926_v5 = vpop.eup %4925 }
 0x4fb   :  { %v3850_v61 = vmul.f32 %v4926_v5, %v5832_v12 }
 0x4fc   :  { %v3819_v26 = vpop.xlane.xlu0 %3818 }
 0x4fd   :  { %3866 = vst [vmem:[#allocation11 + $0x40] sm:$0xff] %v3850_v61  ;;  %4933 = vrcp.f32 %v3819_v26 }
 0x4fe   :  { %v4928_v17 = vpop.eup %4927 }
 0x4ff   :  { %v3851_v55 = vmul.f32 %v4928_v17, %v5836_v36 }
 0x500   :  { %v3821_v63 = vpop.xlane.xlu1 %3820 }
 0x501   :  { %3867 = vst [vmem:[#allocation11 + $0x48] sm:$0xff] %v3851_v55  ;;  %4935 = vrcp.f32 %v3821_v63 }
 0x502   :  { %v4930_v4 = vpop.eup %4929 }
 0x503   :  { %v3852_v23 = vmul.f32 %v4930_v4, %v5840_v54 }
 0x504   :  { %v3823_v53 = vpop.xlane.xlu0 %3822 }
 0x505   :  { %3868 = vst [vmem:[#allocation11 + $0x50] sm:$0xff] %v3852_v23  ;;  %4937 = vrcp.f32 %v3823_v53 }
 0x506   :  { %v4932_v10 = vpop.eup %4931 }
 0x507   :  { %v3853_v30 = vmul.f32 %v4932_v10, %v5844_v41 }
 0x508   :  { %v3825_v21 = vpop.xlane.xlu1 %3824 }
 0x509   :  { %3869 = vst [vmem:[#allocation11 + $0x58] sm:$0xff] %v3853_v30  ;;  %4939 = vrcp.f32 %v3825_v21 }
 0x50a   :  { %v4934_v18 = vpop.eup %4933 }
 0x50b   :  { %v3854_v45 = vmul.f32 %v4934_v18, %v5847_v22 }
 0x50d   :  { %3870 = vst [vmem:[#allocation11 + $0x60] sm:$0xff] %v3854_v45 }
 0x50e   :  { %v4936_v62 = vpop.eup %4935 }
 0x50f   :  { %v3855_v35 = vmul.f32 %v4936_v62, %v5850_v51 }
 0x511   :  { %3871 = vst [vmem:[#allocation11 + $0x68] sm:$0xff] %v3855_v35 }
 0x512   :  { %v4938_v9 = vpop.eup %4937 }
 0x513   :  { %v3856_v0 = vmul.f32 %v4938_v9, %v5853_v42 }
 0x515   :  { %3872 = vst [vmem:[#allocation11 + $0x70] sm:$0xff] %v3856_v0 }
 0x516   :  { %v4940_v12 = vpop.eup %4939 }
 0x517   :  { %v3857_v33 = vmul.f32 %v4940_v12, %v5856_v60 }
 0x519   :  { %3873 = vst [vmem:[#allocation11 + $0x78] sm:$0xff] %v3857_v33 }
 0x51a   :  { %5087 = shalt.err (!%p5084_p1)
}
 0x51b   :  { %3885 = dma.vmem_to_hbm [thread:$0]  %s3880_s9, 2048, %s5888_s7, [#allocation4], %s5108_s11, %s5108_s11, %s5109_s12  }
 0x51c   :  { %5102 = dma.done.wait [#allocation4], 2048  }
 0x51d   :  { %5103 = vsyncadd [#allocation4], 4294965248 }
 0x51e   :  { %3889 = vsyncpa [#allocation3], 1 }
 0x51f   :  { %3890 = vsyncpa [#allocation6], 1 }
 0x520   :  { %3891 = vsyncpa [#allocation9], 1 }
 0x521   :  { %3892 = vsyncpa [#allocation4], 1 }

</bundles_post_ra>
